<compile_context>
chip_gen: v7x
topology: tpu7x:2x2x1
jax: 0.10.0
libtpu: 0.0.40
codegen_flags: <defaults>
</compile_context>

<pallas_src>
import functools
import numpy as np

import jax
import jax.numpy as jnp
from jax import lax
from jax.experimental import pallas as pl
from jax.experimental.pallas import tpu as pltpu


def _round_up(x, m):
    return ((x + m - 1) // m) * m


def _pad_to(x, shape):
    return jnp.pad(x, [(0, s - d) for d, s in zip(x.shape, shape)])


# ---------------------------------------------------------------------------
# Fused kernel: one grid step == Bt batch elements, whole sequence.
# ---------------------------------------------------------------------------

def fconv_kernel(fc_ref, att_ref, xt_ref,
                 wfc_ref, watt_ref, wrr_ref, wbx_ref, wlog_ref, wconv_ref,
                 brow_ref, bbx_ref, blog_ref, bconv_ref,
                 o_ref, *, n_att, vocab_p1, b_alpha):
    f32 = jnp.float32
    bf16 = jnp.bfloat16
    BT, TP, RP = xt_ref.shape
    NP, ATTP = att_ref.shape[1], att_ref.shape[2]
    VP = o_ref.shape[2]
    M = BT * TP
    L = wconv_ref.shape[0]
    NEG = -1e30

    def mm(a, w):  # bf16 operands, f32 accumulation on the MXU
        return jnp.dot(a.astype(bf16), w, preferred_element_type=f32)

    def relu(x):
        return jnp.maximum(x, 0.0)

    def brow(i):   # packed [1, RP] f32 bias/vector rows
        return brow_ref[i:i + 1, :]

    # ---- fc / att embedding (Linear + ReLU; dropout = identity) ------------
    fcE = relu(mm(fc_ref[...].reshape(BT, -1), wfc_ref[...]) + brow(0))   # [BT, RP]
    attE = relu(mm(att_ref[...].reshape(BT * NP, ATTP), watt_ref[...]) + brow(1))
    row_n = lax.broadcasted_iota(jnp.int32, (BT, NP, RP), 1).reshape(BT * NP, RP)
    attE = jnp.where(row_n < n_att, attE, 0.0)                            # [BT*NP, RP]
    attE3 = attE.reshape(BT, NP, RP)

    # ---- input encoding: i2h(xt) + w2h(fcE)  (biases pre-summed in row 2) --
    xt = xt_ref[...].reshape(M, RP)
    w2h = mm(fcE, wrr_ref[1])                                             # [BT, RP]
    h = mm(xt, wrr_ref[0]) + brow(2)                                      # [M, RP]
    h = (h.reshape(BT, TP, RP) + w2h[:, None, :]).reshape(M, RP)

    # ---- 5 causal conv-GLU residual blocks (per-tap K=RP matmuls) ----------
    # within-batch time index (roll wrap across batch boundaries is masked)
    t_idx = lax.broadcasted_iota(jnp.int32, (BT, TP, RP), 1).reshape(M, RP)
    for l in range(L):
        x1 = jnp.where(t_idx >= 1, pltpu.roll(h, 1, axis=0), 0.0)         # x[t-1]
        x2 = jnp.where(t_idx >= 2, pltpu.roll(h, 2, axis=0), 0.0)         # x[t-2]
        y = (mm(x2, wconv_ref[l, 0]) + mm(x1, wconv_ref[l, 1])
             + mm(h, wconv_ref[l, 2]) + bconv_ref[l])                     # [M, 2*RP]
        gate = 1.0 / (1.0 + jnp.exp(-y[:, RP:]))                          # exact sigmoid
        h = relu(y[:, :RP] * gate) + h

    # ---- attention over att locations + language token (fully batched) -----
    h3 = h.reshape(BT, TP, RP)
    aA = relu(mm(attE, wrr_ref[2]) + brow(3)).reshape(BT, NP, RP)         # att_transA
    aBlan = mm(h, wbx_ref[...]) + bbx_ref[...]                            # [M, RP+128]
    aB = relu(aBlan[:, :RP]).reshape(BT, TP, RP)                          # att_transB
    lan = aBlan[:, RP:RP + 1].reshape(BT, TP, 1)                          # beta(h)

    comb = jnp.tanh(aB[:, :, None, :] + aA[:, None, :, :])                # [BT,TP,NP,RP]
    alpha = brow(5).reshape(1, 1, 1, RP)
    att_sc = jnp.sum(comb * alpha, axis=-1) + b_alpha                     # [BT, TP, NP]

    col_n = lax.broadcasted_iota(jnp.int32, (BT, TP, NP), 2)
    scores = jnp.where(col_n < n_att, att_sc,
                       jnp.where(col_n == n_att, lan, NEG))
    scores = scores - jnp.max(scores, axis=-1, keepdims=True)
    e = jnp.exp(scores)
    attn = e / jnp.sum(e, axis=-1, keepdims=True)                         # exact softmax

    spatial = jnp.einsum('btn,bnr->btr', attn.astype(bf16), attE3.astype(bf16),
                         preferred_element_type=f32)                      # [BT,TP,RP]
    spatial = spatial + attn[:, :, n_att:n_att + 1] * h3                  # language slot
    att_out = relu(mm(spatial.reshape(M, RP), wrr_ref[3]) + brow(4))      # attout_embed

    # ---- logit + log_softmax (padded vocab columns masked) ------------------
    logits = mm(att_out, wlog_ref[...]) + blog_ref[...]                   # [M, VP]
    col_v = lax.broadcasted_iota(jnp.int32, (M, VP), 1)
    logits = jnp.where(col_v < vocab_p1, logits, NEG)
    z = logits - jnp.max(logits, axis=-1, keepdims=True)
    lse = jnp.log(jnp.sum(jnp.exp(z), axis=-1, keepdims=True))
    o_ref[...] = (z - lse).reshape(BT, TP, VP)


# ---------------------------------------------------------------------------
# Forward pass wrapper (embedding gathers + padding are glue; everything else
# runs in the single fused kernel).
# ---------------------------------------------------------------------------

def fconv_forward(pp, fc_feats, att_feats, seq, *, bt_max=16):
    B = fc_feats.shape[0]
    N = att_feats.shape[1]
    T = seq.shape[1] - 1
    RP, VP = pp["RP"], pp["VP"]
    FCP, ATTP = pp["FCP"], pp["ATTP"]
    vocab_p1 = pp["vocab_p1"]
    assert 1 <= T <= pp["pos_table"].shape[0], "pos_embed supports at most 20 steps"

    # batch tile: largest divisor of B <= bt_max, keeping >= 2 grid steps (v7x)
    Bt = max(c for c in range(1, min(B, bt_max) + 1) if B % c == 0)
    if B // Bt == 1 and Bt > 1:
        smaller = [c for c in range(1, Bt) if B % c == 0]
        Bt = max(smaller) if smaller else Bt

    TP = _round_up(T, 8)
    if Bt * TP < 16:
        TP = _round_up(T, 16)        # fill bf16 sublane packing when M is tiny
    NP = _round_up(N + 1, 8)         # +1 column for the language-token score

    # pad runtime inputs to lane-dense shapes
    fc_p = _pad_to(fc_feats, (B, FCP)).reshape(B, 1, FCP)
    att_p = _pad_to(att_feats, (B, NP, ATTP))

    # token + positional embeddings (gathers stay in plain JAX); embed has ReLU
    tok = jnp.maximum(jnp.take(pp["embed_table"], seq[:, :T], axis=0), 0.0)  # [B,T,RP]
    pos = pp["pos_table"][:T]                                                 # [T, RP]
    xt = _pad_to(tok + pos[None], (B, TP, RP))

    weights = [pp["w_fc"], pp["w_att"], pp["w_rr"], pp["w_bext"], pp["w_logit"],
               pp["conv_w"], pp["b_rows"], pp["b_bext"], pp["b_logit"], pp["conv_b"]]

    def wspec(arr):
        # grid-invariant weights; Pallas re-uses the resident block each step.
        # (pipeline_mode=pl.Buffered(1) would additionally single-buffer them.)
        nd = arr.ndim
        return pl.BlockSpec(tuple(arr.shape), lambda b, _nd=nd: (0,) * _nd)

    in_specs = ([pl.BlockSpec((Bt, 1, FCP), lambda b: (b, 0, 0)),
                 pl.BlockSpec((Bt, NP, ATTP), lambda b: (b, 0, 0)),
                 pl.BlockSpec((Bt, TP, RP), lambda b: (b, 0, 0))]
                + [wspec(w) for w in weights])
    out_spec = pl.BlockSpec((Bt, TP, VP), lambda b: (b, 0, 0))

    # explicit VMEM budget (v7x has 64 MiB total / 32 MiB default scoped)
    def nbytes(a):
        return int(np.prod(a.shape)) * a.dtype.itemsize
    M = Bt * TP
    w_bytes = sum(nbytes(w) for w in weights)
    data_bytes = (Bt * FCP + Bt * NP * ATTP + Bt * TP * RP + Bt * TP * VP) * 4
    live_bytes = (M * NP * RP + 2 * M * VP + 12 * M * RP) * 4
    vmem_limit = int(min(max(int(1.5 * (2 * w_bytes + 2 * data_bytes + live_bytes)),
                             16 << 20), 48 << 20))

    kernel = functools.partial(fconv_kernel, n_att=N, vocab_p1=vocab_p1,
                               b_alpha=pp["b_alpha"])
    out = pl.pallas_call(
        kernel,
        out_shape=jax.ShapeDtypeStruct((B, TP, VP), jnp.float32),
        grid_spec=pltpu.PrefetchScalarGridSpec(
            num_scalar_prefetch=0,
            grid=(B // Bt,),
            in_specs=in_specs,
            out_specs=out_spec),
        compiler_params=pltpu.CompilerParams(
            dimension_semantics=("parallel",),
            vmem_limit_bytes=vmem_limit),
    )(fc_p, att_p, xt, *weights)

    return out[:, :T, :vocab_p1]                                   # [B, T, V+1]


# ---------------------------------------------------------------------------
# Deterministic parameter initialization (logical sizes) + packing (pad/cast).
# ---------------------------------------------------------------------------

def init_params(key, *, vocab_size, rnn_size, fc_dim, att_dim, n_conv_blocks=5):
    """Linear weights stored [in, out], biases [1, out]; conv weights [3, C, 2C]."""
    R = rnn_size
    keys = iter(jax.random.split(key, 64))

    def uni(k, shape, scale):
        return jax.random.uniform(k, shape, jnp.float32, -scale, scale)

    def lin(fin, fout):
        s = 1.0 / np.sqrt(fin)
        return (uni(next(keys), (fin, fout), s), uni(next(keys), (1, fout), s))

    p = {}
    p["embed_table"] = 0.1 * jax.random.normal(next(keys), (vocab_size + 1, R), jnp.float32)
    p["pos_table"] = 0.1 * jax.random.normal(next(keys), (20, R), jnp.float32)
    p["fc_embed"] = lin(fc_dim, R)
    p["att_embed"] = lin(att_dim, R)
    p["w2h"] = lin(R, R)
    p["i2h"] = lin(R, R)
    p["att_transA"] = lin(R, R)
    p["att_transB"] = lin(R, R)
    p["attout"] = lin(R, R)
    p["logit"] = lin(R, vocab_size + 1)
    s = 1.0 / np.sqrt(R)
    p["alpha"] = (uni(next(keys), (1, R), s), uni(next(keys), (1, 1), s))
    p["beta"] = (uni(next(keys), (1, R), s), uni(next(keys), (1, 1), s))
    sconv = 1.0 / np.sqrt(3 * R)     # effective (weight-normed) conv weights
    p["conv_blocks"] = [(uni(next(keys), (3, R, 2 * R), sconv),
                         uni(next(keys), (1, 2 * R), sconv))
                        for _ in range(n_conv_blocks)]
    p["dims"] = dict(vocab_size=vocab_size, rnn_size=R, fc_dim=fc_dim, att_dim=att_dim)
    return p


def pack_params(p):
    d = p["dims"]
    R = d["rnn_size"]
    V1 = d["vocab_size"] + 1
    RP = _round_up(R, 128)
    VP = _round_up(V1, 128)
    FCP = _round_up(d["fc_dim"], 128)
    ATTP = _round_up(d["att_dim"], 128)
    bf16 = jnp.bfloat16

    def pad_w(w, fin_p, fout_p):
        return _pad_to(w, (fin_p, fout_p)).astype(bf16)

    pp = {"RP": RP, "VP": VP, "FCP": FCP, "ATTP": ATTP, "vocab_p1": V1}
    pp["embed_table"] = _pad_to(p["embed_table"], (p["embed_table"].shape[0], RP))
    pp["pos_table"] = _pad_to(p["pos_table"], (p["pos_table"].shape[0], RP))

    pp["w_fc"] = pad_w(p["fc_embed"][0], FCP, RP)
    pp["w_att"] = pad_w(p["att_embed"][0], ATTP, RP)
    pp["w_rr"] = jnp.stack([pad_w(p["i2h"][0], RP, RP),         # 0: i2h
                            pad_w(p["w2h"][0], RP, RP),         # 1: w2h
                            pad_w(p["att_transA"][0], RP, RP),  # 2: att_transA
                            pad_w(p["attout"][0], RP, RP)])     # 3: attout
    pp["w_logit"] = pad_w(p["logit"][0], RP, VP)

    # att_transB weight with beta folded in as an extra 128-lane output block
    wbx = jnp.zeros((RP, RP + 128), jnp.float32)
    wbx = wbx.at[:R, :R].set(p["att_transB"][0])
    wbx = wbx.at[:R, RP].set(p["beta"][0][0])
    pp["w_bext"] = wbx.astype(bf16)
    bbx = jnp.zeros((1, RP + 128), jnp.float32)
    bbx = bbx.at[:, :R].set(p["att_transB"][1])
    bbx = bbx.at[0, RP].set(p["beta"][1][0, 0])
    pp["b_bext"] = bbx

    # small [1,R] bias / alpha vectors packed into one [8, RP] array
    b_rows = jnp.zeros((8, RP), jnp.float32)
    b_rows = b_rows.at[0, :R].set(p["fc_embed"][1][0])
    b_rows = b_rows.at[1, :R].set(p["att_embed"][1][0])
    b_rows = b_rows.at[2, :R].set(p["i2h"][1][0] + p["w2h"][1][0])   # pre-summed
    b_rows = b_rows.at[3, :R].set(p["att_transA"][1][0])
    b_rows = b_rows.at[4, :R].set(p["attout"][1][0])
    b_rows = b_rows.at[5, :R].set(p["alpha"][0][0])                  # alpha weight
    pp["b_rows"] = b_rows
    pp["b_alpha"] = float(p["alpha"][1][0, 0])
    pp["b_logit"] = _pad_to(p["logit"][1], (1, VP))

    # conv blocks: [L, 3, RP, 2*RP] bf16 (tap-major), GLU halves at [:RP]/[RP:]
    conv_w, conv_b = [], []
    for (w, b) in p["conv_blocks"]:
        wp = jnp.zeros((3, RP, 2 * RP), jnp.float32)
        wp = wp.at[:, :R, :R].set(w[:, :, :R])          # f1 half
        wp = wp.at[:, :R, RP:RP + R].set(w[:, :, R:])   # f2 half
        bp = jnp.zeros((1, 2 * RP), jnp.float32)
        bp = bp.at[:, :R].set(b[:, :R])
        bp = bp.at[:, RP:RP + R].set(b[:, R:])
        conv_w.append(wp.astype(bf16))
        conv_b.append(bp)
    pp["conv_w"] = jnp.stack(conv_w)     # [L, 3, RP, 2*RP] bf16
    pp["conv_b"] = jnp.stack(conv_b)     # [L, 1, 2*RP]    f32
    return pp


# ---------------------------------------------------------------------------

if __name__ == "__main__":
    B, R, FC, ATT, N, VOCAB, SEQT = 2, 32, 48, 40, 6, 20, 8

    key = jax.random.PRNGKey(0)
    kp, kfc, katt, kseq = jax.random.split(key, 4)

    params = init_params(kp, vocab_size=VOCAB, rnn_size=R, fc_dim=FC, att_dim=ATT)
    packed = pack_params(params)

    fc_feats = jax.random.normal(kfc, (B, FC), jnp.float32)
    att_feats = jax.random.normal(katt, (B, N, ATT), jnp.float32)
    # tokens in [1, VOCAB] so the PyTorch early-break never triggers
    seq = jax.random.randint(kseq, (B, SEQT), 1, VOCAB + 1, dtype=jnp.int32)

    out = fconv_forward(packed, fc_feats, att_feats, seq)
    out = jax.block_until_ready(out)

    assert out.shape == (B, SEQT - 1, VOCAB + 1), out.shape
    assert bool(jnp.all(jnp.isfinite(out)))
    print("KERNEL_OK")
</pallas_src>

<mosaic_0001>
module attributes {stable_mosaic.version = 11 : i64} {
  func.func @fconv_kernel(%arg0: i32, %arg1: memref<1x1x128xf32, #tpu.memory_space<vmem>>, %arg2: memref<1x8x128xf32, #tpu.memory_space<vmem>>, %arg3: memref<1x16x128xf32, #tpu.memory_space<vmem>>, %arg4: memref<128x128xbf16, #tpu.memory_space<vmem>>, %arg5: memref<128x128xbf16, #tpu.memory_space<vmem>>, %arg6: memref<4x128x128xbf16, #tpu.memory_space<vmem>>, %arg7: memref<128x256xbf16, #tpu.memory_space<vmem>>, %arg8: memref<128x128xbf16, #tpu.memory_space<vmem>>, %arg9: memref<5x3x128x256xbf16, #tpu.memory_space<vmem>>, %arg10: memref<8x128xf32, #tpu.memory_space<vmem>>, %arg11: memref<1x256xf32, #tpu.memory_space<vmem>>, %arg12: memref<1x128xf32, #tpu.memory_space<vmem>>, %arg13: memref<5x1x256xf32, #tpu.memory_space<vmem>>, %arg14: memref<1x16x128xf32, #tpu.memory_space<vmem>>) attributes {dimension_semantics = [#tpu.dimension_semantics<parallel>], iteration_bounds = array<i64: 2>, scalar_prefetch = 0 : i64, scratch_operands = 0 : i64, tpu.core_type = #tpu.core_type<tc>, window_params = [{transform_indices = @transform_0, window_bounds = array<i64: 1, 1, 128>}, {transform_indices = @transform_1, window_bounds = array<i64: 1, 8, 128>}, {transform_indices = @transform_2, window_bounds = array<i64: 1, 16, 128>}, {pipeline_mode = #tpu.pipeline_mode<synchronous>, transform_indices = @transform_3, window_bounds = array<i64: 128, 128>}, {pipeline_mode = #tpu.pipeline_mode<synchronous>, transform_indices = @transform_4, window_bounds = array<i64: 128, 128>}, {pipeline_mode = #tpu.pipeline_mode<synchronous>, transform_indices = @transform_5, window_bounds = array<i64: 4, 128, 128>}, {pipeline_mode = #tpu.pipeline_mode<synchronous>, transform_indices = @transform_6, window_bounds = array<i64: 128, 256>}, {pipeline_mode = #tpu.pipeline_mode<synchronous>, transform_indices = @transform_7, window_bounds = array<i64: 128, 128>}, {pipeline_mode = #tpu.pipeline_mode<synchronous>, transform_indices = @transform_8, window_bounds = array<i64: 5, 3, 128, 256>}, {pipeline_mode = #tpu.pipeline_mode<synchronous>, transform_indices = @transform_9, window_bounds = array<i64: 8, 128>}, {pipeline_mode = #tpu.pipeline_mode<synchronous>, transform_indices = @transform_10, window_bounds = array<i64: 1, 256>}, {pipeline_mode = #tpu.pipeline_mode<synchronous>, transform_indices = @transform_11, window_bounds = array<i64: 1, 128>}, {pipeline_mode = #tpu.pipeline_mode<synchronous>, transform_indices = @transform_12, window_bounds = array<i64: 5, 1, 256>}, {transform_indices = @transform_13, window_bounds = array<i64: 1, 16, 128>}]} {
    %c0 = arith.constant 0 : index
    %c0_0 = arith.constant 0 : index
    %c0_1 = arith.constant 0 : index
    %0 = vector.load %arg1[%c0, %c0_0, %c0_1] : memref<1x1x128xf32, #tpu.memory_space<vmem>>, vector<1x1x128xf32>
    %1 = vector.shape_cast %0 : vector<1x1x128xf32> to vector<1x128xf32>
    %c0_2 = arith.constant 0 : index
    %c0_3 = arith.constant 0 : index
    %2 = vector.load %arg4[%c0_2, %c0_3] : memref<128x128xbf16, #tpu.memory_space<vmem>>, vector<128x128xbf16>
    %3 = arith.truncf %1 : vector<1x128xf32> to vector<1x128xbf16>
    %cst = arith.constant dense<0.000000e+00> : vector<1x128xf32>
    %4 = tpu.matmul %3, %2, %cst {dimension_numbers = #tpu.dot_dimension_numbers<[1], [0], [0], [1], [0, 0, 1, 1], [], []>} : vector<1x128xbf16>, vector<128x128xbf16>, vector<1x128xf32> -> vector<1x128xf32>
    %c0_4 = arith.constant 0 : index
    %c0_5 = arith.constant 0 : index
    %5 = vector.load %arg10[%c0_4, %c0_5] : memref<8x128xf32, #tpu.memory_space<vmem>>, vector<1x128xf32>
    %6 = arith.addf %4, %5 : vector<1x128xf32>
    %cst_6 = arith.constant 0.000000e+00 : f32
    %7 = vector.broadcast %cst_6 : f32 to vector<1x128xf32>
    %8 = arith.maximumf %6, %7 : vector<1x128xf32>
    %c0_7 = arith.constant 0 : index
    %c0_8 = arith.constant 0 : index
    %c0_9 = arith.constant 0 : index
    %9 = vector.load %arg2[%c0_7, %c0_8, %c0_9] : memref<1x8x128xf32, #tpu.memory_space<vmem>>, vector<1x8x128xf32>
    %10 = vector.shape_cast %9 : vector<1x8x128xf32> to vector<8x128xf32>
    %c0_10 = arith.constant 0 : index
    %c0_11 = arith.constant 0 : index
    %11 = vector.load %arg5[%c0_10, %c0_11] : memref<128x128xbf16, #tpu.memory_space<vmem>>, vector<128x128xbf16>
    %12 = arith.truncf %10 : vector<8x128xf32> to vector<8x128xbf16>
    %cst_12 = arith.constant dense<0.000000e+00> : vector<8x128xf32>
    %13 = tpu.matmul %12, %11, %cst_12 {dimension_numbers = #tpu.dot_dimension_numbers<[1], [0], [0], [1], [0, 0, 1, 1], [], []>} : vector<8x128xbf16>, vector<128x128xbf16>, vector<8x128xf32> -> vector<8x128xf32>
    %c1 = arith.constant 1 : index
    %c0_13 = arith.constant 0 : index
    %14 = vector.load %arg10[%c1, %c0_13] : memref<8x128xf32, #tpu.memory_space<vmem>>, vector<1x128xf32>
    %15 = vector.broadcast %14 : vector<1x128xf32> to vector<8x128xf32>
    %16 = arith.addf %13, %15 : vector<8x128xf32>
    %cst_14 = arith.constant 0.000000e+00 : f32
    %17 = vector.broadcast %cst_14 : f32 to vector<8x128xf32>
    %18 = arith.maximumf %16, %17 : vector<8x128xf32>
    %19 = tpu.iota {dimensions = array<i32: 1>} : vector<1x8x128xi32>
    %20 = vector.shape_cast %19 : vector<1x8x128xi32> to vector<8x128xi32>
    %c6_i32 = arith.constant 6 : i32
    %21 = vector.broadcast %c6_i32 : i32 to vector<8x128xi32>
    %22 = arith.cmpi slt, %20, %21 : vector<8x128xi32>
    %cst_15 = arith.constant 0.000000e+00 : f32
    %23 = vector.broadcast %cst_15 : f32 to vector<8x128xf32>
    %24 = arith.select %22, %18, %23 : vector<8x128xi1>, vector<8x128xf32>
    %25 = vector.shape_cast %24 : vector<8x128xf32> to vector<1x8x128xf32>
    %c0_16 = arith.constant 0 : index
    %c0_17 = arith.constant 0 : index
    %c0_18 = arith.constant 0 : index
    %26 = vector.load %arg3[%c0_16, %c0_17, %c0_18] : memref<1x16x128xf32, #tpu.memory_space<vmem>>, vector<1x16x128xf32>
    %27 = vector.shape_cast %26 : vector<1x16x128xf32> to vector<16x128xf32>
    %c1_19 = arith.constant 1 : index
    %c0_20 = arith.constant 0 : index
    %c0_21 = arith.constant 0 : index
    %28 = vector.load %arg6[%c1_19, %c0_20, %c0_21] : memref<4x128x128xbf16, #tpu.memory_space<vmem>>, vector<1x128x128xbf16>
    %29 = vector.shape_cast %28 : vector<1x128x128xbf16> to vector<128x128xbf16>
    %30 = arith.truncf %8 : vector<1x128xf32> to vector<1x128xbf16>
    %cst_22 = arith.constant dense<0.000000e+00> : vector<1x128xf32>
    %31 = tpu.matmul %30, %29, %cst_22 {dimension_numbers = #tpu.dot_dimension_numbers<[1], [0], [0], [1], [0, 0, 1, 1], [], []>} : vector<1x128xbf16>, vector<128x128xbf16>, vector<1x128xf32> -> vector<1x128xf32>
    %c0_23 = arith.constant 0 : index
    %c0_24 = arith.constant 0 : index
    %c0_25 = arith.constant 0 : index
    %32 = vector.load %arg6[%c0_23, %c0_24, %c0_25] : memref<4x128x128xbf16, #tpu.memory_space<vmem>>, vector<1x128x128xbf16>
    %33 = vector.shape_cast %32 : vector<1x128x128xbf16> to vector<128x128xbf16>
    %34 = arith.truncf %27 : vector<16x128xf32> to vector<16x128xbf16>
    %cst_26 = arith.constant dense<0.000000e+00> : vector<16x128xf32>
    %35 = tpu.matmul %34, %33, %cst_26 {dimension_numbers = #tpu.dot_dimension_numbers<[1], [0], [0], [1], [0, 0, 1, 1], [], []>} : vector<16x128xbf16>, vector<128x128xbf16>, vector<16x128xf32> -> vector<16x128xf32>
    %c2 = arith.constant 2 : index
    %c0_27 = arith.constant 0 : index
    %36 = vector.load %arg10[%c2, %c0_27] : memref<8x128xf32, #tpu.memory_space<vmem>>, vector<1x128xf32>
    %37 = vector.broadcast %36 : vector<1x128xf32> to vector<16x128xf32>
    %38 = arith.addf %35, %37 : vector<16x128xf32>
    %39 = vector.shape_cast %38 : vector<16x128xf32> to vector<1x16x128xf32>
    %40 = vector.shape_cast %31 : vector<1x128xf32> to vector<1x1x128xf32>
    %41 = vector.broadcast %40 : vector<1x1x128xf32> to vector<1x16x128xf32>
    %42 = arith.addf %39, %41 : vector<1x16x128xf32>
    %43 = vector.shape_cast %42 : vector<1x16x128xf32> to vector<16x128xf32>
    %44 = tpu.iota {dimensions = array<i32: 1>} : vector<1x16x128xi32>
    %45 = vector.shape_cast %44 : vector<1x16x128xi32> to vector<16x128xi32>
    %c1_i32 = arith.constant 1 : i32
    %46 = vector.broadcast %c1_i32 : i32 to vector<16x128xi32>
    %47 = arith.cmpi sge, %45, %46 : vector<16x128xi32>
    %c1_i32_28 = arith.constant 1 : i32
    %48 = tpu.dynamic_rotate %43 by %c1_i32_28 dim 0 : vector<16x128xf32>, i32 -> vector<16x128xf32>
    %cst_29 = arith.constant 0.000000e+00 : f32
    %49 = vector.broadcast %cst_29 : f32 to vector<16x128xf32>
    %50 = arith.select %47, %48, %49 : vector<16x128xi1>, vector<16x128xf32>
    %c2_i32 = arith.constant 2 : i32
    %51 = vector.broadcast %c2_i32 : i32 to vector<16x128xi32>
    %52 = arith.cmpi sge, %45, %51 : vector<16x128xi32>
    %c2_i32_30 = arith.constant 2 : i32
    %53 = tpu.dynamic_rotate %43 by %c2_i32_30 dim 0 : vector<16x128xf32>, i32 -> vector<16x128xf32>
    %cst_31 = arith.constant 0.000000e+00 : f32
    %54 = vector.broadcast %cst_31 : f32 to vector<16x128xf32>
    %55 = arith.select %52, %53, %54 : vector<16x128xi1>, vector<16x128xf32>
    %c0_32 = arith.constant 0 : index
    %c0_33 = arith.constant 0 : index
    %c0_34 = arith.constant 0 : index
    %c0_35 = arith.constant 0 : index
    %56 = vector.load %arg9[%c0_32, %c0_33, %c0_34, %c0_35] : memref<5x3x128x256xbf16, #tpu.memory_space<vmem>>, vector<1x1x128x256xbf16>
    %57 = vector.shape_cast %56 : vector<1x1x128x256xbf16> to vector<128x256xbf16>
    %58 = arith.truncf %55 : vector<16x128xf32> to vector<16x128xbf16>
    %cst_36 = arith.constant dense<0.000000e+00> : vector<16x256xf32>
    %59 = tpu.matmul %58, %57, %cst_36 {dimension_numbers = #tpu.dot_dimension_numbers<[1], [0], [0], [1], [0, 0, 1, 1], [], []>} : vector<16x128xbf16>, vector<128x256xbf16>, vector<16x256xf32> -> vector<16x256xf32>
    %c0_37 = arith.constant 0 : index
    %c1_38 = arith.constant 1 : index
    %c0_39 = arith.constant 0 : index
    %c0_40 = arith.constant 0 : index
    %60 = vector.load %arg9[%c0_37, %c1_38, %c0_39, %c0_40] : memref<5x3x128x256xbf16, #tpu.memory_space<vmem>>, vector<1x1x128x256xbf16>
    %61 = vector.shape_cast %60 : vector<1x1x128x256xbf16> to vector<128x256xbf16>
    %62 = arith.truncf %50 : vector<16x128xf32> to vector<16x128xbf16>
    %cst_41 = arith.constant dense<0.000000e+00> : vector<16x256xf32>
    %63 = tpu.matmul %62, %61, %cst_41 {dimension_numbers = #tpu.dot_dimension_numbers<[1], [0], [0], [1], [0, 0, 1, 1], [], []>} : vector<16x128xbf16>, vector<128x256xbf16>, vector<16x256xf32> -> vector<16x256xf32>
    %64 = arith.addf %59, %63 : vector<16x256xf32>
    %c0_42 = arith.constant 0 : index
    %c2_43 = arith.constant 2 : index
    %c0_44 = arith.constant 0 : index
    %c0_45 = arith.constant 0 : index
    %65 = vector.load %arg9[%c0_42, %c2_43, %c0_44, %c0_45] : memref<5x3x128x256xbf16, #tpu.memory_space<vmem>>, vector<1x1x128x256xbf16>
    %66 = vector.shape_cast %65 : vector<1x1x128x256xbf16> to vector<128x256xbf16>
    %67 = arith.truncf %43 : vector<16x128xf32> to vector<16x128xbf16>
    %cst_46 = arith.constant dense<0.000000e+00> : vector<16x256xf32>
    %68 = tpu.matmul %67, %66, %cst_46 {dimension_numbers = #tpu.dot_dimension_numbers<[1], [0], [0], [1], [0, 0, 1, 1], [], []>} : vector<16x128xbf16>, vector<128x256xbf16>, vector<16x256xf32> -> vector<16x256xf32>
    %69 = arith.addf %64, %68 : vector<16x256xf32>
    %c0_47 = arith.constant 0 : index
    %c0_48 = arith.constant 0 : index
    %c0_49 = arith.constant 0 : index
    %70 = vector.load %arg13[%c0_47, %c0_48, %c0_49] : memref<5x1x256xf32, #tpu.memory_space<vmem>>, vector<1x1x256xf32>
    %71 = vector.shape_cast %70 : vector<1x1x256xf32> to vector<1x256xf32>
    %72 = vector.broadcast %71 : vector<1x256xf32> to vector<16x256xf32>
    %73 = arith.addf %69, %72 : vector<16x256xf32>
    %74 = vector.extract_strided_slice %73 {offsets = [0, 128], sizes = [16, 128], strides = [1, 1]} : vector<16x256xf32> to vector<16x128xf32>
    %cst_50 = arith.constant 0.000000e+00 : f32
    %75 = vector.broadcast %cst_50 : f32 to vector<16x128xf32>
    %76 = arith.subf %75, %74 : vector<16x128xf32>
    %77 = math.exp %76 : vector<16x128xf32>
    %cst_51 = arith.constant 1.000000e+00 : f32
    %78 = vector.broadcast %cst_51 : f32 to vector<16x128xf32>
    %79 = arith.addf %78, %77 : vector<16x128xf32>
    %cst_52 = arith.constant 1.000000e+00 : f32
    %80 = vector.broadcast %cst_52 : f32 to vector<16x128xf32>
    %81 = arith.divf %80, %79 : vector<16x128xf32>
    %82 = vector.extract_strided_slice %73 {offsets = [0, 0], sizes = [16, 128], strides = [1, 1]} : vector<16x256xf32> to vector<16x128xf32>
    %83 = arith.mulf %82, %81 : vector<16x128xf32>
    %cst_53 = arith.constant 0.000000e+00 : f32
    %84 = vector.broadcast %cst_53 : f32 to vector<16x128xf32>
    %85 = arith.maximumf %83, %84 : vector<16x128xf32>
    %86 = arith.addf %85, %43 : vector<16x128xf32>
    %c1_i32_54 = arith.constant 1 : i32
    %87 = vector.broadcast %c1_i32_54 : i32 to vector<16x128xi32>
    %88 = arith.cmpi sge, %45, %87 : vector<16x128xi32>
    %c1_i32_55 = arith.constant 1 : i32
    %89 = tpu.dynamic_rotate %86 by %c1_i32_55 dim 0 : vector<16x128xf32>, i32 -> vector<16x128xf32>
    %cst_56 = arith.constant 0.000000e+00 : f32
    %90 = vector.broadcast %cst_56 : f32 to vector<16x128xf32>
    %91 = arith.select %88, %89, %90 : vector<16x128xi1>, vector<16x128xf32>
    %c2_i32_57 = arith.constant 2 : i32
    %92 = vector.broadcast %c2_i32_57 : i32 to vector<16x128xi32>
    %93 = arith.cmpi sge, %45, %92 : vector<16x128xi32>
    %c2_i32_58 = arith.constant 2 : i32
    %94 = tpu.dynamic_rotate %86 by %c2_i32_58 dim 0 : vector<16x128xf32>, i32 -> vector<16x128xf32>
    %cst_59 = arith.constant 0.000000e+00 : f32
    %95 = vector.broadcast %cst_59 : f32 to vector<16x128xf32>
    %96 = arith.select %93, %94, %95 : vector<16x128xi1>, vector<16x128xf32>
    %c1_60 = arith.constant 1 : index
    %c0_61 = arith.constant 0 : index
    %c0_62 = arith.constant 0 : index
    %c0_63 = arith.constant 0 : index
    %97 = vector.load %arg9[%c1_60, %c0_61, %c0_62, %c0_63] : memref<5x3x128x256xbf16, #tpu.memory_space<vmem>>, vector<1x1x128x256xbf16>
    %98 = vector.shape_cast %97 : vector<1x1x128x256xbf16> to vector<128x256xbf16>
    %99 = arith.truncf %96 : vector<16x128xf32> to vector<16x128xbf16>
    %cst_64 = arith.constant dense<0.000000e+00> : vector<16x256xf32>
    %100 = tpu.matmul %99, %98, %cst_64 {dimension_numbers = #tpu.dot_dimension_numbers<[1], [0], [0], [1], [0, 0, 1, 1], [], []>} : vector<16x128xbf16>, vector<128x256xbf16>, vector<16x256xf32> -> vector<16x256xf32>
    %c1_65 = arith.constant 1 : index
    %c1_66 = arith.constant 1 : index
    %c0_67 = arith.constant 0 : index
    %c0_68 = arith.constant 0 : index
    %101 = vector.load %arg9[%c1_65, %c1_66, %c0_67, %c0_68] : memref<5x3x128x256xbf16, #tpu.memory_space<vmem>>, vector<1x1x128x256xbf16>
    %102 = vector.shape_cast %101 : vector<1x1x128x256xbf16> to vector<128x256xbf16>
    %103 = arith.truncf %91 : vector<16x128xf32> to vector<16x128xbf16>
    %cst_69 = arith.constant dense<0.000000e+00> : vector<16x256xf32>
    %104 = tpu.matmul %103, %102, %cst_69 {dimension_numbers = #tpu.dot_dimension_numbers<[1], [0], [0], [1], [0, 0, 1, 1], [], []>} : vector<16x128xbf16>, vector<128x256xbf16>, vector<16x256xf32> -> vector<16x256xf32>
    %105 = arith.addf %100, %104 : vector<16x256xf32>
    %c1_70 = arith.constant 1 : index
    %c2_71 = arith.constant 2 : index
    %c0_72 = arith.constant 0 : index
    %c0_73 = arith.constant 0 : index
    %106 = vector.load %arg9[%c1_70, %c2_71, %c0_72, %c0_73] : memref<5x3x128x256xbf16, #tpu.memory_space<vmem>>, vector<1x1x128x256xbf16>
    %107 = vector.shape_cast %106 : vector<1x1x128x256xbf16> to vector<128x256xbf16>
    %108 = arith.truncf %86 : vector<16x128xf32> to vector<16x128xbf16>
    %cst_74 = arith.constant dense<0.000000e+00> : vector<16x256xf32>
    %109 = tpu.matmul %108, %107, %cst_74 {dimension_numbers = #tpu.dot_dimension_numbers<[1], [0], [0], [1], [0, 0, 1, 1], [], []>} : vector<16x128xbf16>, vector<128x256xbf16>, vector<16x256xf32> -> vector<16x256xf32>
    %110 = arith.addf %105, %109 : vector<16x256xf32>
    %c1_75 = arith.constant 1 : index
    %c0_76 = arith.constant 0 : index
    %c0_77 = arith.constant 0 : index
    %111 = vector.load %arg13[%c1_75, %c0_76, %c0_77] : memref<5x1x256xf32, #tpu.memory_space<vmem>>, vector<1x1x256xf32>
    %112 = vector.shape_cast %111 : vector<1x1x256xf32> to vector<1x256xf32>
    %113 = vector.broadcast %112 : vector<1x256xf32> to vector<16x256xf32>
    %114 = arith.addf %110, %113 : vector<16x256xf32>
    %115 = vector.extract_strided_slice %114 {offsets = [0, 128], sizes = [16, 128], strides = [1, 1]} : vector<16x256xf32> to vector<16x128xf32>
    %cst_78 = arith.constant 0.000000e+00 : f32
    %116 = vector.broadcast %cst_78 : f32 to vector<16x128xf32>
    %117 = arith.subf %116, %115 : vector<16x128xf32>
    %118 = math.exp %117 : vector<16x128xf32>
    %cst_79 = arith.constant 1.000000e+00 : f32
    %119 = vector.broadcast %cst_79 : f32 to vector<16x128xf32>
    %120 = arith.addf %119, %118 : vector<16x128xf32>
    %cst_80 = arith.constant 1.000000e+00 : f32
    %121 = vector.broadcast %cst_80 : f32 to vector<16x128xf32>
    %122 = arith.divf %121, %120 : vector<16x128xf32>
    %123 = vector.extract_strided_slice %114 {offsets = [0, 0], sizes = [16, 128], strides = [1, 1]} : vector<16x256xf32> to vector<16x128xf32>
    %124 = arith.mulf %123, %122 : vector<16x128xf32>
    %cst_81 = arith.constant 0.000000e+00 : f32
    %125 = vector.broadcast %cst_81 : f32 to vector<16x128xf32>
    %126 = arith.maximumf %124, %125 : vector<16x128xf32>
    %127 = arith.addf %126, %86 : vector<16x128xf32>
    %c1_i32_82 = arith.constant 1 : i32
    %128 = vector.broadcast %c1_i32_82 : i32 to vector<16x128xi32>
    %129 = arith.cmpi sge, %45, %128 : vector<16x128xi32>
    %c1_i32_83 = arith.constant 1 : i32
    %130 = tpu.dynamic_rotate %127 by %c1_i32_83 dim 0 : vector<16x128xf32>, i32 -> vector<16x128xf32>
    %cst_84 = arith.constant 0.000000e+00 : f32
    %131 = vector.broadcast %cst_84 : f32 to vector<16x128xf32>
    %132 = arith.select %129, %130, %131 : vector<16x128xi1>, vector<16x128xf32>
    %c2_i32_85 = arith.constant 2 : i32
    %133 = vector.broadcast %c2_i32_85 : i32 to vector<16x128xi32>
    %134 = arith.cmpi sge, %45, %133 : vector<16x128xi32>
    %c2_i32_86 = arith.constant 2 : i32
    %135 = tpu.dynamic_rotate %127 by %c2_i32_86 dim 0 : vector<16x128xf32>, i32 -> vector<16x128xf32>
    %cst_87 = arith.constant 0.000000e+00 : f32
    %136 = vector.broadcast %cst_87 : f32 to vector<16x128xf32>
    %137 = arith.select %134, %135, %136 : vector<16x128xi1>, vector<16x128xf32>
    %c2_88 = arith.constant 2 : index
    %c0_89 = arith.constant 0 : index
    %c0_90 = arith.constant 0 : index
    %c0_91 = arith.constant 0 : index
    %138 = vector.load %arg9[%c2_88, %c0_89, %c0_90, %c0_91] : memref<5x3x128x256xbf16, #tpu.memory_space<vmem>>, vector<1x1x128x256xbf16>
    %139 = vector.shape_cast %138 : vector<1x1x128x256xbf16> to vector<128x256xbf16>
    %140 = arith.truncf %137 : vector<16x128xf32> to vector<16x128xbf16>
    %cst_92 = arith.constant dense<0.000000e+00> : vector<16x256xf32>
    %141 = tpu.matmul %140, %139, %cst_92 {dimension_numbers = #tpu.dot_dimension_numbers<[1], [0], [0], [1], [0, 0, 1, 1], [], []>} : vector<16x128xbf16>, vector<128x256xbf16>, vector<16x256xf32> -> vector<16x256xf32>
    %c2_93 = arith.constant 2 : index
    %c1_94 = arith.constant 1 : index
    %c0_95 = arith.constant 0 : index
    %c0_96 = arith.constant 0 : index
    %142 = vector.load %arg9[%c2_93, %c1_94, %c0_95, %c0_96] : memref<5x3x128x256xbf16, #tpu.memory_space<vmem>>, vector<1x1x128x256xbf16>
    %143 = vector.shape_cast %142 : vector<1x1x128x256xbf16> to vector<128x256xbf16>
    %144 = arith.truncf %132 : vector<16x128xf32> to vector<16x128xbf16>
    %cst_97 = arith.constant dense<0.000000e+00> : vector<16x256xf32>
    %145 = tpu.matmul %144, %143, %cst_97 {dimension_numbers = #tpu.dot_dimension_numbers<[1], [0], [0], [1], [0, 0, 1, 1], [], []>} : vector<16x128xbf16>, vector<128x256xbf16>, vector<16x256xf32> -> vector<16x256xf32>
    %146 = arith.addf %141, %145 : vector<16x256xf32>
    %c2_98 = arith.constant 2 : index
    %c2_99 = arith.constant 2 : index
    %c0_100 = arith.constant 0 : index
    %c0_101 = arith.constant 0 : index
    %147 = vector.load %arg9[%c2_98, %c2_99, %c0_100, %c0_101] : memref<5x3x128x256xbf16, #tpu.memory_space<vmem>>, vector<1x1x128x256xbf16>
    %148 = vector.shape_cast %147 : vector<1x1x128x256xbf16> to vector<128x256xbf16>
    %149 = arith.truncf %127 : vector<16x128xf32> to vector<16x128xbf16>
    %cst_102 = arith.constant dense<0.000000e+00> : vector<16x256xf32>
    %150 = tpu.matmul %149, %148, %cst_102 {dimension_numbers = #tpu.dot_dimension_numbers<[1], [0], [0], [1], [0, 0, 1, 1], [], []>} : vector<16x128xbf16>, vector<128x256xbf16>, vector<16x256xf32> -> vector<16x256xf32>
    %151 = arith.addf %146, %150 : vector<16x256xf32>
    %c2_103 = arith.constant 2 : index
    %c0_104 = arith.constant 0 : index
    %c0_105 = arith.constant 0 : index
    %152 = vector.load %arg13[%c2_103, %c0_104, %c0_105] : memref<5x1x256xf32, #tpu.memory_space<vmem>>, vector<1x1x256xf32>
    %153 = vector.shape_cast %152 : vector<1x1x256xf32> to vector<1x256xf32>
    %154 = vector.broadcast %153 : vector<1x256xf32> to vector<16x256xf32>
    %155 = arith.addf %151, %154 : vector<16x256xf32>
    %156 = vector.extract_strided_slice %155 {offsets = [0, 128], sizes = [16, 128], strides = [1, 1]} : vector<16x256xf32> to vector<16x128xf32>
    %cst_106 = arith.constant 0.000000e+00 : f32
    %157 = vector.broadcast %cst_106 : f32 to vector<16x128xf32>
    %158 = arith.subf %157, %156 : vector<16x128xf32>
    %159 = math.exp %158 : vector<16x128xf32>
    %cst_107 = arith.constant 1.000000e+00 : f32
    %160 = vector.broadcast %cst_107 : f32 to vector<16x128xf32>
    %161 = arith.addf %160, %159 : vector<16x128xf32>
    %cst_108 = arith.constant 1.000000e+00 : f32
    %162 = vector.broadcast %cst_108 : f32 to vector<16x128xf32>
    %163 = arith.divf %162, %161 : vector<16x128xf32>
    %164 = vector.extract_strided_slice %155 {offsets = [0, 0], sizes = [16, 128], strides = [1, 1]} : vector<16x256xf32> to vector<16x128xf32>
    %165 = arith.mulf %164, %163 : vector<16x128xf32>
    %cst_109 = arith.constant 0.000000e+00 : f32
    %166 = vector.broadcast %cst_109 : f32 to vector<16x128xf32>
    %167 = arith.maximumf %165, %166 : vector<16x128xf32>
    %168 = arith.addf %167, %127 : vector<16x128xf32>
    %c1_i32_110 = arith.constant 1 : i32
    %169 = vector.broadcast %c1_i32_110 : i32 to vector<16x128xi32>
    %170 = arith.cmpi sge, %45, %169 : vector<16x128xi32>
    %c1_i32_111 = arith.constant 1 : i32
    %171 = tpu.dynamic_rotate %168 by %c1_i32_111 dim 0 : vector<16x128xf32>, i32 -> vector<16x128xf32>
    %cst_112 = arith.constant 0.000000e+00 : f32
    %172 = vector.broadcast %cst_112 : f32 to vector<16x128xf32>
    %173 = arith.select %170, %171, %172 : vector<16x128xi1>, vector<16x128xf32>
    %c2_i32_113 = arith.constant 2 : i32
    %174 = vector.broadcast %c2_i32_113 : i32 to vector<16x128xi32>
    %175 = arith.cmpi sge, %45, %174 : vector<16x128xi32>
    %c2_i32_114 = arith.constant 2 : i32
    %176 = tpu.dynamic_rotate %168 by %c2_i32_114 dim 0 : vector<16x128xf32>, i32 -> vector<16x128xf32>
    %cst_115 = arith.constant 0.000000e+00 : f32
    %177 = vector.broadcast %cst_115 : f32 to vector<16x128xf32>
    %178 = arith.select %175, %176, %177 : vector<16x128xi1>, vector<16x128xf32>
    %c3 = arith.constant 3 : index
    %c0_116 = arith.constant 0 : index
    %c0_117 = arith.constant 0 : index
    %c0_118 = arith.constant 0 : index
    %179 = vector.load %arg9[%c3, %c0_116, %c0_117, %c0_118] : memref<5x3x128x256xbf16, #tpu.memory_space<vmem>>, vector<1x1x128x256xbf16>
    %180 = vector.shape_cast %179 : vector<1x1x128x256xbf16> to vector<128x256xbf16>
    %181 = arith.truncf %178 : vector<16x128xf32> to vector<16x128xbf16>
    %cst_119 = arith.constant dense<0.000000e+00> : vector<16x256xf32>
    %182 = tpu.matmul %181, %180, %cst_119 {dimension_numbers = #tpu.dot_dimension_numbers<[1], [0], [0], [1], [0, 0, 1, 1], [], []>} : vector<16x128xbf16>, vector<128x256xbf16>, vector<16x256xf32> -> vector<16x256xf32>
    %c3_120 = arith.constant 3 : index
    %c1_121 = arith.constant 1 : index
    %c0_122 = arith.constant 0 : index
    %c0_123 = arith.constant 0 : index
    %183 = vector.load %arg9[%c3_120, %c1_121, %c0_122, %c0_123] : memref<5x3x128x256xbf16, #tpu.memory_space<vmem>>, vector<1x1x128x256xbf16>
    %184 = vector.shape_cast %183 : vector<1x1x128x256xbf16> to vector<128x256xbf16>
    %185 = arith.truncf %173 : vector<16x128xf32> to vector<16x128xbf16>
    %cst_124 = arith.constant dense<0.000000e+00> : vector<16x256xf32>
    %186 = tpu.matmul %185, %184, %cst_124 {dimension_numbers = #tpu.dot_dimension_numbers<[1], [0], [0], [1], [0, 0, 1, 1], [], []>} : vector<16x128xbf16>, vector<128x256xbf16>, vector<16x256xf32> -> vector<16x256xf32>
    %187 = arith.addf %182, %186 : vector<16x256xf32>
    %c3_125 = arith.constant 3 : index
    %c2_126 = arith.constant 2 : index
    %c0_127 = arith.constant 0 : index
    %c0_128 = arith.constant 0 : index
    %188 = vector.load %arg9[%c3_125, %c2_126, %c0_127, %c0_128] : memref<5x3x128x256xbf16, #tpu.memory_space<vmem>>, vector<1x1x128x256xbf16>
    %189 = vector.shape_cast %188 : vector<1x1x128x256xbf16> to vector<128x256xbf16>
    %190 = arith.truncf %168 : vector<16x128xf32> to vector<16x128xbf16>
    %cst_129 = arith.constant dense<0.000000e+00> : vector<16x256xf32>
    %191 = tpu.matmul %190, %189, %cst_129 {dimension_numbers = #tpu.dot_dimension_numbers<[1], [0], [0], [1], [0, 0, 1, 1], [], []>} : vector<16x128xbf16>, vector<128x256xbf16>, vector<16x256xf32> -> vector<16x256xf32>
    %192 = arith.addf %187, %191 : vector<16x256xf32>
    %c3_130 = arith.constant 3 : index
    %c0_131 = arith.constant 0 : index
    %c0_132 = arith.constant 0 : index
    %193 = vector.load %arg13[%c3_130, %c0_131, %c0_132] : memref<5x1x256xf32, #tpu.memory_space<vmem>>, vector<1x1x256xf32>
    %194 = vector.shape_cast %193 : vector<1x1x256xf32> to vector<1x256xf32>
    %195 = vector.broadcast %194 : vector<1x256xf32> to vector<16x256xf32>
    %196 = arith.addf %192, %195 : vector<16x256xf32>
    %197 = vector.extract_strided_slice %196 {offsets = [0, 128], sizes = [16, 128], strides = [1, 1]} : vector<16x256xf32> to vector<16x128xf32>
    %cst_133 = arith.constant 0.000000e+00 : f32
    %198 = vector.broadcast %cst_133 : f32 to vector<16x128xf32>
    %199 = arith.subf %198, %197 : vector<16x128xf32>
    %200 = math.exp %199 : vector<16x128xf32>
    %cst_134 = arith.constant 1.000000e+00 : f32
    %201 = vector.broadcast %cst_134 : f32 to vector<16x128xf32>
    %202 = arith.addf %201, %200 : vector<16x128xf32>
    %cst_135 = arith.constant 1.000000e+00 : f32
    %203 = vector.broadcast %cst_135 : f32 to vector<16x128xf32>
    %204 = arith.divf %203, %202 : vector<16x128xf32>
    %205 = vector.extract_strided_slice %196 {offsets = [0, 0], sizes = [16, 128], strides = [1, 1]} : vector<16x256xf32> to vector<16x128xf32>
    %206 = arith.mulf %205, %204 : vector<16x128xf32>
    %cst_136 = arith.constant 0.000000e+00 : f32
    %207 = vector.broadcast %cst_136 : f32 to vector<16x128xf32>
    %208 = arith.maximumf %206, %207 : vector<16x128xf32>
    %209 = arith.addf %208, %168 : vector<16x128xf32>
    %c1_i32_137 = arith.constant 1 : i32
    %210 = vector.broadcast %c1_i32_137 : i32 to vector<16x128xi32>
    %211 = arith.cmpi sge, %45, %210 : vector<16x128xi32>
    %c1_i32_138 = arith.constant 1 : i32
    %212 = tpu.dynamic_rotate %209 by %c1_i32_138 dim 0 : vector<16x128xf32>, i32 -> vector<16x128xf32>
    %cst_139 = arith.constant 0.000000e+00 : f32
    %213 = vector.broadcast %cst_139 : f32 to vector<16x128xf32>
    %214 = arith.select %211, %212, %213 : vector<16x128xi1>, vector<16x128xf32>
    %c2_i32_140 = arith.constant 2 : i32
    %215 = vector.broadcast %c2_i32_140 : i32 to vector<16x128xi32>
    %216 = arith.cmpi sge, %45, %215 : vector<16x128xi32>
    %c2_i32_141 = arith.constant 2 : i32
    %217 = tpu.dynamic_rotate %209 by %c2_i32_141 dim 0 : vector<16x128xf32>, i32 -> vector<16x128xf32>
    %cst_142 = arith.constant 0.000000e+00 : f32
    %218 = vector.broadcast %cst_142 : f32 to vector<16x128xf32>
    %219 = arith.select %216, %217, %218 : vector<16x128xi1>, vector<16x128xf32>
    %c4 = arith.constant 4 : index
    %c0_143 = arith.constant 0 : index
    %c0_144 = arith.constant 0 : index
    %c0_145 = arith.constant 0 : index
    %220 = vector.load %arg9[%c4, %c0_143, %c0_144, %c0_145] : memref<5x3x128x256xbf16, #tpu.memory_space<vmem>>, vector<1x1x128x256xbf16>
    %221 = vector.shape_cast %220 : vector<1x1x128x256xbf16> to vector<128x256xbf16>
    %222 = arith.truncf %219 : vector<16x128xf32> to vector<16x128xbf16>
    %cst_146 = arith.constant dense<0.000000e+00> : vector<16x256xf32>
    %223 = tpu.matmul %222, %221, %cst_146 {dimension_numbers = #tpu.dot_dimension_numbers<[1], [0], [0], [1], [0, 0, 1, 1], [], []>} : vector<16x128xbf16>, vector<128x256xbf16>, vector<16x256xf32> -> vector<16x256xf32>
    %c4_147 = arith.constant 4 : index
    %c1_148 = arith.constant 1 : index
    %c0_149 = arith.constant 0 : index
    %c0_150 = arith.constant 0 : index
    %224 = vector.load %arg9[%c4_147, %c1_148, %c0_149, %c0_150] : memref<5x3x128x256xbf16, #tpu.memory_space<vmem>>, vector<1x1x128x256xbf16>
    %225 = vector.shape_cast %224 : vector<1x1x128x256xbf16> to vector<128x256xbf16>
    %226 = arith.truncf %214 : vector<16x128xf32> to vector<16x128xbf16>
    %cst_151 = arith.constant dense<0.000000e+00> : vector<16x256xf32>
    %227 = tpu.matmul %226, %225, %cst_151 {dimension_numbers = #tpu.dot_dimension_numbers<[1], [0], [0], [1], [0, 0, 1, 1], [], []>} : vector<16x128xbf16>, vector<128x256xbf16>, vector<16x256xf32> -> vector<16x256xf32>
    %228 = arith.addf %223, %227 : vector<16x256xf32>
    %c4_152 = arith.constant 4 : index
    %c2_153 = arith.constant 2 : index
    %c0_154 = arith.constant 0 : index
    %c0_155 = arith.constant 0 : index
    %229 = vector.load %arg9[%c4_152, %c2_153, %c0_154, %c0_155] : memref<5x3x128x256xbf16, #tpu.memory_space<vmem>>, vector<1x1x128x256xbf16>
    %230 = vector.shape_cast %229 : vector<1x1x128x256xbf16> to vector<128x256xbf16>
    %231 = arith.truncf %209 : vector<16x128xf32> to vector<16x128xbf16>
    %cst_156 = arith.constant dense<0.000000e+00> : vector<16x256xf32>
    %232 = tpu.matmul %231, %230, %cst_156 {dimension_numbers = #tpu.dot_dimension_numbers<[1], [0], [0], [1], [0, 0, 1, 1], [], []>} : vector<16x128xbf16>, vector<128x256xbf16>, vector<16x256xf32> -> vector<16x256xf32>
    %233 = arith.addf %228, %232 : vector<16x256xf32>
    %c4_157 = arith.constant 4 : index
    %c0_158 = arith.constant 0 : index
    %c0_159 = arith.constant 0 : index
    %234 = vector.load %arg13[%c4_157, %c0_158, %c0_159] : memref<5x1x256xf32, #tpu.memory_space<vmem>>, vector<1x1x256xf32>
    %235 = vector.shape_cast %234 : vector<1x1x256xf32> to vector<1x256xf32>
    %236 = vector.broadcast %235 : vector<1x256xf32> to vector<16x256xf32>
    %237 = arith.addf %233, %236 : vector<16x256xf32>
    %238 = vector.extract_strided_slice %237 {offsets = [0, 128], sizes = [16, 128], strides = [1, 1]} : vector<16x256xf32> to vector<16x128xf32>
    %cst_160 = arith.constant 0.000000e+00 : f32
    %239 = vector.broadcast %cst_160 : f32 to vector<16x128xf32>
    %240 = arith.subf %239, %238 : vector<16x128xf32>
    %241 = math.exp %240 : vector<16x128xf32>
    %cst_161 = arith.constant 1.000000e+00 : f32
    %242 = vector.broadcast %cst_161 : f32 to vector<16x128xf32>
    %243 = arith.addf %242, %241 : vector<16x128xf32>
    %cst_162 = arith.constant 1.000000e+00 : f32
    %244 = vector.broadcast %cst_162 : f32 to vector<16x128xf32>
    %245 = arith.divf %244, %243 : vector<16x128xf32>
    %246 = vector.extract_strided_slice %237 {offsets = [0, 0], sizes = [16, 128], strides = [1, 1]} : vector<16x256xf32> to vector<16x128xf32>
    %247 = arith.mulf %246, %245 : vector<16x128xf32>
    %cst_163 = arith.constant 0.000000e+00 : f32
    %248 = vector.broadcast %cst_163 : f32 to vector<16x128xf32>
    %249 = arith.maximumf %247, %248 : vector<16x128xf32>
    %250 = arith.addf %249, %209 : vector<16x128xf32>
    %251 = vector.shape_cast %250 : vector<16x128xf32> to vector<1x16x128xf32>
    %c2_164 = arith.constant 2 : index
    %c0_165 = arith.constant 0 : index
    %c0_166 = arith.constant 0 : index
    %252 = vector.load %arg6[%c2_164, %c0_165, %c0_166] : memref<4x128x128xbf16, #tpu.memory_space<vmem>>, vector<1x128x128xbf16>
    %253 = vector.shape_cast %252 : vector<1x128x128xbf16> to vector<128x128xbf16>
    %254 = arith.truncf %24 : vector<8x128xf32> to vector<8x128xbf16>
    %cst_167 = arith.constant dense<0.000000e+00> : vector<8x128xf32>
    %255 = tpu.matmul %254, %253, %cst_167 {dimension_numbers = #tpu.dot_dimension_numbers<[1], [0], [0], [1], [0, 0, 1, 1], [], []>} : vector<8x128xbf16>, vector<128x128xbf16>, vector<8x128xf32> -> vector<8x128xf32>
    %c3_168 = arith.constant 3 : index
    %c0_169 = arith.constant 0 : index
    %256 = vector.load %arg10[%c3_168, %c0_169] : memref<8x128xf32, #tpu.memory_space<vmem>>, vector<1x128xf32>
    %257 = vector.broadcast %256 : vector<1x128xf32> to vector<8x128xf32>
    %258 = arith.addf %255, %257 : vector<8x128xf32>
    %cst_170 = arith.constant 0.000000e+00 : f32
    %259 = vector.broadcast %cst_170 : f32 to vector<8x128xf32>
    %260 = arith.maximumf %258, %259 : vector<8x128xf32>
    %261 = vector.shape_cast %260 : vector<8x128xf32> to vector<1x8x128xf32>
    %c0_171 = arith.constant 0 : index
    %c0_172 = arith.constant 0 : index
    %262 = vector.load %arg7[%c0_171, %c0_172] : memref<128x256xbf16, #tpu.memory_space<vmem>>, vector<128x256xbf16>
    %263 = arith.truncf %250 : vector<16x128xf32> to vector<16x128xbf16>
    %cst_173 = arith.constant dense<0.000000e+00> : vector<16x256xf32>
    %264 = tpu.matmul %263, %262, %cst_173 {dimension_numbers = #tpu.dot_dimension_numbers<[1], [0], [0], [1], [0, 0, 1, 1], [], []>} : vector<16x128xbf16>, vector<128x256xbf16>, vector<16x256xf32> -> vector<16x256xf32>
    %c0_174 = arith.constant 0 : index
    %c0_175 = arith.constant 0 : index
    %265 = vector.load %arg11[%c0_174, %c0_175] : memref<1x256xf32, #tpu.memory_space<vmem>>, vector<1x256xf32>
    %266 = vector.broadcast %265 : vector<1x256xf32> to vector<16x256xf32>
    %267 = arith.addf %264, %266 : vector<16x256xf32>
    %268 = vector.extract_strided_slice %267 {offsets = [0, 0], sizes = [16, 128], strides = [1, 1]} : vector<16x256xf32> to vector<16x128xf32>
    %cst_176 = arith.constant 0.000000e+00 : f32
    %269 = vector.broadcast %cst_176 : f32 to vector<16x128xf32>
    %270 = arith.maximumf %268, %269 : vector<16x128xf32>
    %271 = vector.shape_cast %270 : vector<16x128xf32> to vector<1x16x128xf32>
    %272 = vector.extract_strided_slice %267 {offsets = [0, 128], sizes = [16, 1], strides = [1, 1]} : vector<16x256xf32> to vector<16x1xf32>
    %273 = vector.shape_cast %272 : vector<16x1xf32> to vector<1x16x1xf32>
    %274 = vector.shape_cast %271 : vector<1x16x128xf32> to vector<1x16x1x128xf32>
    %275 = vector.shape_cast %261 : vector<1x8x128xf32> to vector<1x1x8x128xf32>
    %276 = vector.broadcast %274 : vector<1x16x1x128xf32> to vector<1x16x8x128xf32>
    %277 = vector.broadcast %275 : vector<1x1x8x128xf32> to vector<1x16x8x128xf32>
    %278 = arith.addf %276, %277 : vector<1x16x8x128xf32>
    %279 = math.tanh %278 : vector<1x16x8x128xf32>
    %c5 = arith.constant 5 : index
    %c0_177 = arith.constant 0 : index
    %280 = vector.load %arg10[%c5, %c0_177] : memref<8x128xf32, #tpu.memory_space<vmem>>, vector<1x128xf32>
    %281 = vector.shape_cast %280 : vector<1x128xf32> to vector<1x1x1x128xf32>
    %282 = vector.broadcast %281 : vector<1x1x1x128xf32> to vector<1x16x8x128xf32>
    %283 = arith.mulf %279, %282 : vector<1x16x8x128xf32>
    %cst_178 = arith.constant dense<0.000000e+00> : vector<1x16x8xf32>
    %284 = vector.multi_reduction <add>, %283, %cst_178 [3] : vector<1x16x8x128xf32> to vector<1x16x8xf32>
    %cst_179 = arith.constant 0.163011029 : f32
    %285 = vector.broadcast %cst_179 : f32 to vector<1x16x8xf32>
    %286 = arith.addf %284, %285 : vector<1x16x8xf32>
    %287 = tpu.iota {dimensions = array<i32: 2>} : vector<1x16x8xi32>
    %c6_i32_180 = arith.constant 6 : i32
    %288 = vector.broadcast %c6_i32_180 : i32 to vector<1x16x8xi32>
    %289 = arith.cmpi slt, %287, %288 : vector<1x16x8xi32>
    %c6_i32_181 = arith.constant 6 : i32
    %290 = vector.broadcast %c6_i32_181 : i32 to vector<1x16x8xi32>
    %291 = arith.cmpi eq, %287, %290 : vector<1x16x8xi32>
    %cst_182 = arith.constant -1.000000e+30 : f32
    %292 = vector.shape_cast %273 : vector<1x16x1xf32> to vector<1x16x1xf32>
    %293 = vector.broadcast %292 : vector<1x16x1xf32> to vector<1x16x8xf32>
    %294 = vector.broadcast %cst_182 : f32 to vector<1x16x8xf32>
    %295 = arith.select %291, %293, %294 : vector<1x16x8xi1>, vector<1x16x8xf32>
    %296 = arith.select %289, %286, %295 : vector<1x16x8xi1>, vector<1x16x8xf32>
    %cst_183 = arith.constant dense<0xFF800000> : vector<1x16xf32>
    %297 = vector.multi_reduction <maximumf>, %296, %cst_183 [2] : vector<1x16x8xf32> to vector<1x16xf32>
    %298 = vector.shape_cast %297 : vector<1x16xf32> to vector<1x16x1xf32>
    %299 = vector.broadcast %298 : vector<1x16x1xf32> to vector<1x16x8xf32>
    %300 = arith.subf %296, %299 : vector<1x16x8xf32>
    %301 = math.exp %300 : vector<1x16x8xf32>
    %cst_184 = arith.constant dense<0.000000e+00> : vector<1x16xf32>
    %302 = vector.multi_reduction <add>, %301, %cst_184 [2] : vector<1x16x8xf32> to vector<1x16xf32>
    %303 = vector.shape_cast %302 : vector<1x16xf32> to vector<1x16x1xf32>
    %304 = vector.broadcast %303 : vector<1x16x1xf32> to vector<1x16x8xf32>
    %305 = arith.divf %301, %304 : vector<1x16x8xf32>
    %306 = arith.truncf %305 : vector<1x16x8xf32> to vector<1x16x8xbf16>
    %307 = arith.truncf %25 : vector<1x8x128xf32> to vector<1x8x128xbf16>
    "tpu.trace_start"() <{level = 10 : i32, message = "btn,bnr->btr"}> : () -> ()
    %cst_185 = arith.constant dense<0.000000e+00> : vector<1x16x128xf32>
    %308 = tpu.matmul %306, %307, %cst_185 {dimension_numbers = #tpu.dot_dimension_numbers<[2], [1], [1], [2], [0, 0, 0, 1, 1, 2], [0], [0]>} : vector<1x16x8xbf16>, vector<1x8x128xbf16>, vector<1x16x128xf32> -> vector<1x16x128xf32>
    "tpu.trace_stop"() : () -> ()
    %309 = vector.extract_strided_slice %305 {offsets = [0, 0, 6], sizes = [1, 16, 1], strides = [1, 1, 1]} : vector<1x16x8xf32> to vector<1x16x1xf32>
    %310 = vector.broadcast %309 : vector<1x16x1xf32> to vector<1x16x128xf32>
    %311 = arith.mulf %310, %251 : vector<1x16x128xf32>
    %312 = arith.addf %308, %311 : vector<1x16x128xf32>
    %313 = vector.shape_cast %312 : vector<1x16x128xf32> to vector<16x128xf32>
    %c3_186 = arith.constant 3 : index
    %c0_187 = arith.constant 0 : index
    %c0_188 = arith.constant 0 : index
    %314 = vector.load %arg6[%c3_186, %c0_187, %c0_188] : memref<4x128x128xbf16, #tpu.memory_space<vmem>>, vector<1x128x128xbf16>
    %315 = vector.shape_cast %314 : vector<1x128x128xbf16> to vector<128x128xbf16>
    %316 = arith.truncf %313 : vector<16x128xf32> to vector<16x128xbf16>
    %cst_189 = arith.constant dense<0.000000e+00> : vector<16x128xf32>
    %317 = tpu.matmul %316, %315, %cst_189 {dimension_numbers = #tpu.dot_dimension_numbers<[1], [0], [0], [1], [0, 0, 1, 1], [], []>} : vector<16x128xbf16>, vector<128x128xbf16>, vector<16x128xf32> -> vector<16x128xf32>
    %c4_190 = arith.constant 4 : index
    %c0_191 = arith.constant 0 : index
    %318 = vector.load %arg10[%c4_190, %c0_191] : memref<8x128xf32, #tpu.memory_space<vmem>>, vector<1x128xf32>
    %319 = vector.broadcast %318 : vector<1x128xf32> to vector<16x128xf32>
    %320 = arith.addf %317, %319 : vector<16x128xf32>
    %cst_192 = arith.constant 0.000000e+00 : f32
    %321 = vector.broadcast %cst_192 : f32 to vector<16x128xf32>
    %322 = arith.maximumf %320, %321 : vector<16x128xf32>
    %c0_193 = arith.constant 0 : index
    %c0_194 = arith.constant 0 : index
    %323 = vector.load %arg8[%c0_193, %c0_194] : memref<128x128xbf16, #tpu.memory_space<vmem>>, vector<128x128xbf16>
    %324 = arith.truncf %322 : vector<16x128xf32> to vector<16x128xbf16>
    %cst_195 = arith.constant dense<0.000000e+00> : vector<16x128xf32>
    %325 = tpu.matmul %324, %323, %cst_195 {dimension_numbers = #tpu.dot_dimension_numbers<[1], [0], [0], [1], [0, 0, 1, 1], [], []>} : vector<16x128xbf16>, vector<128x128xbf16>, vector<16x128xf32> -> vector<16x128xf32>
    %c0_196 = arith.constant 0 : index
    %c0_197 = arith.constant 0 : index
    %326 = vector.load %arg12[%c0_196, %c0_197] : memref<1x128xf32, #tpu.memory_space<vmem>>, vector<1x128xf32>
    %327 = vector.broadcast %326 : vector<1x128xf32> to vector<16x128xf32>
    %328 = arith.addf %325, %327 : vector<16x128xf32>
    %329 = tpu.iota {dimensions = array<i32: 1>} : vector<16x128xi32>
    %c21_i32 = arith.constant 21 : i32
    %330 = vector.broadcast %c21_i32 : i32 to vector<16x128xi32>
    %331 = arith.cmpi slt, %329, %330 : vector<16x128xi32>
    %cst_198 = arith.constant -1.000000e+30 : f32
    %332 = vector.broadcast %cst_198 : f32 to vector<16x128xf32>
    %333 = arith.select %331, %328, %332 : vector<16x128xi1>, vector<16x128xf32>
    %cst_199 = arith.constant dense<0xFF800000> : vector<16xf32>
    %334 = vector.multi_reduction <maximumf>, %333, %cst_199 [1] : vector<16x128xf32> to vector<16xf32>
    %335 = vector.shape_cast %334 : vector<16xf32> to vector<16x1xf32>
    %336 = vector.broadcast %335 : vector<16x1xf32> to vector<16x128xf32>
    %337 = arith.subf %333, %336 : vector<16x128xf32>
    %338 = math.exp %337 : vector<16x128xf32>
    %cst_200 = arith.constant dense<0.000000e+00> : vector<16xf32>
    %339 = vector.multi_reduction <add>, %338, %cst_200 [1] : vector<16x128xf32> to vector<16xf32>
    %340 = vector.shape_cast %339 : vector<16xf32> to vector<16x1xf32>
    %341 = math.log %340 : vector<16x1xf32>
    %342 = vector.broadcast %341 : vector<16x1xf32> to vector<16x128xf32>
    %343 = arith.subf %337, %342 : vector<16x128xf32>
    %344 = vector.shape_cast %343 : vector<16x128xf32> to vector<1x16x128xf32>
    %c0_201 = arith.constant 0 : index
    %c0_202 = arith.constant 0 : index
    %c0_203 = arith.constant 0 : index
    %345 = vector.load %arg14[%c0_201, %c0_202, %c0_203] : memref<1x16x128xf32, #tpu.memory_space<vmem>>, vector<1x16x128xf32>
    tpu.vector_store %arg14[%c0_201, %c0_202, %c0_203], %344 {strides = array<i32>} : memref<1x16x128xf32, #tpu.memory_space<vmem>>, vector<1x16x128xf32>,
    return
  }
  func.func @transform_0(%arg0: i32) -> (i32, i32, i32) {
    %c0_i32 = arith.constant 0 : i32
    %c0_i32_0 = arith.constant 0 : i32
    %c0_i32_1 = arith.constant 0 : i32
    return %arg0, %c0_i32, %c0_i32_0 : i32, i32, i32
  }
  func.func @transform_1(%arg0: i32) -> (i32, i32, i32) {
    %c0_i32 = arith.constant 0 : i32
    %c0_i32_0 = arith.constant 0 : i32
    %c0_i32_1 = arith.constant 0 : i32
    return %arg0, %c0_i32, %c0_i32_0 : i32, i32, i32
  }
  func.func @transform_2(%arg0: i32) -> (i32, i32, i32) {
    %c0_i32 = arith.constant 0 : i32
    %c0_i32_0 = arith.constant 0 : i32
    %c0_i32_1 = arith.constant 0 : i32
    return %arg0, %c0_i32, %c0_i32_0 : i32, i32, i32
  }
  func.func @transform_3(%arg0: i32) -> (i32, i32) {
    %c0_i32 = arith.constant 0 : i32
    %c0_i32_0 = arith.constant 0 : i32
    %c0_i32_1 = arith.constant 0 : i32
    return %c0_i32, %c0_i32_0 : i32, i32
  }
  func.func @transform_4(%arg0: i32) -> (i32, i32) {
    %c0_i32 = arith.constant 0 : i32
    %c0_i32_0 = arith.constant 0 : i32
    %c0_i32_1 = arith.constant 0 : i32
    return %c0_i32, %c0_i32_0 : i32, i32
  }
  func.func @transform_5(%arg0: i32) -> (i32, i32, i32) {
    %c0_i32 = arith.constant 0 : i32
    %c0_i32_0 = arith.constant 0 : i32
    %c0_i32_1 = arith.constant 0 : i32
    %c0_i32_2 = arith.constant 0 : i32
    return %c0_i32, %c0_i32_0, %c0_i32_1 : i32, i32, i32
  }
  func.func @transform_6(%arg0: i32) -> (i32, i32) {
    %c0_i32 = arith.constant 0 : i32
    %c0_i32_0 = arith.constant 0 : i32
    %c0_i32_1 = arith.constant 0 : i32
    return %c0_i32, %c0_i32_0 : i32, i32
  }
  func.func @transform_7(%arg0: i32) -> (i32, i32) {
    %c0_i32 = arith.constant 0 : i32
    %c0_i32_0 = arith.constant 0 : i32
    %c0_i32_1 = arith.constant 0 : i32
    return %c0_i32, %c0_i32_0 : i32, i32
  }
  func.func @transform_8(%arg0: i32) -> (i32, i32, i32, i32) {
    %c0_i32 = arith.constant 0 : i32
    %c0_i32_0 = arith.constant 0 : i32
    %c0_i32_1 = arith.constant 0 : i32
    %c0_i32_2 = arith.constant 0 : i32
    %c0_i32_3 = arith.constant 0 : i32
    return %c0_i32, %c0_i32_0, %c0_i32_1, %c0_i32_2 : i32, i32, i32, i32
  }
  func.func @transform_9(%arg0: i32) -> (i32, i32) {
    %c0_i32 = arith.constant 0 : i32
    %c0_i32_0 = arith.constant 0 : i32
    %c0_i32_1 = arith.constant 0 : i32
    return %c0_i32, %c0_i32_0 : i32, i32
  }
  func.func @transform_10(%arg0: i32) -> (i32, i32) {
    %c0_i32 = arith.constant 0 : i32
    %c0_i32_0 = arith.constant 0 : i32
    %c0_i32_1 = arith.constant 0 : i32
    return %c0_i32, %c0_i32_0 : i32, i32
  }
  func.func @transform_11(%arg0: i32) -> (i32, i32) {
    %c0_i32 = arith.constant 0 : i32
    %c0_i32_0 = arith.constant 0 : i32
    %c0_i32_1 = arith.constant 0 : i32
    return %c0_i32, %c0_i32_0 : i32, i32
  }
  func.func @transform_12(%arg0: i32) -> (i32, i32, i32) {
    %c0_i32 = arith.constant 0 : i32
    %c0_i32_0 = arith.constant 0 : i32
    %c0_i32_1 = arith.constant 0 : i32
    %c0_i32_2 = arith.constant 0 : i32
    return %c0_i32, %c0_i32_0, %c0_i32_1 : i32, i32, i32
  }
  func.func @transform_13(%arg0: i32) -> (i32, i32, i32) {
    %c0_i32 = arith.constant 0 : i32
    %c0_i32_0 = arith.constant 0 : i32
    %c0_i32_1 = arith.constant 0 : i32
    return %arg0, %c0_i32, %c0_i32_0 : i32, i32, i32
  }
}

</mosaic_0001>

<bundles_post_ra>
// kernel: tpu_custom_call.1
= control target key start
LH: loop header
LB: loop body
LE: loop exit
PB: predicated region body
PF: predicated region fallthrough
CT: control target
= control target key end

     0   :  { %s7197_s0 = inlined_call_operand.hbm [shape: f32[2,1,128], index: 0, kind: input, shape index: {}]   ;;  %s7198_s1 = inlined_call_operand.hbm [shape: f32[2,8,128], index: 1, kind: input, shape index: {}]   ;;  %s7199_s2 = inlined_call_operand.hbm [shape: f32[2,16,128], index: 2, kind: input, shape index: {}]   ;;  %s7200_s3 = inlined_call_operand.hbm [shape: bf16[128,128], index: 3, kind: input, shape index: {}]   ;;  %s7201_s4 = inlined_call_operand.hbm [shape: bf16[128,128], index: 4, kind: input, shape index: {}]   ;;  %s7202_s5 = inlined_call_operand.hbm [shape: bf16[4,128,128], index: 5, kind: input, shape index: {}]   ;;  %s7203_s6 = inlined_call_operand.hbm [shape: bf16[128,256], index: 6, kind: input, shape index: {}]   ;;  %s7204_s7 = inlined_call_operand.hbm [shape: bf16[128,128], index: 7, kind: input, shape index: {}]   ;;  %s7205_s8 = inlined_call_operand.hbm [shape: bf16[5,3,128,256], index: 8, kind: input, shape index: {}]   ;;  %s7206_s9 = inlined_call_operand.vmem [shape: f32[8,128], index: 9, kind: input, shape index: {}]   ;;  %s7207_s10 = inlined_call_operand.vmem [shape: f32[1,256], index: 10, kind: input, shape index: {}]   ;;  %s7208_s11 = inlined_call_operand.vmem [shape: f32[1,128], index: 11, kind: input, shape index: {}]   ;;  %s7209_s12 = inlined_call_operand.vmem [shape: f32[5,1,256], index: 12, kind: input, shape index: {}]   ;;  %s7210_s13 = inlined_call_operand.hbm [shape: f32[2,16,128], index: 13, kind: output, shape index: {}]  }
   0x1   :  { %7233 = sst [smem:[#allocation29_spill]] %s7198_s1 }
   0x2   :  { %7234 = sst [smem:[#allocation30_spill]] %s7200_s3 }
   0x3   :  { %7235 = sst [smem:[#allocation31_spill]] %s7201_s4 }
   0x4   :  { %7236 = sst [smem:[#allocation32_spill]] %s7202_s5 }
   0x5   :  { %7237 = sst [smem:[#allocation33_spill]] %s7204_s7 }
   0x6   :  { %7238 = sst [smem:[#allocation34_spill]] %s7206_s9 }
   0x7   :  { %7239 = sst [smem:[#allocation35_spill]] %s7207_s10 }
   0x8   :  { %7240 = sst [smem:[#allocation36_spill]] %s7208_s11 }
   0x9   :  { %7241 = sst [smem:[#allocation37_spill]] %s7209_s12 }
   0xa   :  { %7242 = sst [smem:[#allocation38_spill]] %s7210_s13 }
   0xb   :  { %18 = vsyncpa [#allocation3], 0 }
   0xc   :  { %20 = vsyncpa [#allocation3 + $0x1], 0 }
   0xd   :  { %21 = vsyncpa [#allocation6], 0 }
   0xe   :  { %23 = vsyncpa [#allocation6 + $0x1], 0 }
   0xf   :  { %24 = vsyncpa [#allocation9], 0 }
  0x10   :  { %25 = vsyncpa [#allocation12], 0 }
  0x11   :  { %26 = vsyncpa [#allocation15], 0 }
  0x12   :  { %27 = vsyncpa [#allocation4], 0 }
  0x13   :  { %29 = vsyncpa [#allocation4 + $0x1], 0  ;;  %s6361_s25 = smov 0   ;;  %s6363_s26 = smov 0  }
  0x14   :  { %s6365_s27 = smov 0   ;;  %s6367_s28 = smov 0  }
  0x15 LB: > { %7243 = sst [smem:[#allocation24_spill]] %s6255_s25  ;;  %s6269_s29 = smov [#allocation8]   ;;  %s6267_s28 = sphi %s6367_s28, %s7290_s28   ;;  %s6263_s27 = sphi %s6365_s27, %s7292_s27   ;;  %s6259_s26 = sphi %s6363_s26, %s7294_s26   ;;  %s6255_s25 = sphi %s6361_s25, %s7293_s25  }
  0x16   : > { %7244 = sst [smem:[#allocation25_spill]] %s6263_s27  ;;  %s366_s30 = sshll.u32 %s6269_s29, 4  ;;  %s6387_s30 = int_to_ptr.vmem [resolvable:$true] %s366_s30 }
  0x17   : > { %s6382_s14 = sadd.s32 4294967295, %s6267_s28   ;;  %p4628_p0 = scmp.ge.s32.totalorder %s6267_s28, 1 }
  0x18   : > { %p7218_p1 = scmp.eq.s32.totalorder %s6382_s14, 0  ;;  %p354_p2 = scmp.lt.s32.totalorder %s6267_s28, 3 }
  0x19   : > { %s6270_s16 = smov [#allocation11]   ;;  %s6271_s19 = smov [#allocation14]  }
  0x1a   : > { %p6389_p3 = pnand %p4628_p0, %p354_p2  ;;  %s392_s17 = sshll.u32 %s6270_s16, 4  ;;  %s6402_s17 = int_to_ptr.vmem [resolvable:$true] %s392_s17 }
  0x1b   : > { %s418_s20 = sshll.u32 %s6271_s19, 4  ;;  %s7247_s3 = sld [smem:[#allocation30_spill]]  ;;  %s6404_s20 = int_to_ptr.vmem [resolvable:$true] %s418_s20 }
  0x1c   : > { %s7245_s15 = scalar_select %p6389_p3, 1, 0 }
  0x1d   : > { %p5298_p5 = pneg %p6389_p3 }
  0x1f   : > { %p6398_p6 = pnand %p5298_p5, %p7218_p1 }
  0x21   : > { %s7246_s18 = scalar_select %p6398_p6, 1, 0 }
  0x22   : > { %s5927_s23 = scalar_lea.hbm %s7247_s3, 1024  ;;  %p6414_p8 = pneg %p6398_p6 }
  0x23   : > { %p5928_p7 = scmp.ne.s32.totalorder %s7247_s3, %s5927_s23  ;;  %p5934_p11 = scmp.lt.u32.totalorder %s5927_s23, %s7247_s3 }
  0x24   : > { %s7248_s16 = scalar_select %p6414_p8, 1, 0 }
  0x25   : > { %p5930_p9 = pnand %p6414_p8, %p5928_p7 }
  0x27   : > { %p5931_p10 = pneg %p5930_p9 }
  0x29   : > { %p5936_p12 = pnand %p5934_p11, %p5931_p10 }
  0x2b   : > { %5939 = shalt.err (!%p5936_p12)
}
  0x2c   : > { %s5940_s21 = scalar_lea.vmem %s6387_s30, 1024  ;;  %p5948_p5 = scmp.lt.s32.totalorder %s6387_s30, %s6387_s30 }
  0x2d   : > { %p5941_p13 = scmp.ne.s32.totalorder %s6387_s30, %s5940_s21  ;;  %p5949_p4 = scmp.lt.s32.totalorder %s5940_s21, %s5940_s21 }
  0x2f   : > { %p5943_p0 = pnand %p5941_p13, %p6414_p8  ;;  %p5950_p7 = por %p5949_p4, %p5948_p5 }
  0x31   : > { %p5944_p2 = pneg %p5943_p0 }
  0x33   : > { %p5951_p9 = pnand %p5950_p7, %p5944_p2 }
  0x35   : > { %5954 = shalt.err (!%p5951_p9)
}
  0x36   : > { %s7215_s22 = smov 64   ;;  %s7216_s13 = smov 4  }
  0x37   : > { %5301 = dma.hbm_to_vmem [thread:$0]  (!%p6398_p6), %s7247_s3, 1024, %s6387_s30, [#allocation9], %s7215_s22, %s7215_s22, %s7216_s13  }
  0x38   : > { %s7249_s5 = sld [smem:[#allocation32_spill]] }
  0x3e   : > { %s5955_s21 = scalar_lea.hbm %s7249_s5, 4096 }
  0x3f   : > { %p5956_p4 = scmp.ne.s32.totalorder %s7249_s5, %s5955_s21  ;;  %p5962_p12 = scmp.lt.u32.totalorder %s5955_s21, %s7249_s5 }
  0x41   : > { %p5958_p10 = pnand %p5956_p4, %p6414_p8 }
  0x43   : > { %p5959_p11 = pneg %p5958_p10 }
  0x45   : > { %p5964_p13 = pnand %p5962_p12, %p5959_p11 }
  0x47   : > { %5967 = shalt.err (!%p5964_p13)
}
  0x48   : > { %s5968_s30 = scalar_lea.vmem %s6402_s17, 4096  ;;  %p5976_p7 = scmp.lt.s32.totalorder %s6402_s17, %s6402_s17 }
  0x49   : > { %p5969_p0 = scmp.ne.s32.totalorder %s6402_s17, %s5968_s30  ;;  %p5977_p9 = scmp.lt.s32.totalorder %s5968_s30, %s5968_s30 }
  0x4b   : > { %p5971_p2 = pnand %p5969_p0, %p6414_p8  ;;  %p5978_p4 = por %p5977_p9, %p5976_p7 }
  0x4d   : > { %p5972_p5 = pneg %p5971_p2 }
  0x4f   : > { %p5979_p10 = pnand %p5978_p4, %p5972_p5 }
  0x51   : > { %5982 = shalt.err (!%p5979_p10)
}
  0x52   : > { %5307 = dma.hbm_to_vmem [thread:$0]  (!%p6398_p6), %s7249_s5, 4096, %s6402_s17, [#allocation12], %s7215_s22, %s7215_s22, %s7216_s13  }
  0x53   : > { %s7250_s7 = sld [smem:[#allocation33_spill]] }
  0x59   : > { %s5983_s23 = scalar_lea.hbm %s7250_s7, 1024 }
  0x5a   : > { %p5984_p11 = scmp.ne.s32.totalorder %s7250_s7, %s5983_s23  ;;  %p5990_p0 = scmp.lt.u32.totalorder %s5983_s23, %s7250_s7 }
  0x5c   : > { %p5986_p12 = pnand %p5984_p11, %p6414_p8 }
  0x5e   : > { %p5987_p13 = pneg %p5986_p12 }
  0x60   : > { %p5992_p2 = pnand %p5990_p0, %p5987_p13 }
  0x62   : > { %5995 = shalt.err (!%p5992_p2)
}
  0x63   : > { %s5996_s17 = scalar_lea.vmem %s6404_s20, 1024  ;;  %p6004_p4 = scmp.lt.s32.totalorder %s6404_s20, %s6404_s20 }
  0x64   : > { %p5997_p5 = scmp.ne.s32.totalorder %s6404_s20, %s5996_s17  ;;  %p6005_p10 = scmp.lt.s32.totalorder %s5996_s17, %s5996_s17 }
  0x66   : > { %p5999_p7 = pnand %p5997_p5, %p6414_p8  ;;  %p6006_p11 = por %p6005_p10, %p6004_p4 }
  0x68   : > { %p6000_p9 = pneg %p5999_p7 }
  0x6a   : > { %p6007_p12 = pnand %p6006_p11, %p6000_p9 }
  0x6c   : > { %6010 = shalt.err (!%p6007_p12)
}
  0x6d   : > { %5313 = dma.hbm_to_vmem [thread:$0]  (!%p6398_p6), %s7250_s7, 1024, %s6404_s20, [#allocation15], %s7215_s22, %s7215_s22, %s7216_s13  }
  0x6e   : > { %s4627_s10 = sadd.s32 4294967294, %s6267_s28   ;;  %s6492_s11 = sadd.s32 1, %s6267_s28  }
  0x6f   : > { %7251 = sst [smem:[#allocation26_spill]] %s6492_s11  ;;  %s42_s12 = sadd.s32 1, %s6263_s27 }
  0x70   : > { %s39_s23 = ssub.s32 %s6267_s28, %s6492_s11  ;;  %p49_p13 = scmp.ne.s32.totalorder %s6263_s27, %s6259_s26 }
  0x71   : > { %p40_p0 = scmp.eq.s32.totalorder %s39_s23, 0  ;;  %p50_p2 = scmp.eq.s32.totalorder %s6267_s28, 0 }
  0x72   : > { %p55_p5 = scmp.ne.s32.totalorder %s6259_s26, %s6255_s25  ;;  %p341_p7 = scmp.eq.s32.totalorder %s6382_s14, 1 }
  0x73   : > { %s6504_s24 = scalar_select %p40_p0, %s6263_s27, %s42_s12  }
  0x74   : > { %p51_p9 = por %p50_p2, %p49_p13  ;;  %p6508_p4 = por %p7218_p1, %p55_p5 }
  0x75   : > { %7252 = sst [smem:[#allocation27_spill]] %s6504_s24  ;;  %p6512_p10 = por %p341_p7, %p49_p13 }
  0x76   : > { %s7253_s20 = scalar_select %p6508_p4, 1, 0 }
  0x77   : > { %s7254_s29 = scalar_select %p6512_p10, 1, 0 }
  0x78   : > { %p347_p11 = scmp.eq.s32.totalorder %s4627_s10, 1  ;;  %p5337_p12 = scmp.lt.s32.totalorder %s6267_s28, 2 }
  0x79   : > { %s6518_s19 = sand.u32 1, %s6263_s27   ;;  %s474_s17 = sand.u32 1, %s6267_s28  }
  0x7a   : > { %p6520_p3 = por %p347_p11, %p55_p5  ;;  %p6525_p0 = pnand %p5337_p12, %p51_p9 }
  0x7b   : > { %s4637_s9 = sshll.u32 %s6518_s19, 3  ;;  %s4638_s12 = sshll.u32 %s6267_s28, 7 }
  0x7c   : > { %s7255_s21 = scalar_select %p6520_p3, 1, 0 }
  0x7d   : > { %s7257_s30 = scalar_select %p6525_p0, 1, 0 }
  0x7e   : > { %7256 = sst [smem:[#allocation28_spill]] %s7255_s21  ;;  %s7258_s1 = sld [smem:[#allocation29_spill]] }
  0x7f   : > { %s478_s13 = scalar_lea.vmem [#allocation5], %s4637_s9  ;;  %s6539_s7 = scalar_lea.sflag [#allocation6], %s474_s17 }
  0x80   : > { %s485_s3 = sshll.u32 %s478_s13, 4  ;;  %p6545_p2 = pneg %p6525_p0  ;;  %s6536_s3 = int_to_ptr.vmem [resolvable:$true] %s485_s3 }
  0x82   : > { %s7259_s27 = scalar_select %p6545_p2, 1, 0 }
  0x84   : > { %s6534_s10 = scalar_lea.hbm %s7258_s1, %s4638_s12  ;;  %s6016_s13 = scalar_lea.hbm %s7258_s1, 256 }
  0x85   : > { %s6011_s24 = scalar_lea.hbm %s6534_s10, 128  ;;  %p6017_p9 = scmp.lt.u32.totalorder %s6534_s10, %s7258_s1 }
  0x86   : > { %p6012_p13 = scmp.ne.s32.totalorder %s6534_s10, %s6011_s24  ;;  %p6018_p11 = scmp.lt.u32.totalorder %s6016_s13, %s6011_s24 }
  0x87   : > { %p6020_p1 = scmp.lt.u32.totalorder %s6011_s24, %s6534_s10 }
  0x88   : > { %p6014_p5 = pnand %p6545_p2, %p6012_p13  ;;  %p6019_p12 = por %p6018_p11, %p6017_p9 }
  0x8a   : > { %p6015_p7 = pneg %p6014_p5  ;;  %p6021_p3 = por %p6020_p1, %p6019_p12 }
  0x8c   : > { %p6022_p10 = pnand %p6021_p3, %p6015_p7 }
  0x8e   : > { %6025 = shalt.err (!%p6022_p10)
}
  0x8f   : > { %s6026_s17 = scalar_lea.vmem %s6536_s3, 128  ;;  %s6274_s22 = smov [#allocation5]  }
  0x90   : > { %p6027_p13 = scmp.ne.s32.totalorder %s6536_s3, %s6026_s17  ;;  %s6031_s12 = sshll.u32 %s6274_s22, 4  ;;  %s6032_s12 = int_to_ptr.vmem [resolvable:$false] %s6031_s12 }
  0x91   : > { %s6033_s9 = scalar_lea.vmem %s6032_s12, 256  ;;  %p6034_p6 = scmp.lt.s32.totalorder %s6536_s3, %s6032_s12 }
  0x92   : > { %p6029_p5 = pnand %p6027_p13, %p6545_p2  ;;  %p6035_p8 = scmp.lt.s32.totalorder %s6033_s9, %s6026_s17 }
  0x94   : > { %p6030_p4 = pneg %p6029_p5  ;;  %p6036_p9 = por %p6035_p8, %p6034_p6 }
  0x96   : > { %p6037_p11 = pnand %p6036_p9, %p6030_p4 }
  0x98   : > { %6040 = shalt.err (!%p6037_p11)
}
  0x99   : > { %5323 = dma.hbm_to_vmem [thread:$0]  (!%p6525_p0), %s6534_s10, 128, %s6536_s3, %s6539_s7  }
  0x9a   : > { %s6275_s24 = smov [#allocation10]   ;;  %s6276_s23 = smov [#allocation13]  }
  0x9b   : > { %s379_s13 = sshll.u32 %s6275_s24, 4  ;;  %s405_s5 = sshll.u32 %s6276_s23, 4  ;;  %s380_s13 = int_to_ptr.vmem [resolvable:$true] %s379_s13  ;;  %s6569_s5 = int_to_ptr.vmem [resolvable:$true] %s405_s5 }
  0x9c   : > { %s7260_s4 = sld [smem:[#allocation31_spill]]  ;;  %p7261_p3 = scmp.ne.s32.totalorder %s7248_s16, 0 }
  0xa2   : > { %s6041_s17 = scalar_lea.hbm %s7260_s4, 1024 }
  0xa3   : > { %p6042_p1 = scmp.ne.s32.totalorder %s7260_s4, %s6041_s17  ;;  %p6048_p4 = scmp.lt.u32.totalorder %s6041_s17, %s7260_s4 }
  0xa5   : > { %p6044_p6 = pnand %p6042_p1, %p7261_p3 }
  0xa7   : > { %p6045_p8 = pneg %p6044_p6 }
  0xa9   : > { %p6050_p10 = pnand %p6048_p4, %p6045_p8 }
  0xab   : > { %6053 = shalt.err (!%p6050_p10)
}
  0xac   : > { %s6054_s10 = scalar_lea.vmem %s380_s13, 1024  ;;  %p6062_p5 = scmp.lt.s32.totalorder %s380_s13, %s380_s13 }
  0xad   : > { %p6055_p7 = scmp.ne.s32.totalorder %s380_s13, %s6054_s10  ;;  %p6063_p9 = scmp.lt.s32.totalorder %s6054_s10, %s6054_s10 }
  0xaf   : > { %p6057_p12 = pnand %p6055_p7, %p7261_p3  ;;  %p6064_p11 = por %p6063_p9, %p6062_p5 }
  0xb1   : > { %p6058_p13 = pneg %p6057_p12 }
  0xb3   : > { %p6065_p0 = pnand %p6064_p11, %p6058_p13 }
  0xb5   : > { %6068 = shalt.err (!%p6065_p0)
}
  0xb6   : > { %p7262_p1 = scmp.ne.s32.totalorder %s7246_s18, 0  ;;  %s7263_s1 = smov 4  }
  0xb7   : > { %s7264_s24 = smov 64   ;;  %s6069_s17 = scalar_lea.hbm %s7203_s6, 2048 }
  0xb8   : > { %5304 = dma.hbm_to_vmem [thread:$0]  (!%p7262_p1), %s7260_s4, 1024, %s380_s13, [#allocation9], %s7264_s24, %s7264_s24, %s7263_s1  }
  0xb9   : > { %p6070_p6 = scmp.ne.s32.totalorder %s7203_s6, %s6069_s17  ;;  %p6076_p4 = scmp.lt.u32.totalorder %s6069_s17, %s7203_s6 }
  0xbb   : > { %p6072_p0 = pnand %p6070_p6, %p7261_p3 }
  0xbd   : > { %p6073_p8 = pneg %p6072_p0 }
  0xbf   : > { %p6078_p10 = pnand %p6076_p4, %p6073_p8 }
  0xc1   : > { %6081 = shalt.err (!%p6078_p10)
}
  0xc2   : > { %s6082_s13 = scalar_lea.vmem %s6569_s5, 2048  ;;  %p6090_p5 = scmp.lt.s32.totalorder %s6569_s5, %s6569_s5 }
  0xc3   : > { %p6083_p7 = scmp.ne.s32.totalorder %s6569_s5, %s6082_s13  ;;  %p6091_p9 = scmp.lt.s32.totalorder %s6082_s13, %s6082_s13 }
  0xc5   : > { %p6085_p12 = pnand %p6083_p7, %p7261_p3  ;;  %p6092_p11 = por %p6091_p9, %p6090_p5 }
  0xc7   : > { %p6086_p13 = pneg %p6085_p12 }
  0xc9   : > { %p6093_p6 = pnand %p6092_p11, %p6086_p13 }
  0xcb   : > { %6096 = shalt.err (!%p6093_p6)
}
  0xcc   : > { %s6277_s1 = smov 128   ;;  %s6278_s21 = smov 8  }
  0xcd   : > { %5310 = dma.hbm_to_vmem [thread:$0]  (!%p7262_p1), %s7203_s6, 2048, %s6569_s5, [#allocation12], %s6277_s1, %s6277_s1, %s6278_s21  }
  0xce   : > { %s6279_s23 = smov [#allocation16]   ;;  %s4636_s12 = sshll.u32 %s6267_s28, 4 }
  0xcf   : > { %s431_s22 = sshll.u32 %s6279_s23, 4  ;;  %s6097_s3 = scalar_lea.hbm %s7205_s8, 30720  ;;  %s432_s22 = int_to_ptr.vmem [resolvable:$true] %s431_s22 }
  0xd0   : > { %p6098_p0 = scmp.ne.s32.totalorder %s7205_s8, %s6097_s3  ;;  %p6104_p10 = scmp.lt.u32.totalorder %s6097_s3, %s7205_s8 }
  0xd2   : > { %p6100_p8 = pnand %p6098_p0, %p7261_p3 }
  0xd4   : > { %p6101_p4 = pneg %p6100_p8 }
  0xd6   : > { %p6106_p7 = pnand %p6104_p10, %p6101_p4 }
  0xd8   : > { %6109 = shalt.err (!%p6106_p7)
}
  0xd9   : > { %s6110_s5 = scalar_lea.vmem %s432_s22, 30720  ;;  %p6118_p9 = scmp.lt.s32.totalorder %s432_s22, %s432_s22 }
  0xda   : > { %p6111_p12 = scmp.ne.s32.totalorder %s432_s22, %s6110_s5  ;;  %p6119_p11 = scmp.lt.s32.totalorder %s6110_s5, %s6110_s5 }
  0xdc   : > { %p6113_p13 = pnand %p6111_p12, %p7261_p3  ;;  %p6120_p6 = por %p6119_p11, %p6118_p9 }
  0xde   : > { %p6114_p5 = pneg %p6113_p13 }
  0xe0   : > { %p6121_p2 = pnand %p6120_p6, %p6114_p5 }
  0xe2   : > { %6124 = shalt.err (!%p6121_p2)
}
  0xe3   : > { %5316 = dma.hbm_to_vmem [thread:$0]  (!%p7262_p1), %s7205_s8, 30720, %s432_s22, [#allocation15], %s6277_s1, %s6277_s1, %s6278_s21  }
  0xe4   : > { %s6643_s11 = scalar_lea.hbm %s7197_s0, %s4636_s12  ;;  %s460_s18 = scalar_lea.vmem [#allocation2], %s6518_s19 }
  0xe5   : > { %s467_s23 = sshll.u32 %s460_s18, 4  ;;  %s458_s17 = scalar_lea.sflag [#allocation3], %s6518_s19  ;;  %s468_s23 = int_to_ptr.vmem [resolvable:$true] %s467_s23 }
  0xe6   : > { %s6125_s9 = scalar_lea.hbm %s6643_s11, 16  ;;  %p7265_p3 = scmp.ne.s32.totalorder %s7259_s27, 0 }
  0xe7   : > { %p6126_p2 = scmp.ne.s32.totalorder %s6643_s11, %s6125_s9  ;;  %s6130_s10 = scalar_lea.hbm %s7197_s0, 32 }
  0xe8   : > { %p6131_p1 = scmp.lt.u32.totalorder %s6643_s11, %s7197_s0  ;;  %p6132_p4 = scmp.lt.u32.totalorder %s6130_s10, %s6125_s9 }
  0xe9   : > { %p6128_p0 = pnand %p6126_p2, %p7265_p3  ;;  %p6134_p7 = scmp.lt.u32.totalorder %s6125_s9, %s6643_s11 }
  0xea   : > { %p6133_p10 = por %p6132_p4, %p6131_p1 }
  0xeb   : > { %p6129_p8 = pneg %p6128_p0 }
  0xec   : > { %p6135_p12 = por %p6134_p7, %p6133_p10 }
  0xee   : > { %p6136_p13 = pnand %p6135_p12, %p6129_p8 }
  0xf0   : > { %6139 = shalt.err (!%p6136_p13)
}
  0xf1   : > { %s6140_s5 = scalar_lea.vmem %s468_s23, 16  ;;  %s6280_s4 = smov [#allocation2]  }
  0xf2   : > { %p6141_p5 = scmp.ne.s32.totalorder %s468_s23, %s6140_s5  ;;  %s6145_s25 = sshll.u32 %s6280_s4, 4  ;;  %s6146_s25 = int_to_ptr.vmem [resolvable:$false] %s6145_s25 }
  0xf3   : > { %s6147_s16 = scalar_lea.vmem %s6146_s25, 32  ;;  %p6148_p6 = scmp.lt.s32.totalorder %s468_s23, %s6146_s25 }
  0xf4   : > { %p6143_p9 = pnand %p6141_p5, %p7265_p3  ;;  %p6149_p2 = scmp.lt.s32.totalorder %s6147_s16, %s6140_s5 }
  0xf6   : > { %p6144_p11 = pneg %p6143_p9  ;;  %p6150_p0 = por %p6149_p2, %p6148_p6 }
  0xf8   : > { %p6151_p1 = pnand %p6150_p0, %p6144_p11 }
  0xfa   : > { %6154 = shalt.err (!%p6151_p1)
}
  0xfb   : > { %p7266_p4 = scmp.ne.s32.totalorder %s7257_s30, 0  ;;  %s5013_s24 = sshll.u32 %s6267_s28, 8 }
  0xfc   : > { %s7267_s18 = sshll.u32 %s6518_s19, 4  ;;  %s6670_s13 = scalar_lea.hbm %s7199_s2, %s5013_s24 }
  0xfd   : > { %5320 = dma.hbm_to_vmem [thread:$0]  (!%p7266_p4), %s6643_s11, 16, %s468_s23, %s458_s17  }
  0xfe   : > { %s496_s9 = scalar_lea.vmem [#allocation7], %s7267_s18  ;;  %s6155_s12 = scalar_lea.hbm %s6670_s13, 256 }
  0xff   : > { %s503_s3 = sshll.u32 %s496_s9, 4  ;;  %p6156_p8 = scmp.ne.s32.totalorder %s6670_s13, %s6155_s12  ;;  %s6672_s3 = int_to_ptr.vmem [resolvable:$true] %s503_s3 }
 0x100   : > { %s6160_s23 = scalar_lea.hbm %s7199_s2, 512  ;;  %p6161_p12 = scmp.lt.u32.totalorder %s6670_s13, %s7199_s2 }
 0x101   : > { %p6158_p10 = pnand %p6156_p8, %p7265_p3  ;;  %p6162_p13 = scmp.lt.u32.totalorder %s6160_s23, %s6155_s12 }
 0x102   : > { %p6164_p9 = scmp.lt.u32.totalorder %s6155_s12, %s6670_s13 }
 0x103   : > { %p6159_p7 = pneg %p6158_p10  ;;  %p6163_p5 = por %p6162_p13, %p6161_p12 }
 0x105   : > { %p6165_p11 = por %p6164_p9, %p6163_p5 }
 0x107   : > { %p6166_p6 = pnand %p6165_p11, %p6159_p7 }
 0x109   : > { %6169 = shalt.err (!%p6166_p6)
}
 0x10a   : > { %s6170_s4 = scalar_lea.vmem %s6672_s3, 256  ;;  %s6281_s25 = smov [#allocation7]  }
 0x10b   : > { %p6171_p2 = scmp.ne.s32.totalorder %s6672_s3, %s6170_s4  ;;  %s6175_s16 = sshll.u32 %s6281_s25, 4  ;;  %s6176_s16 = int_to_ptr.vmem [resolvable:$false] %s6175_s16 }
 0x10c   : > { %s6177_s24 = scalar_lea.vmem %s6176_s16, 512  ;;  %p6178_p8 = scmp.lt.s32.totalorder %s6672_s3, %s6176_s16 }
 0x10d   : > { %p6173_p0 = pnand %p6171_p2, %p7265_p3  ;;  %p6179_p10 = scmp.lt.s32.totalorder %s6177_s24, %s6170_s4 }
 0x10f   : > { %p6174_p1 = pneg %p6173_p0  ;;  %p6180_p12 = por %p6179_p10, %p6178_p8 }
 0x111   : > { %p6181_p13 = pnand %p6180_p12, %p6174_p1 }
 0x113   : > { %6184 = shalt.err (!%p6181_p13)
}
 0x114   : > { %5326 = dma.hbm_to_vmem [thread:$0]  (!%p7266_p4), %s6670_s13, 256, %s6672_s3, %s6539_s7, %s6277_s1, %s6277_s1, %s6278_s21  }
 0x115   : > { %p7268_p3 = scmp.ne.s32.totalorder %s7245_s15, 0 }
 0x116   : > { %s6702_s27 = sand.u32 (!%p7268_p3), 1, %s6259_s26   ;;  %p7269_p7 = scmp.ne.s32.totalorder (!%p7268_p3), %s7253_s20, 0 }
 0x117   : > { %515 = sbr.rel (%p7268_p3) target bundleno = 4093 (0xffd), region = 72  ;;  %s518_s18 = scalar_lea.sflag (!%p7268_p3), [#allocation3], %s6702_s27 }
 0x118   : > { %s520_s9 = scalar_lea.vmem (!%p7268_p3), [#allocation2], %s6702_s27 }
 0x11e   : > { %6230 = dma.done.wait (%p7269_p7), %s518_s18, 16  }
 0x11f   : > { %6232 = vsyncadd (%p7269_p7), %s518_s18, 4294967280  ;;  %s525_s7 = sand.u32 1, %s6382_s14   ;;  %s4643_s30 = sshll.u32 %s6702_s27, 3 }
 0x120   : > { %s526_s15 = scalar_lea.sflag [#allocation6], %s525_s7  ;;  %s6712_s1 = scalar_lea.vmem [#allocation5], %s4643_s30 }
 0x121   : > { %6234 = dma.done.wait (%p7269_p7), %s526_s15, 384  }
 0x122   : > { %6236 = vsyncadd (%p7269_p7), %s526_s15, 4294966912  ;;  %s4644_s21 = sshll.u32 %s6702_s27, 4  ;;  %p7270_p4 = scmp.eq.s32.totalorder %s6382_s14, 0 }
 0x123   : > { %s6721_s3 = scalar_lea.vmem [#allocation7], %s4644_s21 }
 0x124   : > { %6238 = dma.done.wait (%p7270_p4), [#allocation9], 2048   ;;  %p7271_p5 = pmov %p7270_p4 }
 0x125   : > { %p7272_p9 = pmov %p7270_p4 }
 0x126   : > { %6240 = vsyncadd (%p7271_p5), [#allocation9], 4294965248 }
 0x127   : > { %6242 = dma.done.wait (%p7272_p9), [#allocation12], 6144   ;;  %p7273_p11 = pmov %p7270_p4 }
 0x128   : > { %p7274_p6 = pmov %p7270_p4 }
 0x129   : > { %6244 = vsyncadd (%p7273_p11), [#allocation12], 4294961152 }
 0x12a   : > { %6246 = dma.done.wait (%p7274_p6), [#allocation15], 31744   ;;  %p7275_p2 = pmov %p7270_p4 }
 0x12b   : > { %v6282_v0 = vmov 0.0   ;;  %vm6283_vm0 = vmmov 0   ;;  %v5399_v1 = vld [vmem:[#allocation8] sm:$0xff]   ;;  %v5400_v2 = vld [vmem:[#allocation8 + $0x8] sm:$0xff]   ;;  %v5401_v3 = vld [vmem:[#allocation8 + $0x10] sm:$0xff]   ;;  %s7276_s10 = sld [smem:[#allocation34_spill]] }
 0x12c   : > { %6248 = vsyncadd (%p7275_p2), [#allocation15], 4294935552  ;;  %5080 = vmatprep.subr.bf16.mxu0 %v6282_v0  ;;  %5096 = vmatprep.mubr.msk.bf16.mxu0 %vm6283_vm0, %v6282_v0  ;;  %v5407_v4 = vld [vmem:[#allocation10] sm:$0xff]   ;;  %v5402_v5 = vld [vmem:[#allocation8 + $0x18] sm:$0xff]   ;;  %vm6285_vm3 = vmmov 1   ;;  %s7281_s23 = sld [smem:[#allocation37_spill]] }
 0x12d   : > { %5100 = vmatprep.subr.bf16.mxu1 %v6282_v0  ;;  %5116 = vmatprep.mubr.msk.bf16.mxu1 %vm6283_vm0, %v6282_v0  ;;  %v5408_v6 = vld [vmem:[#allocation10 + $0x8] sm:$0xff]   ;;  %v5403_v7 = vld [vmem:[#allocation8 + $0x20] sm:$0xff]   ;;  %v5409_v8 = vld [vmem:[#allocation10 + $0x10] sm:$0xff]   ;;  %vm4146_vm10 = vcmask 1043456   ;;  %vm4082_vm11 = vcmask 1041409   ;;  %vm4084_vm12 = vcmask 1042434  }
 0x12e   : > { %5081 = vmatpush3.bf16.msra.mxu0 %v5399_v1  ;;  %5101 = vmatpush3.bf16.msra.mxu1 %v5407_v4  ;;  %v5404_v9 = vld [vmem:[#allocation8 + $0x28] sm:$0xff]   ;;  %v5410_v10 = vld [vmem:[#allocation10 + $0x18] sm:$0xff]   ;;  %v5405_v11 = vld [vmem:[#allocation8 + $0x30] sm:$0xff]   ;;  %vm4086_vm13 = vcmask 1043459   ;;  %vm4088_vm14 = vcmask 1044484   ;;  %vm4090_vm15 = vcmask 1045509  }
 0x12f   : > { %5082 = vmatprep.subr.bf16.mxu0 %v6282_v0  ;;  %5102 = vmatprep.subr.bf16.mxu1 %v6282_v0  ;;  %v5411_v12 = vld [vmem:[#allocation10 + $0x20] sm:$0xff]   ;;  %v5406_v13 = vld [vmem:[#allocation8 + $0x38] sm:$0xff]   ;;  %v615_v14 = vld [vmem:[%s520_s9] sm:$0x1]  ;;  %s7283_s4 = sld [smem:[#allocation36_spill]]  ;;  %s613_s25 = scalar_lea.vmem [#allocation17], %s4644_s21 }
 0x130   : > { %v5412_v15 = vld [vmem:[#allocation10 + $0x28] sm:$0xff]   ;;  %v632_v16 = vpack.c.bf16 %v615_v14, %v615_v14  ;;  %v5413_v17 = vld [vmem:[#allocation10 + $0x30] sm:$0xff]   ;;  %v5417_v18 = vld [vmem:[#allocation11 + $0x40] sm:$0xff]   ;;  %s4457_s16 = sshll.u32 %s613_s25, 4  ;;  %s5014_s24 = sshll.u32 %s6382_s14, 8  ;;  %s7148_s16 = int_to_ptr.vmem [resolvable:$true] %s4457_s16 }
 0x131   : > { %v5419_v19 = vld [vmem:[#allocation11 + $0x48] sm:$0xff]   ;;  %v5414_v20 = vld [vmem:[#allocation10 + $0x38] sm:$0xff]   ;;  %v5421_v22 = vld [vmem:[#allocation11 + $0x50] sm:$0xff]   ;;  %s7284_s7 = sld [smem:[#allocation38_spill]]  ;;  %s4444_s15 = scalar_lea.sflag [#allocation4], %s6702_s27 }
 0x132   : > { %5083 = vmatpush3.bf16.msra.mxu0 %v5400_v2  ;;  %5103 = vmatpush3.bf16.msra.mxu1 %v5408_v6  ;;  %v723_v21 = vld [vmem:[%s6712_s1] sm:$0xff]  ;;  %v5415_v23 = vld [vmem:[#allocation11] sm:$0xff]   ;;  %v5416_v26 = vld [vmem:[#allocation11 + $0x8] sm:$0xff]   ;;  %s6185_s21 = scalar_lea.vmem %s7148_s16, 256  ;;  %p7285_p1 = scmp.ne.s32.totalorder %s7254_s29, 0 }
 0x133   : > { %5084 = vmatprep.subr.bf16.mxu0 %v6282_v0  ;;  %5104 = vmatprep.subr.bf16.mxu1 %v6282_v0  ;;  %v740_v24 = vpack.c.bf16 %v723_v21, %v723_v21  ;;  %v5423_v25 = vld [vmem:[#allocation11 + $0x58] sm:$0xff]   ;;  %v5425_v27 = vld [vmem:[#allocation11 + $0x60] sm:$0xff]   ;;  %v5418_v28 = vld [vmem:[#allocation11 + $0x10] sm:$0xff]   ;;  %p6186_p0 = scmp.ne.s32.totalorder %s7148_s16, %s6185_s21  ;;  %s6288_s14 = smov [#allocation17]  }
 0x134   : > { %v5427_v29 = vld [vmem:[#allocation11 + $0x68] sm:$0xff]   ;;  %v5420_v30 = vld [vmem:[#allocation11 + $0x18] sm:$0xff]   ;;  %v5422_v31 = vld [vmem:[#allocation11 + $0x20] sm:$0xff]   ;;  %s6189_s1 = sshll.u32 %s6288_s14, 4  ;;  %s6190_s1 = int_to_ptr.vmem [resolvable:$false] %s6189_s1 }
 0x135   : > { %v5424_v32 = vld [vmem:[#allocation11 + $0x28] sm:$0xff]   ;;  %v5426_v33 = vld [vmem:[#allocation11 + $0x30] sm:$0xff]   ;;  %v5428_v34 = vld [vmem:[#allocation11 + $0x38] sm:$0xff]   ;;  %p6187_p8 = pnand %p6186_p0, %p7285_p1  ;;  %p6192_p12 = scmp.lt.s32.totalorder %s7148_s16, %s6190_s1 }
 0x136   : > { %5085 = vmatpush3.bf16.msra.mxu0 %v5401_v3  ;;  %5105 = vmatpush3.bf16.msra.mxu1 %v5409_v8  ;;  %v5429_v35 = vld [vmem:[#allocation11 + $0x70] sm:$0xff]   ;;  %v840_v37 = vld [vmem:[%s6721_s3 + $0x8] sm:$0xff] }
 0x137   : > { %5086 = vmatprep.subr.bf16.mxu0 %v6282_v0  ;;  %5106 = vmatprep.subr.bf16.mxu1 %v6282_v0  ;;  %v839_v36 = vld [vmem:[%s6721_s3] sm:$0xff]  ;;  %v5430_v39 = vld [vmem:[#allocation11 + $0x78] sm:$0xff]   ;;  %s7282_s3 = sld [smem:[#allocation35_spill]]  ;;  %s7153_s30 = scalar_lea.hbm %s7284_s7, %s5014_s24 }
 0x138   : > { %v963_v38 = vpack.c.bf16 %v840_v37, %v839_v36  ;;  %v5433_v40 = vld [vmem:[#allocation16 + $0x84] ss:$8 sps:$4 sm:$0xff]   ;;  %v633_v41 = vld [vmem:[%s7276_s10] sm:$0x1]  ;;  %v5431_v48 = vld [vmem:[#allocation16 + $0x80] ss:$8 sps:$4 sm:$0xff]   ;;  %p6188_p10 = pneg %p6187_p8 }
 0x139   : > { %v5436_v50 = vld [vmem:[#allocation16 + $0x94] ss:$8 sps:$4 sm:$0xff]   ;;  %v5434_v51 = vld [vmem:[#allocation16 + $0x90] ss:$8 sps:$4 sm:$0xff]   ;;  %v5439_v53 = vld [vmem:[#allocation16 + $0xa4] ss:$8 sps:$4 sm:$0xff]  }
 0x13a   : > { %5087 = vmatpush3.bf16.msra.mxu0 %v5402_v5  ;;  %5107 = vmatpush3.bf16.msra.mxu1 %v5410_v10  ;;  %v5437_v57 = vld [vmem:[#allocation16 + $0xa0] ss:$8 sps:$4 sm:$0xff]   ;;  %v5442_v58 = vld [vmem:[#allocation16 + $0xb4] ss:$8 sps:$4 sm:$0xff]   ;;  %v5440_v59 = vld [vmem:[#allocation16 + $0xb0] ss:$8 sps:$4 sm:$0xff]  }
 0x13b   : > { %5088 = vmatprep.subr.bf16.mxu0 %v6282_v0  ;;  %5108 = vmatprep.subr.bf16.mxu1 %v6282_v0  ;;  %v5445_v60 = vld [vmem:[#allocation16 + $0xc4] ss:$8 sps:$4 sm:$0xff]   ;;  %v5443_v61 = vld [vmem:[#allocation16 + $0xc0] ss:$8 sps:$4 sm:$0xff]   ;;  %v5448_v62 = vld [vmem:[#allocation16 + $0xd4] ss:$8 sps:$4 sm:$0xff]  }
 0x13c   : > { %v5446_v63 = vld [vmem:[#allocation16 + $0xd0] ss:$8 sps:$4 sm:$0xff]   ;;  %v5451_v5 = vld [vmem:[#allocation16 + $0xe4] ss:$8 sps:$4 sm:$0xff]   ;;  %v5449_v6 = vld [vmem:[#allocation16 + $0xe0] ss:$8 sps:$4 sm:$0xff]  }
 0x13d   : > { %v5452_v8 = vld [vmem:[#allocation16 + $0xf0] ss:$8 sps:$4 sm:$0xff]   ;;  %v6284_v10 = vmov 0   ;;  %v5469_v37 = vld [vmem:[#allocation16 + $0x44] ss:$8 sps:$4 sm:$0xff]  }
 0x13e   : > { %5089 = vmatpush3.bf16.msra.mxu0 %v5403_v7  ;;  %5109 = vmatpush3.bf16.msra.mxu1 %v5411_v12  ;;  %v5454_v7 = vld [vmem:[#allocation16 + $0xf4] ss:$8 sps:$4 sm:$0xff]   ;;  %v4677_v14 = vld [vmem:[%s7276_s10 + $0x2] ss:$0 sm:$0xff] }
 0x13f   : > { %5090 = vmatprep.subr.bf16.mxu0 %v6282_v0  ;;  %5110 = vmatprep.subr.bf16.mxu1 %v6282_v0  ;;  %v5464_v36 = vld [vmem:[#allocation16 + $0x30] ss:$8 sps:$4 sm:$0xff]  }
 0x140   : > { %5396 = vset.pattern.permute.xlu1 %v6284_v10  ;;  %5395 = vset.pattern.permute.xlu0 %v6284_v10 }
 0x142   : > { %5091 = vmatpush3.bf16.msra.mxu0 %v5404_v9  ;;  %5111 = vmatpush3.bf16.msra.mxu1 %v5412_v15  ;;  %v5457_v9 = vld [vmem:[#allocation16 + $0x4] ss:$8 sps:$4 sm:$0xff]  }
 0x143   : > { %5092 = vmatprep.subr.bf16.mxu0 %v6282_v0  ;;  %5112 = vmatprep.subr.bf16.mxu1 %v6282_v0 }
 0x146   : > { %5093 = vmatpush3.bf16.msra.mxu0 %v5405_v11  ;;  %5113 = vmatpush3.bf16.msra.mxu1 %v5413_v17  ;;  %v835_v11 = vlaneseq }
 0x147   : > { %5094 = vmatprep.subr.bf16.mxu0 %v6282_v0  ;;  %5114 = vmatprep.subr.bf16.mxu1 %v6282_v0 }
 0x148   : > { %v6790_v12 = vshrl.u32 %v835_v11, 7 }
 0x14a   : > { %5095 = vmatpush3.bf16.msra.mxu0 %v5406_v13  ;;  %5115 = vmatpush3.bf16.msra.mxu1 %v5414_v20  ;;  %v6793_v13 = vsub.s32 0, %v6790_v12  ;;  %vm1065_vm1 = vcmp.ge.s32.totalorder %v6790_v12, 1  ;;  %vm1069_vm2 = vcmp.lt.s32.totalorder %v6790_v12, 1  ;;  %vm1078_vm5 = vcmp.lt.s32.totalorder %v6790_v12, 2 }
 0x14b   : > { %5120 = vmatprep.subr.bf16.mxu0 %v6282_v0  ;;  %5140 = vmatprep.subr.bf16.mxu1 %v6282_v0  ;;  %vm6812_vm4 = vmpackc.low %vm6285_vm3, %vm1065_vm1  ;;  %vm1074_vm6 = vcmp.ge.s32.totalorder %v6790_v12, 2  ;;  %vm837_vm8 = vcmp.lt.s32.totalorder %v6790_v12, 6  ;;  %vm4092_vm1 = vcmask 1046534  }
 0x14c   : > { %vm6828_vm7 = vmpackc.low %vm6285_vm3, %vm1074_vm6 }
 0x14d   : > { %5097 = vmatmul.mubr.bf16.vlgmr.msra.gmra.mrb[0].mxu0 %v632_v16  ;;  %5117 = vmatmul.mubr.bf16.vlgmr.msra.gmra.mrb[0].mxu1 %v740_v24  ;;  %vm4969_vm9 = vmpackc.low %vm837_vm8, %vm837_vm8 }
 0x14e   : > { %5121 = vmatpush3.bf16.msra.mxu0 %v5417_v18  ;;  %5136 = vmatprep.mubr.msk.bf16.mxu0 %vm6283_vm0, %v6282_v0 }
 0x14f   : > { %5122 = vmatprep.subr.bf16.mxu0 %v6282_v0  ;;  %5141 = vmatpush3.bf16.msra.mxu1 %v5415_v23 }
 0x150   : > { %5142 = vmatprep.subr.bf16.mxu1 %v6282_v0  ;;  %5156 = vmatprep.mubr.msk.bf16.mxu1 %vm6283_vm0, %v6282_v0 }
 0x152   : > { %5123 = vmatpush3.bf16.msra.mxu0 %v5419_v19 }
 0x153   : > { %5124 = vmatprep.subr.bf16.mxu0 %v6282_v0  ;;  %5143 = vmatpush3.bf16.msra.mxu1 %v5416_v26  ;;  %v5455_v26 = vld [vmem:[#allocation16] ss:$8 sps:$4 sm:$0xff]  }
 0x154   : > { %5144 = vmatprep.subr.bf16.mxu1 %v6282_v0 }
 0x156   : > { %5125 = vmatpush3.bf16.msra.mxu0 %v5421_v22 }
 0x157   : > { %5126 = vmatprep.subr.bf16.mxu0 %v6282_v0  ;;  %5145 = vmatpush3.bf16.msra.mxu1 %v5418_v28 }
 0x158   : > { %5146 = vmatprep.subr.bf16.mxu1 %v6282_v0 }
 0x15a   : > { %5127 = vmatpush3.bf16.msra.mxu0 %v5423_v25 }
 0x15b   : > { %5128 = vmatprep.subr.bf16.mxu0 %v6282_v0  ;;  %5147 = vmatpush3.bf16.msra.mxu1 %v5420_v30 }
 0x15c   : > { %5148 = vmatprep.subr.bf16.mxu1 %v6282_v0 }
 0x15e   : > { %5129 = vmatpush3.bf16.msra.mxu0 %v5425_v27 }
 0x15f   : > { %5130 = vmatprep.subr.bf16.mxu0 %v6282_v0  ;;  %5149 = vmatpush3.bf16.msra.mxu1 %v5422_v31  ;;  %v5460_v31 = vld [vmem:[#allocation16 + $0x14] ss:$8 sps:$4 sm:$0xff]  }
 0x160   : > { %5150 = vmatprep.subr.bf16.mxu1 %v6282_v0 }
 0x162   : > { %5131 = vmatpush3.bf16.msra.mxu0 %v5427_v29  ;;  %v5766_v29 = vld [vmem:[#allocation16 + $0x650] ss:$8 sps:$4 sm:$0xff]  }
 0x163   : > { %5132 = vmatprep.subr.bf16.mxu0 %v6282_v0  ;;  %5151 = vmatpush3.bf16.msra.mxu1 %v5424_v32  ;;  %v5458_v32 = vld [vmem:[#allocation16 + $0x10] ss:$8 sps:$4 sm:$0xff]  }
 0x164   : > { %5152 = vmatprep.subr.bf16.mxu1 %v6282_v0 }
 0x166   : > { %5133 = vmatpush3.bf16.msra.mxu0 %v5429_v35  ;;  %v5466_v35 = vld [vmem:[#allocation16 + $0x34] ss:$8 sps:$4 sm:$0xff]  }
 0x167   : > { %5153 = vmatpush3.bf16.msra.mxu1 %v5426_v33  ;;  %5134 = vmatprep.subr.bf16.mxu0 %v6282_v0  ;;  %v5463_v33 = vld [vmem:[#allocation16 + $0x24] ss:$8 sps:$4 sm:$0xff]  }
 0x168   : > { %5154 = vmatprep.subr.bf16.mxu1 %v6282_v0 }
 0x16a   : > { %5135 = vmatpush3.bf16.msra.mxu0 %v5430_v39  ;;  %v5472_v39 = vld [vmem:[#allocation16 + $0x54] ss:$8 sps:$4 sm:$0xff]  }
 0x16b   : > { %5155 = vmatpush3.bf16.msra.mxu1 %v5428_v34  ;;  %1198 = vmatprep.subr.bf16.mxu0 %v5433_v40  ;;  %v5461_v34 = vld [vmem:[#allocation16 + $0x20] ss:$8 sps:$4 sm:$0xff]   ;;  %v5470_v40 = vld [vmem:[#allocation16 + $0x50] ss:$8 sps:$4 sm:$0xff]  }
 0x16e   : > { %5157 = vmatmul.mubr.bf16.vlgmr.msra.gmra.mrb[4].mxu1 %v963_v38  ;;  %v5467_v38 = vld [vmem:[#allocation16 + $0x40] ss:$8 sps:$4 sm:$0xff]  }
 0x16f   : > { %1703 = vmatprep.mubr.bf16.mxu1 %v6284_v10 }
 0x220   : > { %v716_v42 = vpop.f32.mrb[0].mxu0  ;;  %v6783_v52 = vpop.f32.mrb[0].mxu1 }
 0x221   : > { %v717_v43 = vadd.f32 %v716_v42, %v633_v41  ;;  %v5098_v44 = vpop.f32.mrb[1].mxu0  ;;  %v5118_v54 = vpop.f32.mrb[1].mxu1  ;;  %v5475_v41 = vld [vmem:[#allocation16 + $0x64] ss:$8 sps:$4 sm:$0xff]   ;;  %v5473_v42 = vld [vmem:[#allocation16 + $0x60] ss:$8 sps:$4 sm:$0xff]  }
 0x222   : > { %v719_v45 = vpop.f32.mrb[2].mxu0  ;;  %v831_v55 = vpop.f32.mrb[2].mxu1  ;;  %v5484_v54 = vld [vmem:[#allocation16 + $0x114] ss:$8 sps:$4 sm:$0xff]  }
 0x223   : > { %v722_v46 = vmax.f32 %v717_v43, 0.0  ;;  %v5099_v47 = vpop.f32.mrb[3].mxu0  ;;  %v5119_v56 = vpop.f32.mrb[3].mxu1  ;;  %v5478_v43 = vld [vmem:[#allocation16 + $0x74] ss:$8 sps:$4 sm:$0xff]  }
 0x224   : > { %v5481_v47 = vld [vmem:[#allocation16 + $0x104] ss:$8 sps:$4 sm:$0xff]   ;;  %v5482_v55 = vld [vmem:[#allocation16 + $0x110] ss:$8 sps:$4 sm:$0xff]  }
 0x225   : > { %v858_v49 = vpack.c.bf16 %v722_v46, %v722_v46  ;;  %v5476_v46 = vld [vmem:[#allocation16 + $0x70] ss:$8 sps:$4 sm:$0xff]   ;;  %v5487_v56 = vld [vmem:[#allocation16 + $0x124] ss:$8 sps:$4 sm:$0xff]  }
 0x227   : > { %5137 = vmatmul.mubr.bf16.vlgmr.msra.gmra.mrb[4].mxu0 %v858_v49 }
 0x228   : > { %1199 = vmatpush1.bf16.msra.mxu0 %v5431_v48  ;;  %1230 = vmatprep.mubr.bf16.mxu0 %v6284_v10 }
 0x229   : > { %1200 = vmatprep.subr.bf16.mxu0 %v5436_v50  ;;  %v5790_v50 = vld [vmem:[#allocation16 + $0x750] ss:$8 sps:$4 sm:$0xff]  }
 0x22c   : > { %1201 = vmatpush1.bf16.msra.mxu0 %v5434_v51  ;;  %v5479_v51 = vld [vmem:[#allocation16 + $0x100] ss:$8 sps:$4 sm:$0xff]  }
 0x22d   : > { %1202 = vmatprep.subr.bf16.mxu0 %v5439_v53 }
 0x230   : > { %1203 = vmatpush1.bf16.msra.mxu0 %v5437_v57  ;;  %v5485_v57 = vld [vmem:[#allocation16 + $0x120] ss:$8 sps:$4 sm:$0xff]  }
 0x231   : > { %1204 = vmatprep.subr.bf16.mxu0 %v5442_v58  ;;  %v5490_v58 = vld [vmem:[#allocation16 + $0x134] ss:$8 sps:$4 sm:$0xff]  }
 0x234   : > { %1205 = vmatpush1.bf16.msra.mxu0 %v5440_v59  ;;  %v5488_v59 = vld [vmem:[#allocation16 + $0x130] ss:$8 sps:$4 sm:$0xff]  }
 0x235   : > { %1206 = vmatprep.subr.bf16.mxu0 %v5445_v60  ;;  %v5493_v60 = vld [vmem:[#allocation16 + $0x144] ss:$8 sps:$4 sm:$0xff]  }
 0x238   : > { %1207 = vmatpush1.bf16.msra.mxu0 %v5443_v61  ;;  %v5491_v61 = vld [vmem:[#allocation16 + $0x140] ss:$8 sps:$4 sm:$0xff]  }
 0x239   : > { %1208 = vmatprep.subr.bf16.mxu0 %v5448_v62  ;;  %v5496_v62 = vld [vmem:[#allocation16 + $0x154] ss:$8 sps:$4 sm:$0xff]  }
 0x23c   : > { %1209 = vmatpush1.bf16.msra.mxu0 %v5446_v63  ;;  %v5494_v63 = vld [vmem:[#allocation16 + $0x150] ss:$8 sps:$4 sm:$0xff]  }
 0x23d   : > { %1210 = vmatprep.subr.bf16.mxu0 %v5451_v5 }
 0x240   : > { %1211 = vmatpush1.bf16.msra.mxu0 %v5449_v6  ;;  %v5505_v6 = vld [vmem:[#allocation16 + $0x204] ss:$8 sps:$4 sm:$0xff]  }
 0x241   : > { %v1051_v1 = vpop.f32.mrb[4].mxu1  ;;  %1212 = vmatprep.subr.bf16.mxu0 %v5454_v7  ;;  %v5503_v7 = vld [vmem:[#allocation16 + $0x200] ss:$8 sps:$4 sm:$0xff]   ;;  %1671 = vmatprep.subr.bf16.mxu1 %v5505_v6  ;;  %v5536_v6 = vld [vmem:[#allocation16 + $0x1b0] ss:$8 sps:$4 sm:$0xff]  }
 0x242   : > { %v5158_v2 = vpop.f32.mrb[5].mxu1  ;;  %v1052_v16 = vadd.f32 %v4677_v14, %v1051_v1  ;;  %v5499_v1 = vld [vmem:[#allocation16 + $0x164] ss:$8 sps:$4 sm:$0xff]   ;;  %1672 = vmatpush1.bf16.msra.mxu1 %v5503_v7 }
 0x243   : > { %v1054_v3 = vpop.f32.mrb[6].mxu1  ;;  %v5497_v2 = vld [vmem:[#allocation16 + $0x160] ss:$8 sps:$4 sm:$0xff]   ;;  %v5541_v7 = vld [vmem:[#allocation16 + $0x1c4] ss:$8 sps:$4 sm:$0xff]  }
 0x244   : > { %v5159_v4 = vpop.f32.mrb[7].mxu1  ;;  %1213 = vmatpush1.bf16.msra.mxu0 %v5452_v8  ;;  %v1055_v17 = vadd.f32 %v4677_v14, %v1054_v3  ;;  %v5502_v3 = vld [vmem:[#allocation16 + $0x174] ss:$8 sps:$4 sm:$0xff]   ;;  %v5511_v14 = vld [vmem:[#allocation16 + $0x224] ss:$8 sps:$4 sm:$0xff]  }
 0x245   : > { %1321 = vmatprep.subr.bf16.mxu0 %v5457_v9  ;;  %v5500_v4 = vld [vmem:[#allocation16 + $0x170] ss:$8 sps:$4 sm:$0xff]   ;;  %v5508_v8 = vld [vmem:[#allocation16 + $0x214] ss:$8 sps:$4 sm:$0xff]  }
 0x246   : > { %v5506_v9 = vld [vmem:[#allocation16 + $0x210] ss:$8 sps:$4 sm:$0xff]   ;;  %1673 = vmatprep.subr.bf16.mxu1 %v5508_v8  ;;  %v5539_v8 = vld [vmem:[#allocation16 + $0x1c0] ss:$8 sps:$4 sm:$0xff]  }
 0x247   : > { %1674 = vmatpush1.bf16.msra.mxu1 %v5506_v9  ;;  %v5544_v9 = vld [vmem:[#allocation16 + $0x1d4] ss:$8 sps:$4 sm:$0xff]  }
 0x248   : > { %1675 = vmatprep.subr.bf16.mxu1 %v5511_v14  ;;  %v5542_v14 = vld [vmem:[#allocation16 + $0x1d0] ss:$8 sps:$4 sm:$0xff]  }
 0x2fa   : > { %v941_v15 = vpop.f32.mrb[4].mxu0 }
 0x2fb   : > { %v1061_v18 = vrot.slane %v941_v15, %v6793_v13  ;;  %v5138_v19 = vpop.f32.mrb[5].mxu0  ;;  %v5509_v15 = vld [vmem:[#allocation16 + $0x220] ss:$8 sps:$4 sm:$0xff]  }
 0x2fc   : > { %v944_v20 = vpop.f32.mrb[6].mxu0  ;;  %1676 = vmatpush1.bf16.msra.mxu1 %v5509_v15  ;;  %v5515_v19 = vld [vmem:[#allocation16 + $0x240] ss:$8 sps:$4 sm:$0xff]   ;;  %v5547_v15 = vld [vmem:[#allocation16 + $0x1e4] ss:$8 sps:$4 sm:$0xff]  }
 0x2fd   : > { %v6799_v21 = vadd.f32 %v1061_v18, %v1052_v16  ;;  %v6801_v22 = vadd.f32 %v1061_v18, %v1055_v17  ;;  %v5139_v23 = vpop.f32.mrb[7].mxu0  ;;  %v5514_v16 = vld [vmem:[#allocation16 + $0x234] ss:$8 sps:$4 sm:$0xff]   ;;  %v5512_v17 = vld [vmem:[#allocation16 + $0x230] ss:$8 sps:$4 sm:$0xff]  }
 0x2fe   : > { %1677 = vmatprep.subr.bf16.mxu1 %v5514_v16  ;;  %v5517_v18 = vld [vmem:[#allocation16 + $0x244] ss:$8 sps:$4 sm:$0xff]   ;;  %v5520_v20 = vld [vmem:[#allocation16 + $0x254] ss:$8 sps:$4 sm:$0xff]   ;;  %v5518_v23 = vld [vmem:[#allocation16 + $0x250] ss:$8 sps:$4 sm:$0xff]  }
 0x2ff   : > { %v1067_v24 = vrot.slane %v6799_v21, 7  ;;  %v1068_v25 = vrot.slane %v6801_v22, 7  ;;  %v1076_v44 = vrot.slane %v6799_v21, 6  ;;  %v1077_v45 = vrot.slane %v6801_v22, 6  ;;  %v5545_v16 = vld [vmem:[#allocation16 + $0x1e0] ss:$8 sps:$4 sm:$0xff]  }
 0x300   : > { %v1381_v5 = vpack.c.bf16 %v6801_v22, %v6799_v21  ;;  %1678 = vmatpush1.bf16.msra.mxu1 %v5512_v17  ;;  %v5550_v17 = vld [vmem:[#allocation16 + $0x1f4] ss:$8 sps:$4 sm:$0xff]  }
 0x301   : > { %v1070_v27 = vsel %vm1069_vm2, %v1067_v24, %v1068_v25  ;;  %v1071_v28 = vsel %vm1069_vm2, %v1068_v25, %v1067_v24  ;;  %v1079_v48 = vsel %vm1078_vm5, %v1076_v44, %v1077_v45  ;;  %v1080_v49 = vsel %vm1078_vm5, %v1077_v45, %v1076_v44  ;;  %1679 = vmatprep.subr.bf16.mxu1 %v5517_v18  ;;  %v5523_v24 = vld [vmem:[#allocation16 + $0x264] ss:$8 sps:$4 sm:$0xff]   ;;  %v5521_v25 = vld [vmem:[#allocation16 + $0x260] ss:$8 sps:$4 sm:$0xff]  }
 0x302   : > { %v4703_v30 = vpack.c.bf16 %v1070_v27, %v1071_v28  ;;  %v4722_v53 = vpack.c.bf16 %v1079_v48, %v1080_v49  ;;  %v5526_v27 = vld [vmem:[#allocation16 + $0x274] ss:$8 sps:$4 sm:$0xff]   ;;  %v5529_v28 = vld [vmem:[#allocation16 + $0x184] ss:$8 sps:$4 sm:$0xff]  }
 0x304   : > { %4704 = vmatmul.mubr.msk.bf16.vlgmr.msra.gmra.mrb[8].mxu0 %vm6812_vm4, %v4703_v30  ;;  %1680 = vmatpush1.bf16.msra.mxu1 %v5515_v19  ;;  %v6839_v30 = vsub.s32 1, %v6790_v12  ;;  %v5548_v19 = vld [vmem:[#allocation16 + $0x1f0] ss:$8 sps:$4 sm:$0xff]  }
 0x305   : > { %1322 = vmatpush1.bf16.msra.mxu0 %v5455_v26  ;;  %1353 = vmatprep.mubr.bf16.mxu0 %v6284_v10  ;;  %v5524_v26 = vld [vmem:[#allocation16 + $0x270] ss:$8 sps:$4 sm:$0xff]  }
 0x306   : > { %1323 = vmatprep.subr.bf16.mxu0 %v5460_v31  ;;  %1681 = vmatprep.subr.bf16.mxu1 %v5520_v20  ;;  %v1509_v31 = vld [vmem:[%s7281_s23] sm:$0x3] }
 0x308   : > { %1682 = vmatpush1.bf16.msra.mxu1 %v5518_v23  ;;  %v5553_v23 = vld [vmem:[#allocation16 + $0x284] ss:$8 sps:$4 sm:$0xff]  }
 0x309   : > { %1324 = vmatpush1.bf16.msra.mxu0 %v5458_v32  ;;  %1683 = vmatprep.subr.bf16.mxu1 %v5523_v24  ;;  %v1518_v32 = vrot.slane %v1509_v31, %v6839_v30 }
 0x30a   : > { %1325 = vmatprep.subr.bf16.mxu0 %v5463_v33 }
 0x30c   : > { %1684 = vmatpush1.bf16.msra.mxu1 %v5521_v25 }
 0x30d   : > { %1326 = vmatpush1.bf16.msra.mxu0 %v5461_v34  ;;  %1685 = vmatprep.subr.bf16.mxu1 %v5526_v27 }
 0x30e   : > { %1327 = vmatprep.subr.bf16.mxu0 %v5466_v35 }
 0x310   : > { %1686 = vmatpush1.bf16.msra.mxu1 %v5524_v26  ;;  %v5551_v26 = vld [vmem:[#allocation16 + $0x280] ss:$8 sps:$4 sm:$0xff]  }
 0x311   : > { %1328 = vmatpush1.bf16.msra.mxu0 %v5464_v36  ;;  %1794 = vmatprep.subr.bf16.mxu1 %v5529_v28  ;;  %v5556_v28 = vld [vmem:[#allocation16 + $0x294] ss:$8 sps:$4 sm:$0xff]  }
 0x312   : > { %1329 = vmatprep.subr.bf16.mxu0 %v5469_v37 }
 0x315   : > { %1330 = vmatpush1.bf16.msra.mxu0 %v5467_v38 }
 0x316   : > { %1331 = vmatprep.subr.bf16.mxu0 %v5472_v39 }
 0x319   : > { %1332 = vmatpush1.bf16.msra.mxu0 %v5470_v40 }
 0x31a   : > { %1333 = vmatprep.subr.bf16.mxu0 %v5475_v41 }
 0x31d   : > { %1334 = vmatpush1.bf16.msra.mxu0 %v5473_v42 }
 0x31e   : > { %1335 = vmatprep.subr.bf16.mxu0 %v5478_v43 }
 0x321   : > { %1336 = vmatpush1.bf16.msra.mxu0 %v5476_v46 }
 0x322   : > { %1462 = vmatprep.subr.bf16.mxu0 %v5481_v47  ;;  %v1514_v47 = vrot.slane %v1509_v31, %v6793_v13  ;;  %v5554_v31 = vld [vmem:[#allocation16 + $0x290] ss:$8 sps:$4 sm:$0xff]  }
 0x324   : > { %4723 = vmatmul.mubr.msk.bf16.vlgmr.msra.gmra.mrb[8].mxu0 %vm6828_vm7, %v4722_v53 }
 0x325   : > { %1463 = vmatpush1.bf16.msra.mxu0 %v5479_v51  ;;  %1494 = vmatprep.mubr.bf16.mxu0 %v6284_v10 }
 0x326   : > { %1464 = vmatprep.subr.bf16.mxu0 %v5484_v54 }
 0x329   : > { %1465 = vmatpush1.bf16.msra.mxu0 %v5482_v55 }
 0x32a   : > { %1466 = vmatprep.subr.bf16.mxu0 %v5487_v56 }
 0x32d   : > { %1467 = vmatpush1.bf16.msra.mxu0 %v5485_v57 }
 0x32e   : > { %1468 = vmatprep.subr.bf16.mxu0 %v5490_v58 }
 0x331   : > { %1469 = vmatpush1.bf16.msra.mxu0 %v5488_v59 }
 0x332   : > { %1470 = vmatprep.subr.bf16.mxu0 %v5493_v60 }
 0x335   : > { %1471 = vmatpush1.bf16.msra.mxu0 %v5491_v61 }
 0x336   : > { %1472 = vmatprep.subr.bf16.mxu0 %v5496_v62  ;;  %v5527_v62 = vld [vmem:[#allocation16 + $0x180] ss:$8 sps:$4 sm:$0xff]  }
 0x339   : > { %1473 = vmatpush1.bf16.msra.mxu0 %v5494_v63 }
 0x33a   : > { %1474 = vmatprep.subr.bf16.mxu0 %v5499_v1 }
 0x33d   : > { %1475 = vmatpush1.bf16.msra.mxu0 %v5497_v2 }
 0x33e   : > { %1476 = vmatprep.subr.bf16.mxu0 %v5502_v3  ;;  %v5532_v3 = vld [vmem:[#allocation16 + $0x194] ss:$8 sps:$4 sm:$0xff]  }
 0x341   : > { %1477 = vmatpush1.bf16.msra.mxu0 %v5500_v4  ;;  %v5533_v4 = vld [vmem:[#allocation16 + $0x1a0] ss:$8 sps:$4 sm:$0xff]  }
 0x344   : > { %1495 = vmatmul.mubr.bf16.vlgmr.msra.gmra.mrb[8].mxu0 %v1381_v5  ;;  %v5538_v5 = vld [vmem:[#allocation16 + $0x1b4] ss:$8 sps:$4 sm:$0xff]  }
 0x345   : > { %2177 = vmatprep.mubr.bf16.mxu0 %v6284_v10 }
 0x417   : > { %v1496_v33 = vpop.f32.mrb[8].mxu0 }
 0x418   : > { %v1498_v34 = vpop.f32.mrb[9].mxu0  ;;  %v1521_v48 = vadd.f32 %v1514_v47, %v1496_v33  ;;  %v5557_v33 = vld [vmem:[#allocation16 + $0x2a0] ss:$8 sps:$4 sm:$0xff]  }
 0x419   : > { %v1522_v35 = vadd.f32 %v1518_v32, %v1498_v34  ;;  %v1500_v36 = vpop.f32.mrb[10].mxu0  ;;  %v5562_v34 = vld [vmem:[#allocation16 + $0x2b4] ss:$8 sps:$4 sm:$0xff]  }
 0x41a   : > { %v1502_v37 = vpop.f32.mrb[11].mxu0  ;;  %v1523_v53 = vadd.f32 %v1514_v47, %v1500_v36  ;;  %v5565_v36 = vld [vmem:[#allocation16 + $0x2c4] ss:$8 sps:$4 sm:$0xff]   ;;  %v5580_v47 = vld [vmem:[#allocation16 + $0x394] ss:$8 sps:$4 sm:$0xff]  }
 0x41b   : > { %v1525_v38 = vsub.f32 0.0, %v1522_v35  ;;  %v1524_v39 = vadd.f32 %v1518_v32, %v1502_v37  ;;  %v5559_v32 = vld [vmem:[#allocation16 + $0x2a4] ss:$8 sps:$4 sm:$0xff]   ;;  %v5560_v35 = vld [vmem:[#allocation16 + $0x2b0] ss:$8 sps:$4 sm:$0xff]  }
 0x41c   : > { %v5563_v37 = vld [vmem:[#allocation16 + $0x2c0] ss:$8 sps:$4 sm:$0xff]  }
 0x41d   : > { %v1527_v40 = vmul.f32 1.442695, %v1525_v38  ;;  %v1526_v41 = vsub.f32 0.0, %v1524_v39  ;;  %v5568_v38 = vld [vmem:[#allocation16 + $0x2d4] ss:$8 sps:$4 sm:$0xff]  }
 0x41e   : > { %v5566_v39 = vld [vmem:[#allocation16 + $0x2d0] ss:$8 sps:$4 sm:$0xff]  }
 0x41f   : > { %5839 = vpow2.f32 %v1527_v40  ;;  %v1529_v42 = vmul.f32 1.442695, %v1526_v41  ;;  %v5571_v40 = vld [vmem:[#allocation16 + $0x2e4] ss:$8 sps:$4 sm:$0xff]   ;;  %v5569_v41 = vld [vmem:[#allocation16 + $0x2e0] ss:$8 sps:$4 sm:$0xff]  }
 0x421   : > { %5841 = vpow2.f32 %v1529_v42  ;;  %v5574_v42 = vld [vmem:[#allocation16 + $0x2f4] ss:$8 sps:$4 sm:$0xff]  }
 0x429   : > { %v5840_v43 = vpop.eup %5839 }
 0x42a   : > { %v1531_v44 = vadd.f32 1.0, %v5840_v43  ;;  %v5572_v43 = vld [vmem:[#allocation16 + $0x2f0] ss:$8 sps:$4 sm:$0xff]  }
 0x42b   : > { %v5842_v45 = vpop.eup %5841 }
 0x42c   : > { %5843 = vrcp.f32 %v1531_v44  ;;  %v1532_v46 = vadd.f32 1.0, %v5842_v45  ;;  %v5577_v45 = vld [vmem:[#allocation16 + $0x384] ss:$8 sps:$4 sm:$0xff]  }
 0x42d   : > { %2145 = vmatprep.subr.bf16.mxu0 %v5577_v45  ;;  %v5608_v45 = vld [vmem:[#allocation16 + $0x330] ss:$8 sps:$4 sm:$0xff]  }
 0x42e   : > { %5845 = vrcp.f32 %v1532_v46  ;;  %v5575_v46 = vld [vmem:[#allocation16 + $0x380] ss:$8 sps:$4 sm:$0xff]  }
 0x42f   : > { %2146 = vmatpush1.bf16.msra.mxu0 %v5575_v46  ;;  %v5613_v46 = vld [vmem:[#allocation16 + $0x344] ss:$8 sps:$4 sm:$0xff]  }
 0x430   : > { %2147 = vmatprep.subr.bf16.mxu0 %v5580_v47  ;;  %v5611_v47 = vld [vmem:[#allocation16 + $0x340] ss:$8 sps:$4 sm:$0xff]  }
 0x436   : > { %v5844_v49 = vpop.eup %5843 }
 0x437   : > { %v1537_v51 = vmul.f32 %v5844_v49, %v1521_v48  ;;  %v5578_v48 = vld [vmem:[#allocation16 + $0x390] ss:$8 sps:$4 sm:$0xff]   ;;  %v5583_v49 = vld [vmem:[#allocation16 + $0x3a4] ss:$8 sps:$4 sm:$0xff]  }
 0x438   : > { %v5846_v54 = vpop.eup %5845  ;;  %2148 = vmatpush1.bf16.msra.mxu0 %v5578_v48  ;;  %v5616_v48 = vld [vmem:[#allocation16 + $0x354] ss:$8 sps:$4 sm:$0xff]  }
 0x439   : > { %v1539_v55 = vmax.f32 %v1537_v51, 0.0  ;;  %v1538_v56 = vmul.f32 %v5846_v54, %v1523_v53  ;;  %v5581_v51 = vld [vmem:[#allocation16 + $0x3a0] ss:$8 sps:$4 sm:$0xff]   ;;  %2149 = vmatprep.subr.bf16.mxu0 %v5583_v49  ;;  %v5586_v53 = vld [vmem:[#allocation16 + $0x3b4] ss:$8 sps:$4 sm:$0xff]  }
 0x43a   : > { %v5584_v54 = vld [vmem:[#allocation16 + $0x3b0] ss:$8 sps:$4 sm:$0xff]  }
 0x43b   : > { %v6847_v57 = vadd.f32 %v1539_v55, %v6799_v21  ;;  %v1540_v58 = vmax.f32 %v1538_v56, 0.0  ;;  %v5530_v21 = vld [vmem:[#allocation16 + $0x190] ss:$8 sps:$4 sm:$0xff]   ;;  %v5589_v55 = vld [vmem:[#allocation16 + $0x3c4] ss:$8 sps:$4 sm:$0xff]  }
 0x43c   : > { %2150 = vmatpush1.bf16.msra.mxu0 %v5581_v51  ;;  %v5587_v56 = vld [vmem:[#allocation16 + $0x3c0] ss:$8 sps:$4 sm:$0xff]   ;;  %v5614_v49 = vld [vmem:[#allocation16 + $0x350] ss:$8 sps:$4 sm:$0xff]   ;;  %v5619_v51 = vld [vmem:[#allocation16 + $0x364] ss:$8 sps:$4 sm:$0xff]  }
 0x43d   : > { %v6850_v59 = vadd.f32 %v1540_v58, %v6801_v22  ;;  %v1543_v60 = vrot.slane %v6847_v57, 7  ;;  %v5535_v22 = vld [vmem:[#allocation16 + $0x1a4] ss:$8 sps:$4 sm:$0xff]   ;;  %v1549_v20 = vrot.slane %v6847_v57, 6  ;;  %2151 = vmatprep.subr.bf16.mxu0 %v5586_v53  ;;  %v5592_v58 = vld [vmem:[#allocation16 + $0x3d4] ss:$8 sps:$4 sm:$0xff]  }
 0x43e   : > { %v5617_v53 = vld [vmem:[#allocation16 + $0x360] ss:$8 sps:$4 sm:$0xff]  }
 0x43f   : > { %v1544_v61 = vrot.slane %v6850_v59, 7  ;;  %v1550_v18 = vrot.slane %v6850_v59, 6  ;;  %v1854_v44 = vpack.c.bf16 %v6850_v59, %v6847_v57 }
 0x440   : > { %2152 = vmatpush1.bf16.msra.mxu0 %v5584_v54  ;;  %v5622_v54 = vld [vmem:[#allocation16 + $0x374] ss:$8 sps:$4 sm:$0xff]  }
 0x441   : > { %v1545_v63 = vsel %vm1069_vm2, %v1543_v60, %v1544_v61  ;;  %v1546_v1 = vsel %vm1069_vm2, %v1544_v61, %v1543_v60  ;;  %v1551_v24 = vsel %vm1078_vm5, %v1549_v20, %v1550_v18  ;;  %v1552_v25 = vsel %vm1078_vm5, %v1550_v18, %v1549_v20  ;;  %2153 = vmatprep.subr.bf16.mxu0 %v5589_v55  ;;  %v5590_v60 = vld [vmem:[#allocation16 + $0x3d0] ss:$8 sps:$4 sm:$0xff]   ;;  %v5595_v61 = vld [vmem:[#allocation16 + $0x3e4] ss:$8 sps:$4 sm:$0xff]  }
 0x442   : > { %v4757_v2 = vpack.c.bf16 %v1545_v63, %v1546_v1  ;;  %v4776_v27 = vpack.c.bf16 %v1551_v24, %v1552_v25  ;;  %v5596_v63 = vld [vmem:[#allocation16 + $0x3f0] ss:$8 sps:$4 sm:$0xff]   ;;  %v5598_v1 = vld [vmem:[#allocation16 + $0x3f4] ss:$8 sps:$4 sm:$0xff]  }
 0x444   : > { %4758 = vmatmul.mubr.msk.bf16.vlgmr.msra.gmra.mrb[8].mxu1 %vm6812_vm4, %v4757_v2  ;;  %2154 = vmatpush1.bf16.msra.mxu0 %v5587_v56  ;;  %v5601_v2 = vld [vmem:[#allocation16 + $0x304] ss:$8 sps:$4 sm:$0xff]   ;;  %v5620_v56 = vld [vmem:[#allocation16 + $0x370] ss:$8 sps:$4 sm:$0xff]  }
 0x445   : > { %1795 = vmatpush1.bf16.msra.mxu1 %v5527_v62  ;;  %1826 = vmatprep.mubr.bf16.mxu1 %v6284_v10  ;;  %v5593_v62 = vld [vmem:[#allocation16 + $0x3e0] ss:$8 sps:$4 sm:$0xff]  }
 0x446   : > { %1796 = vmatprep.subr.bf16.mxu1 %v5532_v3  ;;  %2155 = vmatprep.subr.bf16.mxu0 %v5592_v58  ;;  %v4794_v3 = vld [vmem:[%s7281_s23 + $0x2] sm:$0x3] }
 0x448   : > { %2156 = vmatpush1.bf16.msra.mxu0 %v5590_v60  ;;  %v5625_v60 = vld [vmem:[#allocation16 + $0x404] ss:$8 sps:$4 sm:$0xff]  }
 0x449   : > { %1797 = vmatpush1.bf16.msra.mxu1 %v5530_v21  ;;  %2157 = vmatprep.subr.bf16.mxu0 %v5595_v61  ;;  %v1992_v21 = vrot.slane %v4794_v3, %v6839_v30 }
 0x44a   : > { %1798 = vmatprep.subr.bf16.mxu1 %v5535_v22 }
 0x44c   : > { %2158 = vmatpush1.bf16.msra.mxu0 %v5593_v62 }
 0x44d   : > { %1799 = vmatpush1.bf16.msra.mxu1 %v5533_v4  ;;  %2159 = vmatprep.subr.bf16.mxu0 %v5598_v1 }
 0x44e   : > { %1800 = vmatprep.subr.bf16.mxu1 %v5538_v5 }
 0x450   : > { %2160 = vmatpush1.bf16.msra.mxu0 %v5596_v63  ;;  %v5623_v63 = vld [vmem:[#allocation16 + $0x400] ss:$8 sps:$4 sm:$0xff]  }
 0x451   : > { %1801 = vmatpush1.bf16.msra.mxu1 %v5536_v6  ;;  %2268 = vmatprep.subr.bf16.mxu0 %v5601_v2  ;;  %v5628_v2 = vld [vmem:[#allocation16 + $0x414] ss:$8 sps:$4 sm:$0xff]  }
 0x452   : > { %1802 = vmatprep.subr.bf16.mxu1 %v5541_v7 }
 0x455   : > { %1803 = vmatpush1.bf16.msra.mxu1 %v5539_v8 }
 0x456   : > { %1804 = vmatprep.subr.bf16.mxu1 %v5544_v9 }
 0x459   : > { %1805 = vmatpush1.bf16.msra.mxu1 %v5542_v14 }
 0x45a   : > { %1806 = vmatprep.subr.bf16.mxu1 %v5547_v15 }
 0x45d   : > { %1807 = vmatpush1.bf16.msra.mxu1 %v5545_v16 }
 0x45e   : > { %1808 = vmatprep.subr.bf16.mxu1 %v5550_v17 }
 0x461   : > { %1809 = vmatpush1.bf16.msra.mxu1 %v5548_v19 }
 0x462   : > { %1935 = vmatprep.subr.bf16.mxu1 %v5553_v23  ;;  %v1988_v23 = vrot.slane %v4794_v3, %v6793_v13  ;;  %v5626_v3 = vld [vmem:[#allocation16 + $0x410] ss:$8 sps:$4 sm:$0xff]  }
 0x464   : > { %4777 = vmatmul.mubr.msk.bf16.vlgmr.msra.gmra.mrb[8].mxu1 %vm6828_vm7, %v4776_v27 }
 0x465   : > { %1936 = vmatpush1.bf16.msra.mxu1 %v5551_v26  ;;  %1967 = vmatprep.mubr.bf16.mxu1 %v6284_v10 }
 0x466   : > { %1937 = vmatprep.subr.bf16.mxu1 %v5556_v28 }
 0x469   : > { %1938 = vmatpush1.bf16.msra.mxu1 %v5554_v31 }
 0x46a   : > { %1939 = vmatprep.subr.bf16.mxu1 %v5559_v32 }
 0x46d   : > { %1940 = vmatpush1.bf16.msra.mxu1 %v5557_v33 }
 0x46e   : > { %1941 = vmatprep.subr.bf16.mxu1 %v5562_v34 }
 0x471   : > { %1942 = vmatpush1.bf16.msra.mxu1 %v5560_v35 }
 0x472   : > { %1943 = vmatprep.subr.bf16.mxu1 %v5565_v36 }
 0x475   : > { %1944 = vmatpush1.bf16.msra.mxu1 %v5563_v37 }
 0x476   : > { %1945 = vmatprep.subr.bf16.mxu1 %v5568_v38  ;;  %v5599_v38 = vld [vmem:[#allocation16 + $0x300] ss:$8 sps:$4 sm:$0xff]  }
 0x479   : > { %1946 = vmatpush1.bf16.msra.mxu1 %v5566_v39 }
 0x47a   : > { %1947 = vmatprep.subr.bf16.mxu1 %v5571_v40 }
 0x47d   : > { %1948 = vmatpush1.bf16.msra.mxu1 %v5569_v41 }
 0x47e   : > { %1949 = vmatprep.subr.bf16.mxu1 %v5574_v42  ;;  %v5604_v42 = vld [vmem:[#allocation16 + $0x314] ss:$8 sps:$4 sm:$0xff]  }
 0x481   : > { %1950 = vmatpush1.bf16.msra.mxu1 %v5572_v43  ;;  %v5605_v43 = vld [vmem:[#allocation16 + $0x320] ss:$8 sps:$4 sm:$0xff]  }
 0x484   : > { %1968 = vmatmul.mubr.bf16.vlgmr.msra.gmra.mrb[8].mxu1 %v1854_v44  ;;  %v5610_v44 = vld [vmem:[#allocation16 + $0x334] ss:$8 sps:$4 sm:$0xff]  }
 0x485   : > { %2651 = vmatprep.mubr.bf16.mxu1 %v6284_v10 }
 0x557   : > { %v1969_v22 = vpop.f32.mrb[8].mxu1 }
 0x558   : > { %v1971_v4 = vpop.f32.mrb[9].mxu1  ;;  %v1995_v24 = vadd.f32 %v1988_v23, %v1969_v22  ;;  %v5629_v22 = vld [vmem:[#allocation16 + $0x420] ss:$8 sps:$4 sm:$0xff]  }
 0x559   : > { %v1996_v5 = vadd.f32 %v1992_v21, %v1971_v4  ;;  %v1973_v6 = vpop.f32.mrb[10].mxu1  ;;  %v5634_v4 = vld [vmem:[#allocation16 + $0x434] ss:$8 sps:$4 sm:$0xff]  }
 0x55a   : > { %v1975_v7 = vpop.f32.mrb[11].mxu1  ;;  %v1997_v27 = vadd.f32 %v1988_v23, %v1973_v6  ;;  %v5637_v6 = vld [vmem:[#allocation16 + $0x444] ss:$8 sps:$4 sm:$0xff]   ;;  %v5652_v23 = vld [vmem:[#allocation16 + $0x514] ss:$8 sps:$4 sm:$0xff]  }
 0x55b   : > { %v1999_v8 = vsub.f32 0.0, %v1996_v5  ;;  %v1998_v9 = vadd.f32 %v1992_v21, %v1975_v7  ;;  %v5631_v21 = vld [vmem:[#allocation16 + $0x424] ss:$8 sps:$4 sm:$0xff]   ;;  %v5632_v5 = vld [vmem:[#allocation16 + $0x430] ss:$8 sps:$4 sm:$0xff]  }
 0x55c   : > { %v5635_v7 = vld [vmem:[#allocation16 + $0x440] ss:$8 sps:$4 sm:$0xff]  }
 0x55d   : > { %v2001_v14 = vmul.f32 1.442695, %v1999_v8  ;;  %v2000_v15 = vsub.f32 0.0, %v1998_v9  ;;  %v5640_v8 = vld [vmem:[#allocation16 + $0x454] ss:$8 sps:$4 sm:$0xff]  }
 0x55e   : > { %v5638_v9 = vld [vmem:[#allocation16 + $0x450] ss:$8 sps:$4 sm:$0xff]  }
 0x55f   : > { %5847 = vpow2.f32 %v2001_v14  ;;  %v2003_v16 = vmul.f32 1.442695, %v2000_v15  ;;  %v5643_v14 = vld [vmem:[#allocation16 + $0x464] ss:$8 sps:$4 sm:$0xff]   ;;  %v5641_v15 = vld [vmem:[#allocation16 + $0x460] ss:$8 sps:$4 sm:$0xff]  }
 0x561   : > { %5849 = vpow2.f32 %v2003_v16  ;;  %v5646_v16 = vld [vmem:[#allocation16 + $0x474] ss:$8 sps:$4 sm:$0xff]  }
 0x569   : > { %v5848_v17 = vpop.eup %5847 }
 0x56a   : > { %v2005_v18 = vadd.f32 1.0, %v5848_v17  ;;  %v5644_v17 = vld [vmem:[#allocation16 + $0x470] ss:$8 sps:$4 sm:$0xff]  }
 0x56b   : > { %v5850_v19 = vpop.eup %5849 }
 0x56c   : > { %5851 = vrcp.f32 %v2005_v18  ;;  %v2006_v20 = vadd.f32 1.0, %v5850_v19  ;;  %v5649_v19 = vld [vmem:[#allocation16 + $0x504] ss:$8 sps:$4 sm:$0xff]  }
 0x56d   : > { %2619 = vmatprep.subr.bf16.mxu1 %v5649_v19  ;;  %v5680_v19 = vld [vmem:[#allocation16 + $0x4b0] ss:$8 sps:$4 sm:$0xff]  }
 0x56e   : > { %5853 = vrcp.f32 %v2006_v20  ;;  %v5647_v20 = vld [vmem:[#allocation16 + $0x500] ss:$8 sps:$4 sm:$0xff]  }
 0x56f   : > { %2620 = vmatpush1.bf16.msra.mxu1 %v5647_v20  ;;  %v5685_v20 = vld [vmem:[#allocation16 + $0x4c4] ss:$8 sps:$4 sm:$0xff]  }
 0x570   : > { %2621 = vmatprep.subr.bf16.mxu1 %v5652_v23  ;;  %v5683_v23 = vld [vmem:[#allocation16 + $0x4c0] ss:$8 sps:$4 sm:$0xff]  }
 0x576   : > { %v5852_v25 = vpop.eup %5851 }
 0x577   : > { %v2011_v26 = vmul.f32 %v5852_v25, %v1995_v24  ;;  %v5650_v24 = vld [vmem:[#allocation16 + $0x510] ss:$8 sps:$4 sm:$0xff]   ;;  %v5655_v25 = vld [vmem:[#allocation16 + $0x524] ss:$8 sps:$4 sm:$0xff]  }
 0x578   : > { %v5854_v28 = vpop.eup %5853  ;;  %2622 = vmatpush1.bf16.msra.mxu1 %v5650_v24  ;;  %v5688_v24 = vld [vmem:[#allocation16 + $0x4d4] ss:$8 sps:$4 sm:$0xff]  }
 0x579   : > { %v2013_v31 = vmax.f32 %v2011_v26, 0.0  ;;  %v2012_v32 = vmul.f32 %v5854_v28, %v1997_v27  ;;  %v5653_v26 = vld [vmem:[#allocation16 + $0x520] ss:$8 sps:$4 sm:$0xff]   ;;  %2623 = vmatprep.subr.bf16.mxu1 %v5655_v25  ;;  %v5658_v27 = vld [vmem:[#allocation16 + $0x534] ss:$8 sps:$4 sm:$0xff]  }
 0x57a   : > { %v5656_v28 = vld [vmem:[#allocation16 + $0x530] ss:$8 sps:$4 sm:$0xff]  }
 0x57b   : > { %v6879_v33 = vadd.f32 %v2013_v31, %v6847_v57  ;;  %v2014_v34 = vmax.f32 %v2012_v32, 0.0  ;;  %v5602_v57 = vld [vmem:[#allocation16 + $0x310] ss:$8 sps:$4 sm:$0xff]   ;;  %v5661_v31 = vld [vmem:[#allocation16 + $0x544] ss:$8 sps:$4 sm:$0xff]  }
 0x57c   : > { %2624 = vmatpush1.bf16.msra.mxu1 %v5653_v26  ;;  %v5659_v32 = vld [vmem:[#allocation16 + $0x540] ss:$8 sps:$4 sm:$0xff]   ;;  %v5686_v25 = vld [vmem:[#allocation16 + $0x4d0] ss:$8 sps:$4 sm:$0xff]   ;;  %v5691_v26 = vld [vmem:[#allocation16 + $0x4e4] ss:$8 sps:$4 sm:$0xff]  }
 0x57d   : > { %v6882_v35 = vadd.f32 %v2014_v34, %v6850_v59  ;;  %v2017_v36 = vrot.slane %v6879_v33, 7  ;;  %v5607_v59 = vld [vmem:[#allocation16 + $0x324] ss:$8 sps:$4 sm:$0xff]   ;;  %v2023_v58 = vrot.slane %v6879_v33, 6  ;;  %2625 = vmatprep.subr.bf16.mxu1 %v5658_v27  ;;  %v5664_v34 = vld [vmem:[#allocation16 + $0x554] ss:$8 sps:$4 sm:$0xff]  }
 0x57e   : > { %v5689_v27 = vld [vmem:[#allocation16 + $0x4e0] ss:$8 sps:$4 sm:$0xff]  }
 0x57f   : > { %v2018_v37 = vrot.slane %v6882_v35, 7  ;;  %v2024_v55 = vrot.slane %v6882_v35, 6  ;;  %v2328_v18 = vpack.c.bf16 %v6882_v35, %v6879_v33 }
 0x580   : > { %2626 = vmatpush1.bf16.msra.mxu1 %v5656_v28  ;;  %v5694_v28 = vld [vmem:[#allocation16 + $0x4f4] ss:$8 sps:$4 sm:$0xff]  }
 0x581   : > { %v2019_v39 = vsel %vm1069_vm2, %v2017_v36, %v2018_v37  ;;  %v2020_v40 = vsel %vm1069_vm2, %v2018_v37, %v2017_v36  ;;  %v2025_v61 = vsel %vm1078_vm5, %v2023_v58, %v2024_v55  ;;  %v2026_v62 = vsel %vm1078_vm5, %v2024_v55, %v2023_v58  ;;  %2627 = vmatprep.subr.bf16.mxu1 %v5661_v31  ;;  %v5662_v36 = vld [vmem:[#allocation16 + $0x550] ss:$8 sps:$4 sm:$0xff]   ;;  %v5667_v37 = vld [vmem:[#allocation16 + $0x564] ss:$8 sps:$4 sm:$0xff]  }
 0x582   : > { %v4812_v41 = vpack.c.bf16 %v2019_v39, %v2020_v40  ;;  %v4831_v1 = vpack.c.bf16 %v2025_v61, %v2026_v62  ;;  %v5668_v39 = vld [vmem:[#allocation16 + $0x570] ss:$8 sps:$4 sm:$0xff]   ;;  %v5670_v40 = vld [vmem:[#allocation16 + $0x574] ss:$8 sps:$4 sm:$0xff]  }
 0x584   : > { %4813 = vmatmul.mubr.msk.bf16.vlgmr.msra.gmra.mrb[12].mxu0 %vm6812_vm4, %v4812_v41  ;;  %2628 = vmatpush1.bf16.msra.mxu1 %v5659_v32  ;;  %v5673_v41 = vld [vmem:[#allocation16 + $0x484] ss:$8 sps:$4 sm:$0xff]   ;;  %v5692_v32 = vld [vmem:[#allocation16 + $0x4f0] ss:$8 sps:$4 sm:$0xff]  }
 0x585   : > { %2269 = vmatpush1.bf16.msra.mxu0 %v5599_v38  ;;  %2300 = vmatprep.mubr.bf16.mxu0 %v6284_v10  ;;  %v5665_v38 = vld [vmem:[#allocation16 + $0x560] ss:$8 sps:$4 sm:$0xff]  }
 0x586   : > { %2270 = vmatprep.subr.bf16.mxu0 %v5604_v42  ;;  %2629 = vmatprep.subr.bf16.mxu1 %v5664_v34  ;;  %v4849_v42 = vld [vmem:[%s7281_s23 + $0x4] sm:$0x3] }
 0x588   : > { %2630 = vmatpush1.bf16.msra.mxu1 %v5662_v36  ;;  %v5697_v36 = vld [vmem:[#allocation16 + $0x584] ss:$8 sps:$4 sm:$0xff]  }
 0x589   : > { %2271 = vmatpush1.bf16.msra.mxu0 %v5602_v57  ;;  %2631 = vmatprep.subr.bf16.mxu1 %v5667_v37  ;;  %v2466_v57 = vrot.slane %v4849_v42, %v6839_v30 }
 0x58a   : > { %2272 = vmatprep.subr.bf16.mxu0 %v5607_v59 }
 0x58c   : > { %2632 = vmatpush1.bf16.msra.mxu1 %v5665_v38 }
 0x58d   : > { %2273 = vmatpush1.bf16.msra.mxu0 %v5605_v43  ;;  %2633 = vmatprep.subr.bf16.mxu1 %v5670_v40 }
 0x58e   : > { %2274 = vmatprep.subr.bf16.mxu0 %v5610_v44 }
 0x590   : > { %2634 = vmatpush1.bf16.msra.mxu1 %v5668_v39  ;;  %v5695_v39 = vld [vmem:[#allocation16 + $0x580] ss:$8 sps:$4 sm:$0xff]  }
 0x591   : > { %2275 = vmatpush1.bf16.msra.mxu0 %v5608_v45  ;;  %2742 = vmatprep.subr.bf16.mxu1 %v5673_v41  ;;  %v5700_v41 = vld [vmem:[#allocation16 + $0x594] ss:$8 sps:$4 sm:$0xff]  }
 0x592   : > { %2276 = vmatprep.subr.bf16.mxu0 %v5613_v46 }
 0x595   : > { %2277 = vmatpush1.bf16.msra.mxu0 %v5611_v47 }
 0x596   : > { %2278 = vmatprep.subr.bf16.mxu0 %v5616_v48 }
 0x599   : > { %2279 = vmatpush1.bf16.msra.mxu0 %v5614_v49 }
 0x59a   : > { %2280 = vmatprep.subr.bf16.mxu0 %v5619_v51 }
 0x59d   : > { %2281 = vmatpush1.bf16.msra.mxu0 %v5617_v53 }
 0x59e   : > { %2282 = vmatprep.subr.bf16.mxu0 %v5622_v54 }
 0x5a1   : > { %2283 = vmatpush1.bf16.msra.mxu0 %v5620_v56 }
 0x5a2   : > { %2409 = vmatprep.subr.bf16.mxu0 %v5625_v60  ;;  %v2462_v60 = vrot.slane %v4849_v42, %v6793_v13  ;;  %v5698_v42 = vld [vmem:[#allocation16 + $0x590] ss:$8 sps:$4 sm:$0xff]  }
 0x5a4   : > { %4832 = vmatmul.mubr.msk.bf16.vlgmr.msra.gmra.mrb[12].mxu0 %vm6828_vm7, %v4831_v1 }
 0x5a5   : > { %2410 = vmatpush1.bf16.msra.mxu0 %v5623_v63  ;;  %2441 = vmatprep.mubr.bf16.mxu0 %v6284_v10 }
 0x5a6   : > { %2411 = vmatprep.subr.bf16.mxu0 %v5628_v2 }
 0x5a9   : > { %2412 = vmatpush1.bf16.msra.mxu0 %v5626_v3 }
 0x5aa   : > { %2413 = vmatprep.subr.bf16.mxu0 %v5631_v21 }
 0x5ad   : > { %2414 = vmatpush1.bf16.msra.mxu0 %v5629_v22 }
 0x5ae   : > { %2415 = vmatprep.subr.bf16.mxu0 %v5634_v4 }
 0x5b1   : > { %2416 = vmatpush1.bf16.msra.mxu0 %v5632_v5 }
 0x5b2   : > { %2417 = vmatprep.subr.bf16.mxu0 %v5637_v6 }
 0x5b5   : > { %2418 = vmatpush1.bf16.msra.mxu0 %v5635_v7 }
 0x5b6   : > { %2419 = vmatprep.subr.bf16.mxu0 %v5640_v8  ;;  %v5671_v8 = vld [vmem:[#allocation16 + $0x480] ss:$8 sps:$4 sm:$0xff]  }
 0x5b9   : > { %2420 = vmatpush1.bf16.msra.mxu0 %v5638_v9 }
 0x5ba   : > { %2421 = vmatprep.subr.bf16.mxu0 %v5643_v14 }
 0x5bd   : > { %2422 = vmatpush1.bf16.msra.mxu0 %v5641_v15 }
 0x5be   : > { %2423 = vmatprep.subr.bf16.mxu0 %v5646_v16  ;;  %v5676_v16 = vld [vmem:[#allocation16 + $0x494] ss:$8 sps:$4 sm:$0xff]  }
 0x5c1   : > { %2424 = vmatpush1.bf16.msra.mxu0 %v5644_v17  ;;  %v5677_v17 = vld [vmem:[#allocation16 + $0x4a0] ss:$8 sps:$4 sm:$0xff]  }
 0x5c4   : > { %2442 = vmatmul.mubr.bf16.vlgmr.msra.gmra.mrb[12].mxu0 %v2328_v18  ;;  %v5682_v18 = vld [vmem:[#allocation16 + $0x4b4] ss:$8 sps:$4 sm:$0xff]  }
 0x5c5   : > { %3125 = vmatprep.mubr.bf16.mxu0 %v6284_v10 }
 0x697   : > { %v2443_v59 = vpop.f32.mrb[12].mxu0 }
 0x698   : > { %v2445_v43 = vpop.f32.mrb[13].mxu0  ;;  %v2469_v61 = vadd.f32 %v2462_v60, %v2443_v59  ;;  %v5701_v59 = vld [vmem:[#allocation16 + $0x5a0] ss:$8 sps:$4 sm:$0xff]  }
 0x699   : > { %v2470_v44 = vadd.f32 %v2466_v57, %v2445_v43  ;;  %v2447_v45 = vpop.f32.mrb[14].mxu0  ;;  %v5706_v43 = vld [vmem:[#allocation16 + $0x5b4] ss:$8 sps:$4 sm:$0xff]  }
 0x69a   : > { %v2449_v46 = vpop.f32.mrb[15].mxu0  ;;  %v2471_v1 = vadd.f32 %v2462_v60, %v2447_v45  ;;  %v5709_v45 = vld [vmem:[#allocation16 + $0x5c4] ss:$8 sps:$4 sm:$0xff]   ;;  %v5721_v60 = vld [vmem:[#allocation11 + $0x90] sm:$0xff]  }
 0x69b   : > { %v2473_v47 = vsub.f32 0.0, %v2470_v44  ;;  %v2472_v48 = vadd.f32 %v2466_v57, %v2449_v46  ;;  %v5703_v57 = vld [vmem:[#allocation16 + $0x5a4] ss:$8 sps:$4 sm:$0xff]   ;;  %v5704_v44 = vld [vmem:[#allocation16 + $0x5b0] ss:$8 sps:$4 sm:$0xff]  }
 0x69c   : > { %v5707_v46 = vld [vmem:[#allocation16 + $0x5c0] ss:$8 sps:$4 sm:$0xff]  }
 0x69d   : > { %v2475_v49 = vmul.f32 1.442695, %v2473_v47  ;;  %v2474_v51 = vsub.f32 0.0, %v2472_v48  ;;  %v5712_v47 = vld [vmem:[#allocation16 + $0x5d4] ss:$8 sps:$4 sm:$0xff]  }
 0x69e   : > { %v5710_v48 = vld [vmem:[#allocation16 + $0x5d0] ss:$8 sps:$4 sm:$0xff]  }
 0x69f   : > { %5855 = vpow2.f32 %v2475_v49  ;;  %v2477_v53 = vmul.f32 1.442695, %v2474_v51  ;;  %v5715_v49 = vld [vmem:[#allocation16 + $0x5e4] ss:$8 sps:$4 sm:$0xff]   ;;  %v5713_v51 = vld [vmem:[#allocation16 + $0x5e0] ss:$8 sps:$4 sm:$0xff]  }
 0x6a1   : > { %5857 = vpow2.f32 %v2477_v53  ;;  %v5718_v53 = vld [vmem:[#allocation16 + $0x5f4] ss:$8 sps:$4 sm:$0xff]  }
 0x6a9   : > { %v5856_v54 = vpop.eup %5855 }
 0x6aa   : > { %v2479_v55 = vadd.f32 1.0, %v5856_v54  ;;  %v5716_v54 = vld [vmem:[#allocation16 + $0x5f0] ss:$8 sps:$4 sm:$0xff]  }
 0x6ab   : > { %v5858_v56 = vpop.eup %5857 }
 0x6ac   : > { %5859 = vrcp.f32 %v2479_v55  ;;  %v2480_v58 = vadd.f32 1.0, %v5858_v56  ;;  %v5719_v55 = vld [vmem:[#allocation11 + $0x80] sm:$0xff]  }
 0x6ae   : > { %5861 = vrcp.f32 %v2480_v58  ;;  %v5720_v58 = vld [vmem:[#allocation11 + $0x88] sm:$0xff]  }
 0x6b6   : > { %v5860_v62 = vpop.eup %5859 }
 0x6b7   : > { %v2485_v63 = vmul.f32 %v5860_v62, %v2469_v61  ;;  %v5722_v61 = vld [vmem:[#allocation11 + $0x98] sm:$0xff]   ;;  %v5723_v62 = vld [vmem:[#allocation11 + $0xa0] sm:$0xff]  }
 0x6b8   : > { %v5862_v2 = vpop.eup %5861 }
 0x6b9   : > { %v2487_v3 = vmax.f32 %v2485_v63, 0.0  ;;  %v2486_v21 = vmul.f32 %v5862_v2, %v2471_v1  ;;  %v5724_v63 = vld [vmem:[#allocation11 + $0xa8] sm:$0xff]   ;;  %v4660_v1 = vld [vmem:[%s7276_s10 + $0x1] ss:$0 sm:$0xff] }
 0x6ba   : > { %v5725_v2 = vld [vmem:[#allocation11 + $0xb0] sm:$0xff]  }
 0x6bb   : > { %v6911_v22 = vadd.f32 %v2487_v3, %v6879_v33  ;;  %v2488_v4 = vmax.f32 %v2486_v21, 0.0  ;;  %v5674_v33 = vld [vmem:[#allocation16 + $0x490] ss:$8 sps:$4 sm:$0xff]   ;;  %v829_v3 = vadd.f32 %v4660_v1, %v6783_v52  ;;  %v5729_v52 = vld [vmem:[#allocation16 + $0x684] ss:$8 sps:$4 sm:$0xff]  }
 0x6bc   : > { %v5726_v21 = vld [vmem:[#allocation11 + $0xb8] sm:$0xff]   ;;  %3093 = vmatprep.subr.bf16.mxu0 %v5729_v52 }
 0x6bd   : > { %v6914_v5 = vadd.f32 %v2488_v4, %v6882_v35  ;;  %v2491_v6 = vrot.slane %v6911_v22, 7  ;;  %v5679_v35 = vld [vmem:[#allocation16 + $0x4a4] ss:$8 sps:$4 sm:$0xff]   ;;  %v2497_v34 = vrot.slane %v6911_v22, 6  ;;  %v6949_v4 = vmax.f32 %v829_v3, 0.0 }
 0x6be   : > { %v5751_v3 = vld [vmem:[#allocation16 + $0x600] ss:$8 sps:$4 sm:$0xff]  }
 0x6bf   : > { %v2492_v7 = vrot.slane %v6914_v5, 7  ;;  %v2498_v31 = vrot.slane %v6914_v5, 6  ;;  %v2802_v56 = vpack.c.bf16 %v6914_v5, %v6911_v22 }
 0x6c1   : > { %v2493_v9 = vsel %vm1069_vm2, %v2491_v6, %v2492_v7  ;;  %v2494_v14 = vsel %vm1069_vm2, %v2492_v7, %v2491_v6  ;;  %v2499_v37 = vsel %vm1078_vm5, %v2497_v34, %v2498_v31  ;;  %v2500_v38 = vsel %vm1078_vm5, %v2498_v31, %v2497_v34  ;;  %v5727_v7 = vld [vmem:[#allocation16 + $0x680] ss:$8 sps:$4 sm:$0xff]  }
 0x6c2   : > { %v4867_v15 = vpack.c.bf16 %v2493_v9, %v2494_v14  ;;  %v4886_v40 = vpack.c.bf16 %v2499_v37, %v2500_v38  ;;  %v4970_v6 = vpack.c.bf16 %v6949_v4, %v6949_v4  ;;  %3094 = vmatpush1.bf16.msra.mxu0 %v5727_v7  ;;  %v5730_v9 = vld [vmem:[#allocation16 + $0x690] ss:$8 sps:$4 sm:$0xff]   ;;  %v5735_v14 = vld [vmem:[#allocation16 + $0x6a4] ss:$8 sps:$4 sm:$0xff]   ;;  %v5756_v7 = vld [vmem:[#allocation16 + $0x614] ss:$8 sps:$4 sm:$0xff]  }
 0x6c4   : > { %4868 = vmatmul.mubr.msk.bf16.vlgmr.msra.gmra.mrb[12].mxu1 %vm6812_vm4, %v4867_v15  ;;  %v5733_v15 = vld [vmem:[#allocation16 + $0x6a0] ss:$8 sps:$4 sm:$0xff]  }
 0x6c5   : > { %2743 = vmatpush1.bf16.msra.mxu1 %v5671_v8  ;;  %2774 = vmatprep.mubr.bf16.mxu1 %v6284_v10  ;;  %v5732_v8 = vld [vmem:[#allocation16 + $0x694] ss:$8 sps:$4 sm:$0xff]  }
 0x6c6   : > { %2744 = vmatprep.subr.bf16.mxu1 %v5676_v16  ;;  %3095 = vmatprep.subr.bf16.mxu0 %v5732_v8  ;;  %v5738_v16 = vld [vmem:[#allocation16 + $0x6b4] ss:$8 sps:$4 sm:$0xff]   ;;  %v5757_v8 = vld [vmem:[#allocation16 + $0x620] ss:$8 sps:$4 sm:$0xff]  }
 0x6c7   : > { %3096 = vmatpush1.bf16.msra.mxu0 %v5730_v9  ;;  %v5762_v9 = vld [vmem:[#allocation16 + $0x634] ss:$8 sps:$4 sm:$0xff]  }
 0x6c8   : > { %3097 = vmatprep.subr.bf16.mxu0 %v5735_v14  ;;  %v5760_v14 = vld [vmem:[#allocation16 + $0x630] ss:$8 sps:$4 sm:$0xff]  }
 0x6c9   : > { %2745 = vmatpush1.bf16.msra.mxu1 %v5674_v33  ;;  %v5736_v33 = vld [vmem:[#allocation16 + $0x6b0] ss:$8 sps:$4 sm:$0xff]  }
 0x6ca   : > { %2746 = vmatprep.subr.bf16.mxu1 %v5679_v35  ;;  %v5741_v35 = vld [vmem:[#allocation16 + $0x6c4] ss:$8 sps:$4 sm:$0xff]  }
 0x6cb   : > { %3098 = vmatpush1.bf16.msra.mxu0 %v5733_v15  ;;  %v5765_v15 = vld [vmem:[#allocation16 + $0x644] ss:$8 sps:$4 sm:$0xff]  }
 0x6cc   : > { %3099 = vmatprep.subr.bf16.mxu0 %v5738_v16  ;;  %v5763_v16 = vld [vmem:[#allocation16 + $0x640] ss:$8 sps:$4 sm:$0xff]  }
 0x6cd   : > { %2747 = vmatpush1.bf16.msra.mxu1 %v5677_v17  ;;  %v5739_v17 = vld [vmem:[#allocation16 + $0x6c0] ss:$8 sps:$4 sm:$0xff]  }
 0x6ce   : > { %2748 = vmatprep.subr.bf16.mxu1 %v5682_v18  ;;  %v5744_v18 = vld [vmem:[#allocation16 + $0x6d4] ss:$8 sps:$4 sm:$0xff]  }
 0x6cf   : > { %3100 = vmatpush1.bf16.msra.mxu0 %v5736_v33  ;;  %v5768_v33 = vld [vmem:[#allocation16 + $0x654] ss:$8 sps:$4 sm:$0xff]  }
 0x6d0   : > { %3101 = vmatprep.subr.bf16.mxu0 %v5741_v35  ;;  %v5771_v35 = vld [vmem:[#allocation16 + $0x664] ss:$8 sps:$4 sm:$0xff]  }
 0x6d1   : > { %2749 = vmatpush1.bf16.msra.mxu1 %v5680_v19  ;;  %v5742_v19 = vld [vmem:[#allocation16 + $0x6d0] ss:$8 sps:$4 sm:$0xff]  }
 0x6d2   : > { %2750 = vmatprep.subr.bf16.mxu1 %v5685_v20  ;;  %v5747_v20 = vld [vmem:[#allocation16 + $0x6e4] ss:$8 sps:$4 sm:$0xff]  }
 0x6d3   : > { %3102 = vmatpush1.bf16.msra.mxu0 %v5739_v17  ;;  %v5769_v17 = vld [vmem:[#allocation16 + $0x660] ss:$8 sps:$4 sm:$0xff]  }
 0x6d4   : > { %3103 = vmatprep.subr.bf16.mxu0 %v5744_v18  ;;  %v5774_v18 = vld [vmem:[#allocation16 + $0x674] ss:$8 sps:$4 sm:$0xff]  }
 0x6d5   : > { %2751 = vmatpush1.bf16.msra.mxu1 %v5683_v23  ;;  %v5745_v23 = vld [vmem:[#allocation16 + $0x6e0] ss:$8 sps:$4 sm:$0xff]  }
 0x6d6   : > { %2752 = vmatprep.subr.bf16.mxu1 %v5688_v24  ;;  %v5748_v24 = vld [vmem:[#allocation16 + $0x6f0] ss:$8 sps:$4 sm:$0xff]  }
 0x6d7   : > { %3104 = vmatpush1.bf16.msra.mxu0 %v5742_v19 }
 0x6d8   : > { %3105 = vmatprep.subr.bf16.mxu0 %v5747_v20  ;;  %v5772_v20 = vld [vmem:[#allocation16 + $0x670] ss:$8 sps:$4 sm:$0xff]  }
 0x6d9   : > { %2753 = vmatpush1.bf16.msra.mxu1 %v5686_v25  ;;  %v5750_v25 = vld [vmem:[#allocation16 + $0x6f4] ss:$8 sps:$4 sm:$0xff]  }
 0x6da   : > { %2754 = vmatprep.subr.bf16.mxu1 %v5691_v26  ;;  %v5753_v26 = vld [vmem:[#allocation16 + $0x604] ss:$8 sps:$4 sm:$0xff]  }
 0x6db   : > { %3106 = vmatpush1.bf16.msra.mxu0 %v5745_v23 }
 0x6dc   : > { %3107 = vmatprep.subr.bf16.mxu0 %v5750_v25 }
 0x6dd   : > { %2755 = vmatpush1.bf16.msra.mxu1 %v5689_v27  ;;  %v4904_v27 = vld [vmem:[%s7281_s23 + $0x6] sm:$0x3] }
 0x6de   : > { %2756 = vmatprep.subr.bf16.mxu1 %v5694_v28  ;;  %v2940_v28 = vrot.slane %v4904_v27, %v6839_v30 }
 0x6df   : > { %3108 = vmatpush1.bf16.msra.mxu0 %v5748_v24  ;;  %v5777_v24 = vld [vmem:[#allocation16 + $0x704] ss:$8 sps:$4 sm:$0xff]  }
 0x6e0   : > { %3216 = vmatprep.subr.bf16.mxu0 %v5753_v26 }
 0x6e1   : > { %2757 = vmatpush1.bf16.msra.mxu1 %v5692_v32 }
 0x6e2   : > { %2883 = vmatprep.subr.bf16.mxu1 %v5697_v36 }
 0x6e4   : > { %4887 = vmatmul.mubr.msk.bf16.vlgmr.msra.gmra.mrb[12].mxu1 %vm6828_vm7, %v4886_v40 }
 0x6e5   : > { %2884 = vmatpush1.bf16.msra.mxu1 %v5695_v39  ;;  %2915 = vmatprep.mubr.bf16.mxu1 %v6284_v10 }
 0x6e6   : > { %2885 = vmatprep.subr.bf16.mxu1 %v5700_v41 }
 0x6e9   : > { %2886 = vmatpush1.bf16.msra.mxu1 %v5698_v42 }
 0x6ea   : > { %2887 = vmatprep.subr.bf16.mxu1 %v5703_v57 }
 0x6ed   : > { %2888 = vmatpush1.bf16.msra.mxu1 %v5701_v59 }
 0x6ee   : > { %2889 = vmatprep.subr.bf16.mxu1 %v5706_v43 }
 0x6f1   : > { %2890 = vmatpush1.bf16.msra.mxu1 %v5704_v44 }
 0x6f2   : > { %2891 = vmatprep.subr.bf16.mxu1 %v5709_v45  ;;  %v2936_v45 = vrot.slane %v4904_v27, %v6793_v13  ;;  %v5775_v27 = vld [vmem:[#allocation16 + $0x700] ss:$8 sps:$4 sm:$0xff]  }
 0x6f5   : > { %2892 = vmatpush1.bf16.msra.mxu1 %v5707_v46 }
 0x6f6   : > { %2893 = vmatprep.subr.bf16.mxu1 %v5712_v47 }
 0x6f9   : > { %2894 = vmatpush1.bf16.msra.mxu1 %v5710_v48 }
 0x6fa   : > { %2895 = vmatprep.subr.bf16.mxu1 %v5715_v49 }
 0x6fd   : > { %2896 = vmatpush1.bf16.msra.mxu1 %v5713_v51 }
 0x6fe   : > { %2897 = vmatprep.subr.bf16.mxu1 %v5718_v53 }
 0x701   : > { %2898 = vmatpush1.bf16.msra.mxu1 %v5716_v54 }
 0x702   : > { %5160 = vmatprep.subr.bf16.mxu1 %v6282_v0 }
 0x704   : > { %2916 = vmatmul.mubr.bf16.vlgmr.msra.gmra.mrb[12].mxu1 %v2802_v56 }
 0x705   : > { %5161 = vmatpush3.bf16.msra.mxu1 %v5719_v55  ;;  %5176 = vmatprep.mubr.msk.bf16.mxu1 %vm6283_vm0, %v6282_v0 }
 0x706   : > { %5162 = vmatprep.subr.bf16.mxu1 %v6282_v0 }
 0x709   : > { %5163 = vmatpush3.bf16.msra.mxu1 %v5720_v58 }
 0x70a   : > { %5164 = vmatprep.subr.bf16.mxu1 %v6282_v0 }
 0x70d   : > { %5165 = vmatpush3.bf16.msra.mxu1 %v5721_v60 }
 0x70e   : > { %5166 = vmatprep.subr.bf16.mxu1 %v6282_v0 }
 0x711   : > { %5167 = vmatpush3.bf16.msra.mxu1 %v5722_v61 }
 0x712   : > { %5168 = vmatprep.subr.bf16.mxu1 %v6282_v0 }
 0x715   : > { %5169 = vmatpush3.bf16.msra.mxu1 %v5723_v62 }
 0x716   : > { %5170 = vmatprep.subr.bf16.mxu1 %v6282_v0 }
 0x719   : > { %5171 = vmatpush3.bf16.msra.mxu1 %v5724_v63 }
 0x71a   : > { %5172 = vmatprep.subr.bf16.mxu1 %v6282_v0 }
 0x71d   : > { %5173 = vmatpush3.bf16.msra.mxu1 %v5725_v2 }
 0x71e   : > { %5174 = vmatprep.subr.bf16.mxu1 %v6282_v0 }
 0x721   : > { %5175 = vmatpush3.bf16.msra.mxu1 %v5726_v21 }
 0x724   : > { %5177 = vmatmul.mubr.msk.bf16.vlgmr.msra.gmra.mrb[16].mxu1 %vm4969_vm9, %v4970_v6 }
 0x725   : > { %3692 = vmatprep.mubr.bf16.mxu1 %v6284_v10 }
 0x7d7   : > { %v2917_v31 = vpop.f32.mrb[12].mxu1 }
 0x7d8   : > { %v2919_v32 = vpop.f32.mrb[13].mxu1  ;;  %v2943_v46 = vadd.f32 %v2936_v45, %v2917_v31  ;;  %v5780_v31 = vld [vmem:[#allocation16 + $0x714] ss:$8 sps:$4 sm:$0xff]  }
 0x7d9   : > { %v2944_v34 = vadd.f32 %v2940_v28, %v2919_v32  ;;  %v2921_v36 = vpop.f32.mrb[14].mxu1  ;;  %v5778_v32 = vld [vmem:[#allocation16 + $0x710] ss:$8 sps:$4 sm:$0xff]  }
 0x7da   : > { %v2923_v37 = vpop.f32.mrb[15].mxu1  ;;  %v2945_v49 = vadd.f32 %v2936_v45, %v2921_v36  ;;  %v5781_v36 = vld [vmem:[#allocation16 + $0x720] ss:$8 sps:$4 sm:$0xff]  }
 0x7db   : > { %v2947_v38 = vsub.f32 0.0, %v2944_v34  ;;  %v2946_v39 = vadd.f32 %v2940_v28, %v2923_v37  ;;  %v5783_v34 = vld [vmem:[#allocation16 + $0x724] ss:$8 sps:$4 sm:$0xff]   ;;  %v5786_v37 = vld [vmem:[#allocation16 + $0x734] ss:$8 sps:$4 sm:$0xff]  }
 0x7dc   : > { %v5799_v45 = vld [vmem:[#allocation13] ss:$8 sps:$4 sm:$0xff]  }
 0x7dd   : > { %v2949_v40 = vmul.f32 1.442695, %v2947_v38  ;;  %v2948_v41 = vsub.f32 0.0, %v2946_v39  ;;  %v5784_v38 = vld [vmem:[#allocation16 + $0x730] ss:$8 sps:$4 sm:$0xff]  }
 0x7de   : > { %v5789_v39 = vld [vmem:[#allocation16 + $0x744] ss:$8 sps:$4 sm:$0xff]  }
 0x7df   : > { %5863 = vpow2.f32 %v2949_v40  ;;  %v2951_v42 = vmul.f32 1.442695, %v2948_v41  ;;  %v5787_v40 = vld [vmem:[#allocation16 + $0x740] ss:$8 sps:$4 sm:$0xff]   ;;  %v5792_v41 = vld [vmem:[#allocation16 + $0x754] ss:$8 sps:$4 sm:$0xff]  }
 0x7e1   : > { %5865 = vpow2.f32 %v2951_v42  ;;  %v5795_v42 = vld [vmem:[#allocation16 + $0x764] ss:$8 sps:$4 sm:$0xff]  }
 0x7e9   : > { %v5864_v57 = vpop.eup %5863 }
 0x7ea   : > { %v2953_v59 = vadd.f32 1.0, %v5864_v57  ;;  %v5798_v57 = vld [vmem:[#allocation16 + $0x774] ss:$8 sps:$4 sm:$0xff]  }
 0x7eb   : > { %v5866_v43 = vpop.eup %5865 }
 0x7ec   : > { %5867 = vrcp.f32 %v2953_v59  ;;  %v2954_v44 = vadd.f32 1.0, %v5866_v43  ;;  %v5796_v59 = vld [vmem:[#allocation16 + $0x770] ss:$8 sps:$4 sm:$0xff]  }
 0x7ee   : > { %5869 = vrcp.f32 %v2954_v44  ;;  %v5801_v44 = vld [vmem:[#allocation13 + $0x4] ss:$8 sps:$4 sm:$0xff]  }
 0x7ef   : > { %3660 = vmatprep.subr.bf16.mxu1 %v5801_v44 }
 0x7f0   : > { %3661 = vmatpush1.bf16.msra.mxu1 %v5799_v45 }
 0x7f6   : > { %v5868_v47 = vpop.eup %5867 }
 0x7f7   : > { %v2959_v48 = vmul.f32 %v5868_v47, %v2943_v46  ;;  %v6964_v51 = vpop.f32.mrb[16].mxu1  ;;  %v5804_v46 = vld [vmem:[#allocation13 + $0x14] ss:$8 sps:$4 sm:$0xff]   ;;  %v5802_v47 = vld [vmem:[#allocation13 + $0x10] ss:$8 sps:$4 sm:$0xff]  }
 0x7f8   : > { %v5870_v53 = vpop.eup %5869  ;;  %v5178_v54 = vpop.f32.mrb[17].mxu1  ;;  %3662 = vmatprep.subr.bf16.mxu1 %v5804_v46 }
 0x7f9   : > { %v2961_v55 = vmax.f32 %v2959_v48, 0.0  ;;  %v2960_v56 = vmul.f32 %v5870_v53, %v2945_v49  ;;  %v3547_v58 = vpop.f32.mrb[18].mxu1  ;;  %3663 = vmatpush1.bf16.msra.mxu1 %v5802_v47  ;;  %v5807_v48 = vld [vmem:[#allocation13 + $0x24] ss:$8 sps:$4 sm:$0xff]   ;;  %v5805_v49 = vld [vmem:[#allocation13 + $0x20] ss:$8 sps:$4 sm:$0xff]  }
 0x7fa   : > { %v5179_v60 = vpop.f32.mrb[19].mxu1  ;;  %3664 = vmatprep.subr.bf16.mxu1 %v5807_v48  ;;  %v5810_v53 = vld [vmem:[#allocation13 + $0x34] ss:$8 sps:$4 sm:$0xff]   ;;  %v5808_v54 = vld [vmem:[#allocation13 + $0x30] ss:$8 sps:$4 sm:$0xff]  }
 0x7fb   : > { %v6967_v61 = vadd.f32 %v2961_v55, %v6911_v22  ;;  %v2962_v62 = vmax.f32 %v2960_v56, 0.0  ;;  %v5754_v22 = vld [vmem:[#allocation16 + $0x610] ss:$8 sps:$4 sm:$0xff]   ;;  %v5811_v55 = vld [vmem:[#allocation13 + $0x40] ss:$8 sps:$4 sm:$0xff]  }
 0x7fc   : > { %v5813_v56 = vld [vmem:[#allocation13 + $0x44] ss:$8 sps:$4 sm:$0xff]   ;;  %v5816_v58 = vld [vmem:[#allocation13 + $0x54] ss:$8 sps:$4 sm:$0xff]   ;;  %v5814_v60 = vld [vmem:[#allocation13 + $0x50] ss:$8 sps:$4 sm:$0xff]  }
 0x7fd   : > { %v6970_v63 = vadd.f32 %v2962_v62, %v6914_v5  ;;  %v2965_v1 = vrot.slane %v6967_v61, 7  ;;  %v5759_v5 = vld [vmem:[#allocation16 + $0x624] ss:$8 sps:$4 sm:$0xff]   ;;  %v2971_v23 = vrot.slane %v6967_v61, 6  ;;  %3665 = vmatpush1.bf16.msra.mxu1 %v5805_v49 }
 0x7fe   : > { %3666 = vmatprep.subr.bf16.mxu1 %v5810_v53  ;;  %v5819_v62 = vld [vmem:[#allocation13 + $0x64] ss:$8 sps:$4 sm:$0xff]  }
 0x7ff   : > { %v2966_v2 = vrot.slane %v6970_v63, 7  ;;  %v2972_v19 = vrot.slane %v6970_v63, 6  ;;  %v3276_v43 = vpack.c.bf16 %v6970_v63, %v6967_v61 }
 0x801   : > { %v2967_v21 = vsel %vm1069_vm2, %v2965_v1, %v2966_v2  ;;  %v2968_v6 = vsel %vm1069_vm2, %v2966_v2, %v2965_v1  ;;  %v2973_v25 = vsel %vm1078_vm5, %v2971_v23, %v2972_v19  ;;  %v2974_v26 = vsel %vm1078_vm5, %v2972_v19, %v2971_v23  ;;  %3667 = vmatpush1.bf16.msra.mxu1 %v5808_v54  ;;  %v5817_v1 = vld [vmem:[#allocation13 + $0x60] ss:$8 sps:$4 sm:$0xff]   ;;  %v5822_v2 = vld [vmem:[#allocation13 + $0x74] ss:$8 sps:$4 sm:$0xff]  }
 0x802   : > { %v4922_v52 = vpack.c.bf16 %v2967_v21, %v2968_v6  ;;  %v4941_v28 = vpack.c.bf16 %v2973_v25, %v2974_v26  ;;  %3668 = vmatprep.subr.bf16.mxu1 %v5813_v56  ;;  %v4959_v21 = vld [vmem:[%s7281_s23 + $0x8] sm:$0x3]  ;;  %vm4094_vm2 = vcmask 1047559   ;;  %vm4107_vm5 = vcmask 64512  }
 0x803   : > { %v3414_v6 = vrot.slane %v4959_v21, %v6839_v30  ;;  %v3410_v19 = vrot.slane %v4959_v21, %v6793_v13 }
 0x804   : > { %4923 = vmatmul.mubr.msk.bf16.vlgmr.msra.gmra.mrb[16].mxu0 %vm6812_vm4, %v4922_v52 }
 0x805   : > { %3217 = vmatpush1.bf16.msra.mxu0 %v5751_v3  ;;  %3248 = vmatprep.mubr.bf16.mxu0 %v6284_v10  ;;  %v5820_v3 = vld [vmem:[#allocation13 + $0x70] ss:$8 sps:$4 sm:$0xff]  }
 0x806   : > { %3218 = vmatprep.subr.bf16.mxu0 %v5756_v7  ;;  %3669 = vmatpush1.bf16.msra.mxu1 %v5811_v55 }
 0x807   : > { %3670 = vmatprep.subr.bf16.mxu1 %v5816_v58 }
 0x809   : > { %3219 = vmatpush1.bf16.msra.mxu0 %v5754_v22 }
 0x80a   : > { %3220 = vmatprep.subr.bf16.mxu0 %v5759_v5  ;;  %3671 = vmatpush1.bf16.msra.mxu1 %v5814_v60 }
 0x80b   : > { %3672 = vmatprep.subr.bf16.mxu1 %v5819_v62 }
 0x80d   : > { %3221 = vmatpush1.bf16.msra.mxu0 %v5757_v8 }
 0x80e   : > { %3222 = vmatprep.subr.bf16.mxu0 %v5762_v9  ;;  %3673 = vmatpush1.bf16.msra.mxu1 %v5817_v1 }
 0x80f   : > { %3674 = vmatprep.subr.bf16.mxu1 %v5822_v2 }
 0x811   : > { %3223 = vmatpush1.bf16.msra.mxu0 %v5760_v14 }
 0x812   : > { %3224 = vmatprep.subr.bf16.mxu0 %v5765_v15  ;;  %3675 = vmatpush1.bf16.msra.mxu1 %v5820_v3 }
 0x813   : > { %5180 = vmatprep.subr.bf16.mxu1 %v6282_v0 }
 0x815   : > { %3225 = vmatpush1.bf16.msra.mxu0 %v5763_v16 }
 0x816   : > { %3226 = vmatprep.subr.bf16.mxu0 %v5768_v33 }
 0x819   : > { %3227 = vmatpush1.bf16.msra.mxu0 %v5766_v29 }
 0x81a   : > { %3228 = vmatprep.subr.bf16.mxu0 %v5771_v35 }
 0x81d   : > { %3229 = vmatpush1.bf16.msra.mxu0 %v5769_v17 }
 0x81e   : > { %3230 = vmatprep.subr.bf16.mxu0 %v5774_v18 }
 0x821   : > { %3231 = vmatpush1.bf16.msra.mxu0 %v5772_v20 }
 0x822   : > { %3357 = vmatprep.subr.bf16.mxu0 %v5777_v24 }
 0x824   : > { %4942 = vmatmul.mubr.msk.bf16.vlgmr.msra.gmra.mrb[16].mxu0 %vm6828_vm7, %v4941_v28 }
 0x825   : > { %3358 = vmatpush1.bf16.msra.mxu0 %v5775_v27  ;;  %3389 = vmatprep.mubr.bf16.mxu0 %v6284_v10  ;;  %v5793_v10 = vld [vmem:[#allocation16 + $0x760] ss:$8 sps:$4 sm:$0xff]  }
 0x826   : > { %3359 = vmatprep.subr.bf16.mxu0 %v5780_v31  ;;  %v838_v31 = vsel %vm837_vm8, %v6949_v4, 0.0  ;;  %v6286_v4 = vmov 1966171168  }
 0x829   : > { %3360 = vmatpush1.bf16.msra.mxu0 %v5778_v32 }
 0x82a   : > { %3361 = vmatprep.subr.bf16.mxu0 %v5783_v34  ;;  %v3456_v34 = vpack.c.bf16 %v838_v31, %v838_v31 }
 0x82d   : > { %3362 = vmatpush1.bf16.msra.mxu0 %v5781_v36 }
 0x82e   : > { %3363 = vmatprep.subr.bf16.mxu0 %v5786_v37 }
 0x831   : > { %3364 = vmatpush1.bf16.msra.mxu0 %v5784_v38 }
 0x832   : > { %3365 = vmatprep.subr.bf16.mxu0 %v5789_v39  ;;  %v4148_v39 = vsel %vm4146_vm10, %v3456_v34, 0 }
 0x835   : > { %3366 = vmatpush1.bf16.msra.mxu0 %v5787_v40  ;;  %v3709_v40 = vunpack.c.l.s4 %v6286_v4 }
 0x836   : > { %3367 = vmatprep.subr.bf16.mxu0 %v5792_v41 }
 0x837   : > { %v3710_v41 = vunpack.c.0.s8 %v3709_v40 }
 0x839   : > { %3368 = vmatpush1.bf16.msra.mxu0 %v5790_v50 }
 0x83a   : > { %3369 = vmatprep.subr.bf16.mxu0 %v5795_v42  ;;  %v4960_v42 = vld [vmem:[%s7276_s10 + $0x3] ss:$0 sm:$0xff] }
 0x83b   : > { %v3545_v47 = vadd.f32 %v4960_v42, %v6964_v51 }
 0x83d   : > { %3370 = vmatpush1.bf16.msra.mxu0 %v5793_v10  ;;  %v3550_v60 = vmax.f32 %v3545_v47, 0.0 }
 0x83e   : > { %3371 = vmatprep.subr.bf16.mxu0 %v5798_v57  ;;  %v3713_v57 = vsub.s32 %v3710_v41, %v6790_v12 }
 0x841   : > { %3372 = vmatpush1.bf16.msra.mxu0 %v5796_v59 }
 0x842   : > { %5206 = vmatprep.subr.bf16.mxu0 %v6282_v0 }
 0x844   : > { %3390 = vmatmul.mubr.bf16.vlgmr.msra.gmra.mrb[16].mxu0 %v3276_v43 }
 0x845   : > { %5222 = vmatprep.mubr.msk.bf16.mxu0 %vm6283_vm0, %v6282_v0 }
 0x917   : > { %v3391_v52 = vpop.f32.mrb[16].mxu0 }
 0x918   : > { %v3393_v7 = vpop.f32.mrb[17].mxu0  ;;  %v3417_v20 = vadd.f32 %v3410_v19, %v3391_v52 }
 0x919   : > { %v3418_v22 = vadd.f32 %v3414_v6, %v3393_v7  ;;  %v3395_v5 = vpop.f32.mrb[18].mxu0 }
 0x91a   : > { %v3397_v8 = vpop.f32.mrb[19].mxu0  ;;  %v3419_v24 = vadd.f32 %v3410_v19, %v3395_v5 }
 0x91b   : > { %v3421_v9 = vsub.f32 0.0, %v3418_v22  ;;  %v3420_v14 = vadd.f32 %v3414_v6, %v3397_v8 }
 0x91d   : > { %v3423_v15 = vmul.f32 1.442695, %v3421_v9  ;;  %v3422_v16 = vsub.f32 0.0, %v3420_v14 }
 0x91f   : > { %5871 = vpow2.f32 %v3423_v15  ;;  %v3425_v33 = vmul.f32 1.442695, %v3422_v16 }
 0x921   : > { %5873 = vpow2.f32 %v3425_v33 }
 0x929   : > { %v5872_v29 = vpop.eup %5871 }
 0x92a   : > { %v3427_v35 = vadd.f32 1.0, %v5872_v29 }
 0x92b   : > { %v5874_v17 = vpop.eup %5873 }
 0x92c   : > { %5875 = vrcp.f32 %v3427_v35  ;;  %v3428_v18 = vadd.f32 1.0, %v5874_v17 }
 0x92e   : > { %5877 = vrcp.f32 %v3428_v18 }
 0x936   : > { %v5876_v23 = vpop.eup %5875 }
 0x937   : > { %v3433_v25 = vmul.f32 %v5876_v23, %v3417_v20 }
 0x938   : > { %v5878_v26 = vpop.eup %5877 }
 0x939   : > { %v3434_v27 = vmul.f32 %v5878_v26, %v3419_v24  ;;  %v3435_v28 = vmax.f32 %v3433_v25, 0.0 }
 0x93b   : > { %v3436_v32 = vmax.f32 %v3434_v27, 0.0  ;;  %v7005_v36 = vadd.f32 %v3435_v28, %v6967_v61  ;;  %v7018_v61 = vld [vmem:[%s7282_s3] sm:$0x3]  ;;  %s6191_s3 = scalar_lea.vmem %s6190_s1, 512 }
 0x93c   : > { %p6193_p13 = scmp.lt.s32.totalorder %s6191_s3, %s6185_s21 }
 0x93d   : > { %v7008_v37 = vadd.f32 %v3436_v32, %v6970_v63  ;;  %v3573_v63 = vrot.slane %v7018_v61, %v6793_v13 }
 0x93e   : > { %p6194_p3 = por %p6193_p13, %p6192_p12 }
 0x93f   : > { %v3567_v38 = vpack.c.bf16 %v7008_v37, %v7005_v36 }
 0x940   : > { %p6195_p7 = pnand %p6194_p3, %p6188_p10 }
 0x941   : > { %3693 = vmatmul.mubr.bf16.vlgmr.msra.gmra.mrb[20].mxu1 %v3567_v38 }
 0x942   : > { %5181 = vmatpush3.bf16.msra.mxu1 %v4148_v39  ;;  %5182 = vmatprep.mubr.msk.bf16.mxu1 %vm6283_vm0, %v6282_v0 }
 0x943   : > { %5186 = vmatprep.subr.bf16.mxu1 %v6282_v0 }
 0xa14   : > { %v3694_v50 = vpop.f32.mrb[20].mxu1 }
 0xa15   : > { %v3695_v10 = vadd.f32 %v3694_v50, %v3573_v63  ;;  %v7026_v59 = vpop.f32.mrb[21].mxu1 }
 0xa16   : > { %v3698_v43 = vpop.f32.mrb[22].mxu1 }
 0xa17   : > { %v3703_v44 = vmax.f32 %v3695_v10, 0.0  ;;  %v3699_v45 = vadd.f32 %v3698_v43, %v3573_v63  ;;  %v7028_v46 = vpop.f32.mrb[23].mxu1 }
 0xa19   : > { %v3707_v48 = vcombine.high %v3703_v44, %v3703_v44  ;;  %v3714_v49 = vrot.slane %v3703_v44, %v3713_v57  ;;  %v3704_v53 = vmax.f32 %v3699_v45, 0.0 }
 0xa1b   : > { %v3721_v54 = vrot.slane %v3707_v48, %v3713_v57  ;;  %v3722_v55 = vcombine.high %v3714_v49, %v3714_v49  ;;  %v3730_v56 = vrot.slane %v3714_v49, %v3713_v57  ;;  %v3756_v58 = vcombine.high %v3704_v53, %v3704_v53 }
 0xa1c   : > { %v3763_v62 = vrot.slane %v3704_v53, %v3713_v57  ;;  %v7050_v53 = vld [vmem:[%s7276_s10 + $0x5] ss:$0 sm:$0xff] }
 0xa1d   : > { %v3723_v1 = vcombine.high %v3721_v54, %v3721_v54  ;;  %v3737_v2 = vrot.slane %v3721_v54, %v3713_v57  ;;  %v3744_v3 = vrot.slane %v3722_v55, %v3713_v57  ;;  %v3752_v21 = vcombine.high %v3730_v56, %v3730_v56 }
 0xa1e   : > { %v3808_v6 = vrot.slane %v3730_v56, %v6793_v13  ;;  %v3770_v52 = vrot.slane %v3756_v58, %v3713_v57  ;;  %v3771_v7 = vcombine.high %v3763_v62, %v3763_v62  ;;  %v3779_v22 = vrot.slane %v3763_v62, %v3713_v57 }
 0xa1f   : > { %v3751_v5 = vrot.slane %v3723_v1, %v3713_v57  ;;  %v3753_v51 = vcombine.high %v3737_v2, %v3737_v2  ;;  %v3754_v8 = vcombine.high %v3744_v3, %v3744_v3  ;;  %v3812_v9 = vrot.slane %v3744_v3, %v6793_v13 }
 0xa20   : > { %v3816_v14 = vrot.slane %v3752_v21, %v6793_v13  ;;  %v3824_v15 = vrot.slane %v3737_v2, %v6793_v13  ;;  %v3885_v16 = vadd.f32 %v3808_v6, %v3550_v60  ;;  %v3772_v33 = vcombine.high %v3770_v52, %v3770_v52 }
 0xa21   : > { %v3755_v29 = vcombine.high %v3751_v5, %v3751_v5  ;;  %v3820_v35 = vrot.slane %v3754_v8, %v6793_v13  ;;  %v3828_v17 = vrot.slane %v3751_v5, %v6793_v13  ;;  %v3886_v18 = vadd.f32 %v3812_v9, %v3550_v60 }
 0xa22   : > { %v3887_v19 = vadd.f32 %v3816_v14, %v3550_v60  ;;  %v3889_v20 = vadd.f32 %v3824_v15, %v3550_v60  ;;  %5879 = vtanh.f32 %v3885_v16  ;;  %v3832_v23 = vrot.slane %v3753_v51, %v6793_v13 }
 0xa23   : > { %v3786_v24 = vrot.slane %v3770_v52, %v3713_v57  ;;  %v3793_v25 = vrot.slane %v3771_v7, %v3713_v57  ;;  %v3800_v26 = vrot.slane %v3772_v33, %v3713_v57  ;;  %5881 = vtanh.f32 %v3886_v18 }
 0xa24   : > { %v3801_v27 = vcombine.high %v3779_v22, %v3779_v22  ;;  %v3840_v28 = vrot.slane %v3779_v22, %v6793_v13  ;;  %v3888_v31 = vadd.f32 %v3820_v35, %v3550_v60  ;;  %v3836_v32 = vrot.slane %v3755_v29, %v6793_v13 }
 0xa25   : > { %v3802_v34 = vcombine.high %v3786_v24, %v3786_v24  ;;  %v3803_v38 = vcombine.high %v3793_v25, %v3793_v25  ;;  %v3804_v39 = vcombine.high %v3800_v26, %v3800_v26  ;;  %5883 = vtanh.f32 %v3887_v19 }
 0xa26   : > { %v3844_v4 = vrot.slane %v3793_v25, %v6793_v13  ;;  %v3848_v40 = vrot.slane %v3801_v27, %v6793_v13  ;;  %v3856_v63 = vrot.slane %v3786_v24, %v6793_v13  ;;  %v3860_v50 = vrot.slane %v3800_v26, %v6793_v13 }
 0xa27   : > { %v3852_v41 = vrot.slane %v3803_v38, %v6793_v13  ;;  %v3864_v42 = vrot.slane %v3802_v34, %v6793_v13  ;;  %v3868_v10 = vrot.slane %v3804_v39, %v6793_v13  ;;  %v3893_v57 = vadd.f32 %v3840_v28, %v3550_v60 }
 0xa28   : > { %v3894_v43 = vadd.f32 %v3844_v4, %v3550_v60  ;;  %v3895_v44 = vadd.f32 %v3848_v40, %v3550_v60  ;;  %v3897_v45 = vadd.f32 %v3856_v63, %v3550_v60  ;;  %v3890_v48 = vadd.f32 %v3828_v17, %v3550_v60 }
 0xa29   : > { %v3896_v47 = vadd.f32 %v3852_v41, %v3550_v60  ;;  %v3898_v49 = vadd.f32 %v3860_v50, %v3550_v60  ;;  %5885 = vtanh.f32 %v3893_v57  ;;  %v3891_v54 = vadd.f32 %v3832_v23, %v3550_v60 }
 0xa2a   : > { %v3899_v55 = vadd.f32 %v3864_v42, %v3550_v60  ;;  %v3892_v56 = vadd.f32 %v3836_v32, %v3550_v60  ;;  %5887 = vtanh.f32 %v3889_v20  ;;  %v3900_v58 = vadd.f32 %v3868_v10, %v3550_v60 }
 0xa2b   : > { %5889 = vtanh.f32 %v3894_v43  ;;  %v3577_v32 = vrot.slane %v7018_v61, %v6839_v30  ;;  %v7073_v57 = vand.u32 127, %v835_v11 }
 0xa2c   : > { %v5880_v62 = vpop.eup %5879  ;;  %5891 = vtanh.f32 %v3888_v31 }
 0xa2d   : > { %v3922_v13 = vmul.f32 %v5880_v62, %v7050_v53  ;;  %v5882_v1 = vpop.eup %5881  ;;  %5893 = vtanh.f32 %v3895_v44  ;;  %v3697_v34 = vadd.f32 %v7026_v59, %v3577_v32  ;;  %v3701_v38 = vadd.f32 %v7028_v46, %v3577_v32 }
 0xa2e   : > { %v3923_v3 = vmul.f32 %v5882_v1, %v7050_v53  ;;  %5895 = vtanh.f32 %v3897_v45  ;;  %v7077_v59 = vsub.s32 %v7073_v57, %v6790_v12  ;;  %vm3989_vm3 = vcmp.eq.s32.totalorder %v7073_v57, 6 }
 0xa2f   : > { %3938 = vadd.xlane.f32.xlu0 %v3922_v13  ;;  %v5884_v2 = vpop.eup %5883  ;;  %5897 = vtanh.f32 %v3890_v48  ;;  %vm3988_vm4 = vcmp.lt.s32.totalorder %v7073_v57, 6 }
 0xa30   : > { %v3924_v60 = vmul.f32 %v5884_v2, %v7050_v53  ;;  %5899 = vtanh.f32 %v3896_v47 }
 0xa31   : > { %5901 = vtanh.f32 %v3891_v54 }
 0xa32   : > { %5903 = vtanh.f32 %v3898_v49 }
 0xa33   : > { %3940 = vadd.xlane.f32.xlu0 %v3923_v3  ;;  %v5886_v21 = vpop.eup %5885  ;;  %5905 = vtanh.f32 %v3892_v56 }
 0xa34   : > { %v5888_v6 = vpop.eup %5887  ;;  %v3930_v52 = vmul.f32 %v5886_v21, %v7050_v53  ;;  %5907 = vtanh.f32 %v3899_v55 }
 0xa35   : > { %v5890_v7 = vpop.eup %5889  ;;  %v3926_v51 = vmul.f32 %v5888_v6, %v7050_v53  ;;  %5909 = vtanh.f32 %v3900_v58 }
 0xa36   : > { %3954 = vadd.xlane.f32.xlu1 %v3930_v52  ;;  %v5892_v22 = vpop.eup %5891  ;;  %v3931_v5 = vmul.f32 %v5890_v7, %v7050_v53 }
 0xa37   : > { %3942 = vadd.xlane.f32.xlu0 %v3924_v60  ;;  %v5894_v8 = vpop.eup %5893  ;;  %v3925_v15 = vmul.f32 %v5892_v22, %v7050_v53 }
 0xa38   : > { %v5896_v9 = vpop.eup %5895  ;;  %v3932_v14 = vmul.f32 %v5894_v8, %v7050_v53 }
 0xa39   : > { %v5898_v16 = vpop.eup %5897  ;;  %v3934_v29 = vmul.f32 %v5896_v9, %v7050_v53 }
 0xa3a   : > { %3956 = vadd.xlane.f32.xlu1 %v3931_v5  ;;  %v5900_v33 = vpop.eup %5899  ;;  %v3927_v35 = vmul.f32 %v5898_v16, %v7050_v53 }
 0xa3b   : > { %3946 = vadd.xlane.f32.xlu0 %v3926_v51  ;;  %v5902_v17 = vpop.eup %5901  ;;  %v3933_v19 = vmul.f32 %v5900_v33, %v7050_v53 }
 0xa3c   : > { %v5904_v18 = vpop.eup %5903  ;;  %v3928_v20 = vmul.f32 %v5902_v17, %v7050_v53 }
 0xa3d   : > { %v5906_v23 = vpop.eup %5905  ;;  %v3935_v24 = vmul.f32 %v5904_v18, %v7050_v53 }
 0xa3e   : > { %3958 = vadd.xlane.f32.xlu1 %v3932_v14  ;;  %v3929_v25 = vmul.f32 %v5906_v23, %v7050_v53  ;;  %v5908_v26 = vpop.eup %5907 }
 0xa3f   : > { %3944 = vadd.xlane.f32.xlu0 %v3925_v15  ;;  %v3936_v27 = vmul.f32 %v5908_v26, %v7050_v53  ;;  %v5910_v28 = vpop.eup %5909 }
 0xa40   : > { %v3937_v31 = vmul.f32 %v5910_v28, %v7050_v53 }
 0xa42   : > { %3962 = vadd.xlane.f32.xlu1 %v3934_v29 }
 0xa43   : > { %3948 = vadd.xlane.f32.xlu0 %v3927_v35 }
 0xa46   : > { %3960 = vadd.xlane.f32.xlu1 %v3933_v19 }
 0xa47   : > { %3950 = vadd.xlane.f32.xlu0 %v3928_v20 }
 0xa4a   : > { %3964 = vadd.xlane.f32.xlu1 %v3935_v24 }
 0xa4b   : > { %3952 = vadd.xlane.f32.xlu0 %v3929_v25 }
 0xa4e   : > { %3966 = vadd.xlane.f32.xlu1 %v3936_v27 }
 0xa52   : > { %3968 = vadd.xlane.f32.xlu1 %v3937_v31 }
 0xa61   : > { %3992 = vperm.xlu0 %5395, %v3697_v34  }
 0xa63   : > { %3997 = vperm.xlu1 %5396, %v3701_v38  }
 0xabc   : > { %v3939_v39 = vpop.xlane.xlu0 %3938 }
 0xabd   : > { %v3970_v46 = vadd.f32 0.16301103, %v3939_v39 }
 0xabf   : > { %v4021_v56 = vrot.slane %v3970_v46, %v7077_v59 }
 0xac0   : > { %v3941_v4 = vpop.xlane.xlu0 %3940 }
 0xac1   : > { %v3971_v30 = vadd.f32 0.16301103, %v3941_v4 }
 0xac3   : > { %v3955_v40 = vpop.xlane.xlu1 %3954  ;;  %v4025_v49 = vrot.slane %v3971_v30, %v7077_v59 }
 0xac4   : > { %v3943_v63 = vpop.xlane.xlu0 %3942  ;;  %v3978_v54 = vadd.f32 0.16301103, %v3955_v40 }
 0xac5   : > { %v3972_v61 = vadd.f32 0.16301103, %v3943_v63  ;;  %v4083_v21 = vsel %vm4082_vm11, %v4025_v49, %v4021_v56 }
 0xac6   : > { %v4053_v60 = vrot.slane %v3978_v54, %v7077_v59 }
 0xac7   : > { %v3957_v41 = vpop.xlane.xlu1 %3956  ;;  %v4029_v11 = vrot.slane %v3972_v61, %v7077_v59 }
 0xac8   : > { %v3947_v50 = vpop.xlane.xlu0 %3946  ;;  %v3979_v53 = vadd.f32 0.16301103, %v3957_v41 }
 0xac9   : > { %v3974_v13 = vadd.f32 0.16301103, %v3947_v50  ;;  %v4085_v7 = vsel %vm4084_vm12, %v4029_v11, %v4083_v21  ;;  %v5824_v21 = vld [vmem:[#allocation11 + $0xc8] sm:$0xff]  }
 0xaca   : > { %v4057_v6 = vrot.slane %v3979_v53, %v7077_v59 }
 0xacb   : > { %v3959_v42 = vpop.xlane.xlu1 %3958  ;;  %v4037_v14 = vrot.slane %v3974_v13, %v7077_v59 }
 0xacc   : > { %v3945_v10 = vpop.xlane.xlu0 %3944  ;;  %v3980_v55 = vadd.f32 0.16301103, %v3959_v42  ;;  %v4096_v29 = vsel %vm4082_vm11, %v4057_v6, %v4053_v60  ;;  %v5825_v6 = vld [vmem:[#allocation11 + $0xd0] sm:$0xff]   ;;  %v5827_v60 = vld [vmem:[#allocation11 + $0xe0] sm:$0xff]  }
 0xacd   : > { %v3973_v45 = vadd.f32 0.16301103, %v3945_v10 }
 0xace   : > { %v4061_v22 = vrot.slane %v3980_v55, %v7077_v59  ;;  %v6287_v55 = vmov 6  }
 0xacf   : > { %v3963_v43 = vpop.xlane.xlu1 %3962  ;;  %v4033_v58 = vrot.slane %v3973_v45, %v7077_v59  ;;  %5397 = vset.pattern.permute.xlu1 %v6287_v55  ;;  %5398 = vset.pattern.permute.xlu0 %v6287_v55 }
 0xad0   : > { %v3949_v44 = vpop.xlane.xlu0 %3948  ;;  %v3982_v15 = vadd.f32 0.16301103, %v3963_v43  ;;  %v4097_v18 = vsel %vm4084_vm12, %v4061_v22, %v4096_v29  ;;  %v5829_v22 = vld [vmem:[#allocation11 + $0xf0] sm:$0xff]  }
 0xad1   : > { %v3975_v12 = vadd.f32 0.16301103, %v3949_v44  ;;  %v4087_v5 = vsel %vm4086_vm13, %v4033_v58, %v4085_v7  ;;  %v5828_v7 = vld [vmem:[#allocation11 + $0xe8] sm:$0xff]  }
 0xad2   : > { %v4089_v19 = vsel %vm4088_vm14, %v4037_v14, %v4087_v5  ;;  %v4069_v25 = vrot.slane %v3982_v15, %v7077_v59  ;;  %v5830_v5 = vld [vmem:[#allocation11 + $0xf8] sm:$0xff]   ;;  %v5835_v15 = vld [vmem:[#allocation14 + $0x20] sm:$0xff]  }
 0xad3   : > { %v3961_v47 = vpop.xlane.xlu1 %3960  ;;  %v4041_v8 = vrot.slane %v3975_v12, %v7077_v59  ;;  %v5834_v14 = vld [vmem:[#allocation14 + $0x18] sm:$0xff]  }
 0xad4   : > { %v3951_v48 = vpop.xlane.xlu0 %3950  ;;  %v3981_v62 = vadd.f32 0.16301103, %v3961_v47 }
 0xad5   : > { %v3976_v2 = vadd.f32 0.16301103, %v3951_v48  ;;  %v4091_v23 = vsel %vm4090_vm15, %v4041_v8, %v4089_v19  ;;  %v5832_v8 = vld [vmem:[#allocation14 + $0x8] sm:$0xff]  }
 0xad6   : > { %v4065_v51 = vrot.slane %v3981_v62, %v7077_v59 }
 0xad7   : > { %v3965_v1 = vpop.xlane.xlu1 %3964  ;;  %v4045_v16 = vrot.slane %v3976_v2, %v7077_v59 }
 0xad8   : > { %v3953_v3 = vpop.xlane.xlu0 %3952  ;;  %v3983_v9 = vadd.f32 0.16301103, %v3965_v1  ;;  %v4098_v20 = vsel %vm4086_vm13, %v4065_v51, %v4097_v18  ;;  %v5831_v51 = vld [vmem:[#allocation14] sm:$0xff]  }
 0xad9   : > { %v3977_v52 = vadd.f32 0.16301103, %v3953_v3  ;;  %v4093_v31 = vsel %vm4092_vm1, %v4045_v16, %v4091_v23  ;;  %v4099_v39 = vsel %vm4088_vm14, %v4069_v25, %v4098_v20  ;;  %v5823_v3 = vld [vmem:[#allocation11 + $0xc0] sm:$0xff]   ;;  %5207 = vmatpush3.bf16.msra.mxu0 %v5831_v51  ;;  %v5836_v16 = vld [vmem:[#allocation14 + $0x28] sm:$0xff]  }
 0xada   : > { %v4073_v24 = vrot.slane %v3983_v9, %v7077_v59  ;;  %5208 = vmatprep.subr.bf16.mxu0 %v6282_v0  ;;  %v5833_v9 = vld [vmem:[#allocation14 + $0x10] sm:$0xff]  }
 0xadb   : > { %v3967_v33 = vpop.xlane.xlu1 %3966  ;;  %v4049_v17 = vrot.slane %v3977_v52, %v7077_v59  ;;  %v5826_v52 = vld [vmem:[#allocation11 + $0xd8] sm:$0xff]  }
 0xadc   : > { %v3984_v35 = vadd.f32 0.16301103, %v3967_v33  ;;  %v4100_v40 = vsel %vm4090_vm15, %v4073_v24, %v4099_v39 }
 0xadd   : > { %v4095_v38 = vsel %vm4094_vm2, %v4049_v17, %v4093_v31  ;;  %5209 = vmatpush3.bf16.msra.mxu0 %v5832_v8  ;;  %v4990_v31 = vld [vmem:[%s7276_s10 + $0x4] ss:$0 sm:$0xff] }
 0xade   : > { %v4077_v26 = vrot.slane %v3984_v35, %v7077_v59  ;;  %5210 = vmatprep.subr.bf16.mxu0 %v6282_v0 }
 0xadf   : > { %v3969_v27 = vpop.xlane.xlu1 %3968 }
 0xae0   : > { %v3993_v28 = vpop.permute.xlu0 %3992  ;;  %v3985_v32 = vadd.f32 0.16301103, %v3969_v27  ;;  %v4101_v42 = vsel %vm4092_vm1, %v4077_v26, %v4100_v40  ;;  %v5837_v27 = vld [vmem:[#allocation14 + $0x30] sm:$0xff]  }
 0xae1   : > { %v4000_v34 = vsel %vm3989_vm3, %v3993_v28, -1e+30  ;;  %5211 = vmatpush3.bf16.msra.mxu0 %v5833_v9  ;;  %v5838_v28 = vld [vmem:[#allocation14 + $0x38] sm:$0xff]  }
 0xae2   : > { %v4105_v4 = vsel %vm3988_vm4, %v4095_v38, %v4000_v34  ;;  %v4081_v63 = vrot.slane %v3985_v32, %v7077_v59  ;;  %5212 = vmatprep.subr.bf16.mxu0 %v6282_v0 }
 0xae3   : > { %v4108_v41 = vsel %vm4107_vm5, %v4105_v4, -inf  ;;  %v3998_v50 = vpop.permute.xlu1 %3997 }
 0xae4   : > { %4109 = vmax.xlane.f32.xlu1 %v4108_v41  ;;  %v4001_v10 = vsel %vm3989_vm3, %v3998_v50, -1e+30  ;;  %v4102_v43 = vsel %vm4094_vm2, %v4081_v63, %v4101_v42  ;;  %v4999_v41 = vld [vmem:[%s7283_s4] ss:$0 sm:$0xff] }
 0xae5   : > { %v4106_v44 = vsel %vm3988_vm4, %v4102_v43, %v4001_v10  ;;  %5213 = vmatpush3.bf16.msra.mxu0 %v5834_v14 }
 0xae6   : > { %v4111_v30 = vsel %vm4107_vm5, %v4106_v44, -inf  ;;  %5214 = vmatprep.subr.bf16.mxu0 %v6282_v0 }
 0xae7   : > { %4112 = vmax.xlane.f32.xlu0 %v4111_v30 }
 0xae9   : > { %5215 = vmatpush3.bf16.msra.mxu0 %v5835_v15 }
 0xaea   : > { %5216 = vmatprep.subr.bf16.mxu0 %v6282_v0 }
 0xaed   : > { %5217 = vmatpush3.bf16.msra.mxu0 %v5836_v16 }
 0xaee   : > { %5218 = vmatprep.subr.bf16.mxu0 %v6282_v0 }
 0xaf1   : > { %5219 = vmatpush3.bf16.msra.mxu0 %v5837_v27 }
 0xaf2   : > { %5220 = vmatprep.subr.bf16.mxu0 %v6282_v0 }
 0xaf5   : > { %5221 = vmatpush3.bf16.msra.mxu0 %v5838_v28 }
 0xb71   : > { %v4110_v61 = vpop.xlane.xlu1 %4109 }
 0xb72   : > { %v4114_v46 = vsub.f32 %v4105_v4, %v4110_v61 }
 0xb74   : > { %v4116_v45 = vmul.f32 1.442695, %v4114_v46  ;;  %v4113_v47 = vpop.xlane.xlu0 %4112 }
 0xb75   : > { %v4115_v59 = vsub.f32 %v4106_v44, %v4113_v47 }
 0xb76   : > { %5911 = vpow2.f32 %v4116_v45 }
 0xb77   : > { %v4118_v48 = vmul.f32 1.442695, %v4115_v59 }
 0xb79   : > { %5913 = vpow2.f32 %v4118_v48 }
 0xb80   : > { %v5912_v49 = vpop.eup %5911 }
 0xb81   : > { %v4120_v53 = vsel %vm4107_vm5, %v5912_v49, 0.0 }
 0xb82   : > { %4121 = vadd.xlane.f32.xlu1 %v4120_v53 }
 0xb83   : > { %v5914_v54 = vpop.eup %5913 }
 0xb84   : > { %v4123_v11 = vsel %vm4107_vm5, %v5914_v54, 0.0 }
 0xb86   : > { %4124 = vadd.xlane.f32.xlu1 %v4123_v11 }
 0xc0f   : > { %v4122_v56 = vpop.xlane.xlu1 %4121 }
 0xc10   : > { %5915 = vrcp.f32 %v4122_v56 }
 0xc13   : > { %v4125_v58 = vpop.xlane.xlu1 %4124 }
 0xc14   : > { %5917 = vrcp.f32 %v4125_v58 }
 0xc1a   : > { %v5916_v62 = vpop.eup %5915 }
 0xc1b   : > { %v4127_v12 = vmul.f32 %v5916_v62, %v5912_v49 }
 0xc1d   : > { %4133 = vperm.xlu1 %5397, %v4127_v12  }
 0xc1e   : > { %v5918_v13 = vpop.eup %5917 }
 0xc1f   : > { %v4129_v1 = vmul.f32 %v5918_v13, %v5914_v54 }
 0xc21   : > { %4138 = vperm.xlu0 %5398, %v4129_v1   ;;  %v4130_v2 = vpack.c.bf16 %v4129_v1, %v4127_v12 }
 0xc23   : > { %5183 = vmatmul.mubr.msk.bf16.vlgmr.msra.gmra.mrb[24].mxu1 %vm4107_vm5, %v4130_v2 }
 0xc24   : > { %5187 = vmatpush3.bf16.msra.mxu1 %v5823_v3  ;;  %5202 = vmatprep.mubr.msk.bf16.mxu1 %vm6283_vm0, %v6282_v0  ;;  %vm4418_vm0 = vcmp.lt.s32.totalorder %v7073_v57, 21 }
 0xc25   : > { %5188 = vmatprep.subr.bf16.mxu1 %v6282_v0 }
 0xc28   : > { %5189 = vmatpush3.bf16.msra.mxu1 %v5824_v21 }
 0xc29   : > { %5190 = vmatprep.subr.bf16.mxu1 %v6282_v0 }
 0xc2c   : > { %5191 = vmatpush3.bf16.msra.mxu1 %v5825_v6 }
 0xc2d   : > { %5192 = vmatprep.subr.bf16.mxu1 %v6282_v0 }
 0xc30   : > { %5193 = vmatpush3.bf16.msra.mxu1 %v5826_v52 }
 0xc31   : > { %5194 = vmatprep.subr.bf16.mxu1 %v6282_v0 }
 0xc34   : > { %5195 = vmatpush3.bf16.msra.mxu1 %v5827_v60 }
 0xc35   : > { %5196 = vmatprep.subr.bf16.mxu1 %v6282_v0 }
 0xc38   : > { %5197 = vmatpush3.bf16.msra.mxu1 %v5828_v7 }
 0xc39   : > { %5198 = vmatprep.subr.bf16.mxu1 %v6282_v0 }
 0xc3c   : > { %5199 = vmatpush3.bf16.msra.mxu1 %v5829_v22 }
 0xc3d   : > { %5200 = vmatprep.subr.bf16.mxu1 %v6282_v0 }
 0xc40   : > { %5201 = vmatpush3.bf16.msra.mxu1 %v5830_v5 }
 0xc9c   : > { %v4134_v33 = vpop.permute.xlu1 %4133 }
 0xc9d   : > { %v4141_v17 = vmul.f32 %v4134_v33, %v7005_v36 }
 0xca0   : > { %v4139_v29 = vpop.permute.xlu0 %4138 }
 0xca1   : > { %v4142_v18 = vmul.f32 %v4139_v29, %v7008_v37 }
 0xcf6   : > { %v4184_v35 = vpop.f32.mrb[24].mxu1 }
 0xcf7   : > { %v5184_v19 = vpop.f32.mrb[25].mxu1  ;;  %v4185_v23 = vadd.f32 %v4184_v35, %v4141_v17 }
 0xcf8   : > { %v4187_v20 = vpop.f32.mrb[26].mxu1 }
 0xcf9   : > { %v4188_v24 = vadd.f32 %v4187_v20, %v4142_v18  ;;  %v5185_v25 = vpop.f32.mrb[27].mxu1 }
 0xcfb   : > { %v4208_v26 = vpack.c.bf16 %v4188_v24, %v4185_v23 }
 0xcfd   : > { %5203 = vmatmul.mubr.bf16.vlgmr.msra.gmra.mrb[28].mxu1 %v4208_v26 }
 0xdd0   : > { %v4296_v36 = vpop.f32.mrb[28].mxu1 }
 0xdd1   : > { %v4297_v32 = vadd.f32 %v4990_v31, %v4296_v36  ;;  %v5204_v37 = vpop.f32.mrb[29].mxu1 }
 0xdd2   : > { %v4299_v34 = vpop.f32.mrb[30].mxu1 }
 0xdd3   : > { %v4300_v38 = vadd.f32 %v4990_v31, %v4299_v34  ;;  %v5205_v39 = vpop.f32.mrb[31].mxu1  ;;  %v4303_v4 = vmax.f32 %v4297_v32, 0.0 }
 0xdd5   : > { %v4304_v40 = vmax.f32 %v4300_v38, 0.0 }
 0xdd7   : > { %v4321_v63 = vpack.c.bf16 %v4304_v40, %v4303_v4 }
 0xdd9   : > { %5223 = vmatmul.mubr.bf16.vlgmr.msra.gmra.mrb[20].mxu0 %v4321_v63 }
 0xeac   : > { %v4411_v0 = vpop.f32.mrb[20].mxu0 }
 0xead   : > { %v4412_v50 = vadd.f32 %v4999_v41, %v4411_v0  ;;  %v5224_v42 = vpop.f32.mrb[21].mxu0 }
 0xeae   : > { %v4414_v10 = vpop.f32.mrb[22].mxu0 }
 0xeaf   : > { %v4415_v43 = vadd.f32 %v4999_v41, %v4414_v10  ;;  %v5225_v44 = vpop.f32.mrb[23].mxu0  ;;  %v4419_v30 = vsel %vm4418_vm0, %v4412_v50, -1e+30 }
 0xeb0   : > { %4421 = vmax.xlane.f32.xlu1 %v4419_v30 }
 0xeb1   : > { %v4420_v61 = vsel %vm4418_vm0, %v4415_v43, -1e+30 }
 0xeb4   : > { %4423 = vmax.xlane.f32.xlu1 %v4420_v61 }
 0xf3d   : > { %v4422_v46 = vpop.xlane.xlu1 %4421 }
 0xf3e   : > { %v4425_v45 = vsub.f32 %v4419_v30, %v4422_v46 }
 0xf40   : > { %v4427_v47 = vmul.f32 1.442695, %v4425_v45 }
 0xf41   : > { %v4424_v59 = vpop.xlane.xlu1 %4423 }
 0xf42   : > { %5919 = vpow2.f32 %v4427_v47  ;;  %v4426_v48 = vsub.f32 %v4420_v61, %v4424_v59 }
 0xf44   : > { %v4429_v49 = vmul.f32 1.442695, %v4426_v48 }
 0xf46   : > { %5921 = vpow2.f32 %v4429_v49 }
 0xf4c   : > { %v5920_v57 = vpop.eup %5919 }
 0xf4d   : > { %4431 = vadd.xlane.f32.xlu1 %v5920_v57 }
 0xf50   : > { %v5922_v53 = vpop.eup %5921 }
 0xf51   : > { %4433 = vadd.xlane.f32.xlu0 %v5922_v53 }
 0xfda   : > { %v4432_v54 = vpop.xlane.xlu1 %4431 }
 0xfdb   : > { %5923 = vlog2.f32 %v4432_v54 }
 0xfde   : > { %v4434_v11 = vpop.xlane.xlu0 %4433 }
 0xfdf   : > { %5925 = vlog2.f32 %v4434_v11 }
 0xfe5   : > { %v5924_v55 = vpop.eup %5923 }
 0xfe6   : > { %v4436_v56 = vmul.f32 0.6931472, %v5924_v55 }
 0xfe8   : > { %v4439_v58 = vsub.f32 %v4425_v45, %v4436_v56 }
 0xfe9   : > { %v5926_v62 = vpop.eup %5925 }
 0xfea   : > { %4441 = vst [vmem:[%s613_s25] sm:$0xff] %v4439_v58  ;;  %v4438_v12 = vmul.f32 0.6931472, %v5926_v62 }
 0xfec   : > { %v4440_v13 = vsub.f32 %v4426_v48, %v4438_v12 }
 0xfee   : > { %4442 = vst [vmem:[%s613_s25 + $0x8] sm:$0xff] %v4440_v13 }
 0xfef   : > { %6198 = shalt.err (!%p6195_p7)
}
 0xff0   : > { %s6199_s20 = scalar_lea.hbm %s7153_s30, 256  ;;  %s6203_s12 = scalar_lea.hbm %s7284_s7, 512 }
 0xff1   : > { %p6200_p4 = scmp.ne.s32.totalorder %s7153_s30, %s6199_s20  ;;  %p6204_p11 = scmp.lt.u32.totalorder %s7153_s30, %s7284_s7 }
 0xff2   : > { %p6205_p6 = scmp.lt.u32.totalorder %s6203_s12, %s6199_s20  ;;  %p6207_p0 = scmp.lt.u32.totalorder %s6199_s20, %s7153_s30 }
 0xff3   : > { %p6201_p5 = pnand %p6200_p4, %p7285_p1 }
 0xff4   : > { %p6206_p2 = por %p6205_p6, %p6204_p11 }
 0xff5   : > { %p6202_p9 = pneg %p6201_p5 }
 0xff6   : > { %p6208_p8 = por %p6207_p0, %p6206_p2 }
 0xff8   : > { %p6209_p10 = pnand %p6208_p8, %p6202_p9 }
 0xffa   : > { %6212 = shalt.err (!%p6209_p10)
}
 0xffb   : > { %s6289_s17 = smov 128   ;;  %s6290_s5 = smov 8  }
 0xffc   : > { %5296 = dma.vmem_to_hbm [thread:$0]  (%p7285_p1), %s7148_s16, 256, %s7153_s30, %s4444_s15, %s6289_s17, %s6289_s17, %s6290_s5  }
 0xffd PF: > { %s7286_s4 = sld [smem:[#allocation24_spill]]  ;;  %s7287_s25 = sld [smem:[#allocation28_spill]] }
 0xffe   : > { %p7289_p13 = scmp.ge.s32.totalorder %s6267_s28, 2 }
0x1003   : > { %s4472_s24 = sand.u32 1, %s7286_s4   ;;  %p7288_p12 = scmp.ne.s32.totalorder %s7287_s25, 0 }
0x1004   : > { %s4473_s18 = scalar_lea.sflag [#allocation4], %s4472_s24 }
0x1005   : > { %p5328_p3 = pnand %p7289_p13, %p7288_p12 }
0x1007   : > { %6250 = dma.done.wait (!%p5328_p3), %s4473_s18, 256  }
0x1008   : > { %6252 = vsyncadd (!%p5328_p3), %s4473_s18, 4294967040  ;;  %s7290_s28 = sld [smem:[#allocation26_spill]]  ;;  %s7291_s9 = sld [smem:[#allocation25_spill]] }
0x1009   : > { %s7292_s27 = sld [smem:[#allocation27_spill]]  ;;  %s7293_s25 = smov %s6259_s26 }
0x100e   : > { %p32_p7 = scmp.ge.s32.totalorder %s7290_s28, 4   ;;  %s7294_s26 = smov %s7291_s9 }
0x1010   :  { %34 = sbr.rel (!%p32_p7) target bundleno = 21 (0x15), region = 186 }
0x1017   :  { %4478 = vsyncpa [#allocation3], 1 }
0x1018   :  { %4480 = vsyncpa [#allocation3 + $0x1], 1 }
0x1019   :  { %4481 = vsyncpa [#allocation6], 1 }
0x101a   :  { %4483 = vsyncpa [#allocation6 + $0x1], 1 }
0x101b   :  { %4484 = vsyncpa [#allocation9], 1 }
0x101c   :  { %4485 = vsyncpa [#allocation12], 1 }
0x101d   :  { %4486 = vsyncpa [#allocation15], 1 }
0x101e   :  { %4487 = vsyncpa [#allocation4], 1 }
0x101f   :  { %4489 = vsyncpa [#allocation4 + $0x1], 1 }

</bundles_post_ra>
